<compile_context>
chip_gen: v6e
topology: v6e:2x2x1
jax: 0.10.0
libtpu: 0.0.40
codegen_flags: <defaults>
</compile_context>

<pallas_src>
import functools

import numpy as np
import jax
import jax.numpy as jnp
from jax.experimental import pallas as pl
from jax.experimental.pallas import tpu as pltpu


MLP_ORDER = ("phi_e", "att_x", "phi_x", "att_u", "phi_u", "mlp_out")
N_GRAPH_INPUTS = 7   # x0, u0, src_oh, dest_oh, dest_t, batch_oh, batch_t
FOUT_PAD = 128       # lane-dense readout width


# ----------------------------- fused kernel --------------------------------

def make_fused_kernel(spec, n_weights):
    """One grid step = one full GNN step; grid axis 0 = step index (sequential,
    carries x/u state in VMEM scratch -> must stay 'arbitrary')."""

    def kernel(*refs):
        (x0_ref, u0_ref, src_oh_ref, dest_oh_ref, dest_t_ref,
         batch_oh_ref, batch_t_ref) = refs[:N_GRAPH_INPUTS]
        w_refs = refs[N_GRAPH_INPUTS:N_GRAPH_INPUTS + n_weights]
        out_ref = refs[N_GRAPH_INPUTS + n_weights]
        x_state, u_state = refs[N_GRAPH_INPUTS + n_weights + 1:]

        s = pl.program_id(0)

        @pl.when(s == 0)
        def _():
            x_state[...] = x0_ref[...]
            u_state[...] = u0_ref[...]

        f32 = jnp.float32

        def dot(a, b):
            return jnp.dot(a, b, preferred_element_type=f32)

        def wdot(a, idx):
            # weight loaded at point of use: keeps the vld adjacent to the
            # consuming vmatmul (short live ranges, no spills as dims grow)
            return dot(a, w_refs[idx][...])

        def bias(idx):
            return w_refs[idx][...]            # shape (1, H), broadcasts

        def finish(pre, mlp_spec, final_act="none"):
            """`pre` = first-layer output (bias already added)."""
            y = pre
            for li in range(1, len(mlp_spec)):
                y = jnp.maximum(y, 0.0)
                (w_idx,), b_idx = mlp_spec[li]
                y = wdot(y, w_idx) + bias(b_idx)
            if final_act == "sigmoid":
                y = jax.nn.sigmoid(y)
            return y

        spec_e, spec_ax, spec_x, spec_au, spec_u, spec_o = spec

        x = x_state[...]                                    # [Nn, f_x]
        u = u_state[...]                                    # [Ng, f_u]

        # structure matrices: big ones stored bf16 (exact 0/1), cast on load
        src_oh = src_oh_ref[...].astype(f32)                # [Ep, Nn]
        dest_oh = dest_oh_ref[...].astype(f32)              # [Ep, Nn]
        dest_t = dest_t_ref[...].astype(f32)                # [Nn, Ep]
        batch_oh = batch_oh_ref[...]                        # [Nn, Ng] (f32)
        batch_t = batch_t_ref[...]                          # [Ng, Nn] (f32)

        u_b = dot(batch_oh, u)                              # [Nn, f_u] = u[batch]

        # --- EdgeModel_NoMem: e = phi_e([x[src], x[dest], u[batch[src]]]) ---
        # project-then-gather: per-node projections, one gather dot per side.
        (i_exs, i_exd, i_eu), i_eb = spec_e[0]
        p_src = wdot(x, i_exs) + wdot(u_b, i_eu)            # [Nn, H]
        p_dst = wdot(x, i_exd)                              # [Nn, H]
        pre_e = dot(src_oh, p_src) + dot(dest_oh, p_dst) + bias(i_eb)
        e = finish(pre_e, spec_e)                           # [Ep, f_e]

        # --- NodeModel_A: sigmoid attention over incoming edges ---
        (i_axd, i_ae, i_au), i_ab = spec_ax[0]
        p_att = wdot(x, i_axd) + wdot(u_b, i_au)            # [Nn, h]
        pre_a = dot(dest_oh, p_att) + wdot(e, i_ae) + bias(i_ab)
        a = finish(pre_a, spec_ax, "sigmoid")               # [Ep, f_e]
        # padded edge rows have zero dest_t columns -> contribute nothing
        # (valid only while attention stays unnormalized sigmoid gating)
        e_agg = dot(dest_t, e * a)                          # [Nn, f_e]

        (i_xx, i_xe, i_xu), i_xb = spec_x[0]
        pre_x = wdot(x, i_xx) + wdot(e_agg, i_xe) + wdot(u_b, i_xu) + bias(i_xb)
        x_new = finish(pre_x, spec_x)                       # [Nn, f_x]

        # --- GlobalModel_NodeOnly_A: sigmoid attention over nodes ---
        (i_gx, i_gu), i_gb = spec_au[0]
        pre_g = wdot(x_new, i_gx) + wdot(u_b, i_gu) + bias(i_gb)
        ga = finish(pre_g, spec_au, "sigmoid")              # [Nn, f_x]
        x_agg = dot(batch_t, x_new * ga)                    # [Ng, f_x]

        (i_ux, i_uu), i_ub = spec_u[0]
        pre_u = wdot(x_agg, i_ux) + wdot(u, i_uu) + bias(i_ub)
        u_new = finish(pre_u, spec_u)                       # [Ng, f_u]

        # --- readout (lane-dense, 128 padded output columns) ---
        (i_o,), i_ob = spec_o[0]
        pre_o = wdot(u_new, i_o) + bias(i_ob)
        out = finish(pre_o, spec_o)                         # [Ng, FOUT_PAD]

        x_state[...] = x_new
        u_state[...] = u_new
        out_ref[s] = out

    return kernel


# ------------------------- parameter initialization ------------------------

def init_linear(key, f_in, f_out):
    kw, kb = jax.random.split(key)
    w = jax.random.normal(kw, (f_in, f_out), jnp.float32) / jnp.sqrt(float(f_in))
    b = 0.01 * jax.random.normal(kb, (f_out,), jnp.float32)
    return (w, b)


def init_mlp(key, f_in, hidden, f_out):
    sizes = [f_in] + list(hidden) + [f_out]
    keys = jax.random.split(key, len(sizes) - 1)
    return [init_linear(k, a, b) for k, a, b in zip(keys, sizes[:-1], sizes[1:])]


def init_n_gnn_a(key, mlp_layers, f_e, f_x, f_u, h, f_out):
    ks = jax.random.split(key, 6)
    return {
        "phi_e": init_mlp(ks[0], 2 * f_x + f_u, mlp_layers, f_e),
        "att_x": init_mlp(ks[1], f_x + f_e + f_u, (h,), f_e),
        "phi_x": init_mlp(ks[2], f_x + f_e + f_u, mlp_layers, f_x),
        "att_u": init_mlp(ks[3], f_x + f_u, (h,), f_x),
        "phi_u": init_mlp(ks[4], f_x + f_u, mlp_layers, f_u),
        "mlp_out": init_mlp(ks[5], f_u, mlp_layers, f_out),
    }


# --------------------- host-side (hoisted) preprocessing ---------------------

def build_graph_matrices(edge_index, batch, Nn, Ng):
    """Built ONCE on host (numpy), outside the jitted forward.  Edge dim is
    zero-padded to a lane-dense multiple of 128; the large O(Ep*Nn) matrices
    are stored in bf16 (0/1 exact)."""
    edge_index = np.asarray(edge_index)
    batch = np.asarray(batch)
    E = edge_index.shape[1]
    Ep = max(128, ((E + 127) // 128) * 128)
    src, dest = edge_index[0], edge_index[1]

    src_oh = np.zeros((Ep, Nn), np.float32)
    src_oh[np.arange(E), src] = 1.0
    dest_oh = np.zeros((Ep, Nn), np.float32)
    dest_oh[np.arange(E), dest] = 1.0
    batch_oh = np.zeros((Nn, Ng), np.float32)
    batch_oh[np.arange(Nn), batch] = 1.0

    return {
        "src_oh": jnp.asarray(src_oh, jnp.bfloat16),
        "dest_oh": jnp.asarray(dest_oh, jnp.bfloat16),
        "dest_t": jnp.asarray(dest_oh.T, jnp.bfloat16),
        "batch_oh": jnp.asarray(batch_oh, jnp.float32),
        "batch_t": jnp.asarray(batch_oh.T, jnp.float32),
    }


def pad_readout(params, fout_pad):
    """Zero-pad the last mlp_out layer to `fout_pad` lanes (lane-dense store)."""
    layers = list(params["mlp_out"])
    w, b = layers[-1]
    w = jnp.pad(w, ((0, 0), (0, fout_pad - w.shape[1])))
    b = jnp.pad(b, (0, fout_pad - b.shape[0]))
    layers[-1] = (w, b)
    return {**params, "mlp_out": layers}


def pack_params(params, f_e, f_x, f_u):
    """Split each first-layer W by concat-part (on host) and flatten all
    weights/biases into one list of 2-D arrays + a static index spec."""
    split_dims = {
        "phi_e": (f_x, f_x, f_u),      # [x_src, x_dest, u[batch[src]]]
        "att_x": (f_x, f_e, f_u),      # [x_dest, e, u[batch[dest]]]
        "phi_x": (f_x, f_e, f_u),      # [x, e_agg, u[batch]]
        "att_u": (f_x, f_u),           # [x, u[batch]]
        "phi_u": (f_x, f_u),           # [x_agg, u]
        "mlp_out": (f_u,),             # [u]
    }
    flat, spec = [], []
    for name in MLP_ORDER:
        layers = params[name]
        mlp_spec = []
        w1, b1 = layers[0]
        part_idx, off = [], 0
        for d in split_dims[name]:
            flat.append(w1[off:off + d, :])
            part_idx.append(len(flat) - 1)
            off += d
        assert off == w1.shape[0]
        flat.append(b1.reshape(1, -1))
        mlp_spec.append((tuple(part_idx), len(flat) - 1))
        for li in range(1, len(layers)):
            w, b = layers[li]
            flat.append(w)
            w_idx = len(flat) - 1
            flat.append(b.reshape(1, -1))
            mlp_spec.append(((w_idx,), len(flat) - 1))
        spec.append(tuple(mlp_spec))
    return flat, tuple(spec)


# ------------------------------- forward ------------------------------------

def n_gnn_a_forward(flat_w, graph, x, u, *, spec, N, f_out):
    Nn, f_x = x.shape
    Ng, f_u = u.shape
    fout_p = flat_w[spec[-1][-1][1]].shape[-1]   # padded readout width

    inputs = [x, u, graph["src_oh"], graph["dest_oh"], graph["dest_t"],
              graph["batch_oh"], graph["batch_t"]] + list(flat_w)
    assert all(a.ndim == 2 for a in inputs)
    # every operand is a single full-array block, resident for the whole call
    in_specs = [pl.BlockSpec(a.shape, lambda s: (0, 0)) for a in inputs]

    out = pl.pallas_call(
        make_fused_kernel(spec, len(flat_w)),
        out_shape=jax.ShapeDtypeStruct((N, Ng, fout_p), jnp.float32),
        grid_spec=pltpu.PrefetchScalarGridSpec(
            num_scalar_prefetch=0,
            grid=(N,),                                   # sequential GNN steps
            in_specs=in_specs,
            out_specs=pl.BlockSpec((N, Ng, fout_p), lambda s: (0, 0, 0)),
            scratch_shapes=[pltpu.VMEM((Nn, f_x), jnp.float32),   # node state
                            pltpu.VMEM((Ng, f_u), jnp.float32)],  # global state
        ),
        compiler_params=pltpu.CompilerParams(
            dimension_semantics=("arbitrary",)),         # step axis carries state
    )(*inputs)

    return [out[i, :, :f_out] for i in range(N)]


# --------------------------- pure-JAX reference ------------------------------

def reference_forward(params, x, edge_index, u, batch, N):
    src, dest = edge_index[0], edge_index[1]
    Nn, Ng = x.shape[0], u.shape[0]

    def mlp(layers, v, final_act="none"):
        n = len(layers)
        for i, (w, b) in enumerate(layers):
            v = jnp.dot(v, w, precision=jax.lax.Precision.HIGHEST) + b
            if i < n - 1:
                v = jnp.maximum(v, 0.0)
            elif final_act == "sigmoid":
                v = jax.nn.sigmoid(v)
        return v

    outs = []
    for _ in range(N):
        u_b = u[batch]
        e = mlp(params["phi_e"], jnp.concatenate([x[src], x[dest], u_b[src]], 1))
        a = mlp(params["att_x"], jnp.concatenate([x[dest], e, u_b[dest]], 1), "sigmoid")
        e_agg = jax.ops.segment_sum(e * a, dest, num_segments=Nn)
        x = mlp(params["phi_x"], jnp.concatenate([x, e_agg, u_b], 1))
        ga = mlp(params["att_u"], jnp.concatenate([x, u[batch]], 1), "sigmoid")
        x_agg = jax.ops.segment_sum(x * ga, batch, num_segments=Ng)
        u = mlp(params["phi_u"], jnp.concatenate([x_agg, u], 1))
        outs.append(mlp(params["mlp_out"], u))
    return outs


# --------------------------------- main -------------------------------------

if __name__ == "__main__":
    B, n_obj = 2, 8                      # 2 graphs, 8 nodes each
    f_e, f_x, f_u, h, f_out = 16, 16, 16, 32, 8
    mlp_layers = (32, 32)
    N_steps = 2

    key = jax.random.PRNGKey(0)
    k_par, k_x, k_u = jax.random.split(key, 3)

    params = init_n_gnn_a(k_par, mlp_layers, f_e, f_x, f_u, h, f_out)

    # fully-connected directed graphs (no self-loops)
    srcs, dests = [], []
    for b in range(B):
        for i in range(n_obj):
            for j in range(n_obj):
                if i != j:
                    srcs.append(b * n_obj + i)
                    dests.append(b * n_obj + j)
    edge_index = np.array([srcs, dests], dtype=np.int32)            # [2, 112]
    batch = np.repeat(np.arange(B, dtype=np.int32), n_obj)          # [16]

    x = jax.random.normal(k_x, (B * n_obj, f_x), jnp.float32)       # [16, 16]
    u = jax.random.normal(k_u, (B, f_u), jnp.float32)               # [2, 16]

    # host preprocessing hoisted out of the jitted forward (built once)
    graph = build_graph_matrices(edge_index, batch, B * n_obj, B)
    flat_w, spec = pack_params(pad_readout(params, FOUT_PAD), f_e, f_x, f_u)
    flat_w = tuple(flat_w)

    fwd = jax.jit(functools.partial(n_gnn_a_forward,
                                    spec=spec, N=N_steps, f_out=f_out))
    outs = jax.block_until_ready(fwd(flat_w, graph, x, u))

    assert len(outs) == N_steps
    for o in outs:
        assert o.shape == (B, f_out) and o.dtype == jnp.float32
        assert bool(jnp.all(jnp.isfinite(o)))

    # numerical check against a pure-JAX reference of the same semantics
    refs = reference_forward(params, jnp.asarray(x), jnp.asarray(edge_index),
                             jnp.asarray(u), jnp.asarray(batch), N_steps)
    for o, r in zip(outs, refs):
        assert np.allclose(np.asarray(o), np.asarray(r), rtol=2e-2, atol=2e-2), (
            float(np.max(np.abs(np.asarray(o) - np.asarray(r)))))

    print("KERNEL_OK")
</pallas_src>

<mosaic_0001>
module attributes {stable_mosaic.version = 11 : i64} {
  func.func @kernel(%arg0: i32, %arg1: memref<16x16xf32, #tpu.memory_space<vmem>>, %arg2: memref<2x16xf32, #tpu.memory_space<vmem>>, %arg3: memref<128x16xbf16, #tpu.memory_space<vmem>>, %arg4: memref<128x16xbf16, #tpu.memory_space<vmem>>, %arg5: memref<16x128xbf16, #tpu.memory_space<vmem>>, %arg6: memref<16x2xf32, #tpu.memory_space<vmem>>, %arg7: memref<2x16xf32, #tpu.memory_space<vmem>>, %arg8: memref<16x32xf32, #tpu.memory_space<vmem>>, %arg9: memref<16x32xf32, #tpu.memory_space<vmem>>, %arg10: memref<16x32xf32, #tpu.memory_space<vmem>>, %arg11: memref<1x32xf32, #tpu.memory_space<vmem>>, %arg12: memref<32x32xf32, #tpu.memory_space<vmem>>, %arg13: memref<1x32xf32, #tpu.memory_space<vmem>>, %arg14: memref<32x16xf32, #tpu.memory_space<vmem>>, %arg15: memref<1x16xf32, #tpu.memory_space<vmem>>, %arg16: memref<16x32xf32, #tpu.memory_space<vmem>>, %arg17: memref<16x32xf32, #tpu.memory_space<vmem>>, %arg18: memref<16x32xf32, #tpu.memory_space<vmem>>, %arg19: memref<1x32xf32, #tpu.memory_space<vmem>>, %arg20: memref<32x16xf32, #tpu.memory_space<vmem>>, %arg21: memref<1x16xf32, #tpu.memory_space<vmem>>, %arg22: memref<16x32xf32, #tpu.memory_space<vmem>>, %arg23: memref<16x32xf32, #tpu.memory_space<vmem>>, %arg24: memref<16x32xf32, #tpu.memory_space<vmem>>, %arg25: memref<1x32xf32, #tpu.memory_space<vmem>>, %arg26: memref<32x32xf32, #tpu.memory_space<vmem>>, %arg27: memref<1x32xf32, #tpu.memory_space<vmem>>, %arg28: memref<32x16xf32, #tpu.memory_space<vmem>>, %arg29: memref<1x16xf32, #tpu.memory_space<vmem>>, %arg30: memref<16x32xf32, #tpu.memory_space<vmem>>, %arg31: memref<16x32xf32, #tpu.memory_space<vmem>>, %arg32: memref<1x32xf32, #tpu.memory_space<vmem>>, %arg33: memref<32x16xf32, #tpu.memory_space<vmem>>, %arg34: memref<1x16xf32, #tpu.memory_space<vmem>>, %arg35: memref<16x32xf32, #tpu.memory_space<vmem>>, %arg36: memref<16x32xf32, #tpu.memory_space<vmem>>, %arg37: memref<1x32xf32, #tpu.memory_space<vmem>>, %arg38: memref<32x32xf32, #tpu.memory_space<vmem>>, %arg39: memref<1x32xf32, #tpu.memory_space<vmem>>, %arg40: memref<32x16xf32, #tpu.memory_space<vmem>>, %arg41: memref<1x16xf32, #tpu.memory_space<vmem>>, %arg42: memref<16x32xf32, #tpu.memory_space<vmem>>, %arg43: memref<1x32xf32, #tpu.memory_space<vmem>>, %arg44: memref<32x32xf32, #tpu.memory_space<vmem>>, %arg45: memref<1x32xf32, #tpu.memory_space<vmem>>, %arg46: memref<32x128xf32, #tpu.memory_space<vmem>>, %arg47: memref<1x128xf32, #tpu.memory_space<vmem>>, %arg48: memref<2x2x128xf32, #tpu.memory_space<vmem>>, %arg49: memref<16x16xf32, #tpu.memory_space<vmem>>, %arg50: memref<2x16xf32, #tpu.memory_space<vmem>>) attributes {dimension_semantics = [#tpu.dimension_semantics<arbitrary>], iteration_bounds = array<i64: 2>, scalar_prefetch = 0 : i64, scratch_operands = 2 : i64, tpu.core_type = #tpu.core_type<tc>, window_params = [{pipeline_mode = #tpu.pipeline_mode<synchronous>, transform_indices = @transform_0, window_bounds = array<i64: 16, 16>}, {pipeline_mode = #tpu.pipeline_mode<synchronous>, transform_indices = @transform_1, window_bounds = array<i64: 2, 16>}, {pipeline_mode = #tpu.pipeline_mode<synchronous>, transform_indices = @transform_2, window_bounds = array<i64: 128, 16>}, {pipeline_mode = #tpu.pipeline_mode<synchronous>, transform_indices = @transform_3, window_bounds = array<i64: 128, 16>}, {pipeline_mode = #tpu.pipeline_mode<synchronous>, transform_indices = @transform_4, window_bounds = array<i64: 16, 128>}, {pipeline_mode = #tpu.pipeline_mode<synchronous>, transform_indices = @transform_5, window_bounds = array<i64: 16, 2>}, {pipeline_mode = #tpu.pipeline_mode<synchronous>, transform_indices = @transform_6, window_bounds = array<i64: 2, 16>}, {pipeline_mode = #tpu.pipeline_mode<synchronous>, transform_indices = @transform_7, window_bounds = array<i64: 16, 32>}, {pipeline_mode = #tpu.pipeline_mode<synchronous>, transform_indices = @transform_8, window_bounds = array<i64: 16, 32>}, {pipeline_mode = #tpu.pipeline_mode<synchronous>, transform_indices = @transform_9, window_bounds = array<i64: 16, 32>}, {pipeline_mode = #tpu.pipeline_mode<synchronous>, transform_indices = @transform_10, window_bounds = array<i64: 1, 32>}, {pipeline_mode = #tpu.pipeline_mode<synchronous>, transform_indices = @transform_11, window_bounds = array<i64: 32, 32>}, {pipeline_mode = #tpu.pipeline_mode<synchronous>, transform_indices = @transform_12, window_bounds = array<i64: 1, 32>}, {pipeline_mode = #tpu.pipeline_mode<synchronous>, transform_indices = @transform_13, window_bounds = array<i64: 32, 16>}, {pipeline_mode = #tpu.pipeline_mode<synchronous>, transform_indices = @transform_14, window_bounds = array<i64: 1, 16>}, {pipeline_mode = #tpu.pipeline_mode<synchronous>, transform_indices = @transform_15, window_bounds = array<i64: 16, 32>}, {pipeline_mode = #tpu.pipeline_mode<synchronous>, transform_indices = @transform_16, window_bounds = array<i64: 16, 32>}, {pipeline_mode = #tpu.pipeline_mode<synchronous>, transform_indices = @transform_17, window_bounds = array<i64: 16, 32>}, {pipeline_mode = #tpu.pipeline_mode<synchronous>, transform_indices = @transform_18, window_bounds = array<i64: 1, 32>}, {pipeline_mode = #tpu.pipeline_mode<synchronous>, transform_indices = @transform_19, window_bounds = array<i64: 32, 16>}, {pipeline_mode = #tpu.pipeline_mode<synchronous>, transform_indices = @transform_20, window_bounds = array<i64: 1, 16>}, {pipeline_mode = #tpu.pipeline_mode<synchronous>, transform_indices = @transform_21, window_bounds = array<i64: 16, 32>}, {pipeline_mode = #tpu.pipeline_mode<synchronous>, transform_indices = @transform_22, window_bounds = array<i64: 16, 32>}, {pipeline_mode = #tpu.pipeline_mode<synchronous>, transform_indices = @transform_23, window_bounds = array<i64: 16, 32>}, {pipeline_mode = #tpu.pipeline_mode<synchronous>, transform_indices = @transform_24, window_bounds = array<i64: 1, 32>}, {pipeline_mode = #tpu.pipeline_mode<synchronous>, transform_indices = @transform_25, window_bounds = array<i64: 32, 32>}, {pipeline_mode = #tpu.pipeline_mode<synchronous>, transform_indices = @transform_26, window_bounds = array<i64: 1, 32>}, {pipeline_mode = #tpu.pipeline_mode<synchronous>, transform_indices = @transform_27, window_bounds = array<i64: 32, 16>}, {pipeline_mode = #tpu.pipeline_mode<synchronous>, transform_indices = @transform_28, window_bounds = array<i64: 1, 16>}, {pipeline_mode = #tpu.pipeline_mode<synchronous>, transform_indices = @transform_29, window_bounds = array<i64: 16, 32>}, {pipeline_mode = #tpu.pipeline_mode<synchronous>, transform_indices = @transform_30, window_bounds = array<i64: 16, 32>}, {pipeline_mode = #tpu.pipeline_mode<synchronous>, transform_indices = @transform_31, window_bounds = array<i64: 1, 32>}, {pipeline_mode = #tpu.pipeline_mode<synchronous>, transform_indices = @transform_32, window_bounds = array<i64: 32, 16>}, {pipeline_mode = #tpu.pipeline_mode<synchronous>, transform_indices = @transform_33, window_bounds = array<i64: 1, 16>}, {pipeline_mode = #tpu.pipeline_mode<synchronous>, transform_indices = @transform_34, window_bounds = array<i64: 16, 32>}, {pipeline_mode = #tpu.pipeline_mode<synchronous>, transform_indices = @transform_35, window_bounds = array<i64: 16, 32>}, {pipeline_mode = #tpu.pipeline_mode<synchronous>, transform_indices = @transform_36, window_bounds = array<i64: 1, 32>}, {pipeline_mode = #tpu.pipeline_mode<synchronous>, transform_indices = @transform_37, window_bounds = array<i64: 32, 32>}, {pipeline_mode = #tpu.pipeline_mode<synchronous>, transform_indices = @transform_38, window_bounds = array<i64: 1, 32>}, {pipeline_mode = #tpu.pipeline_mode<synchronous>, transform_indices = @transform_39, window_bounds = array<i64: 32, 16>}, {pipeline_mode = #tpu.pipeline_mode<synchronous>, transform_indices = @transform_40, window_bounds = array<i64: 1, 16>}, {pipeline_mode = #tpu.pipeline_mode<synchronous>, transform_indices = @transform_41, window_bounds = array<i64: 16, 32>}, {pipeline_mode = #tpu.pipeline_mode<synchronous>, transform_indices = @transform_42, window_bounds = array<i64: 1, 32>}, {pipeline_mode = #tpu.pipeline_mode<synchronous>, transform_indices = @transform_43, window_bounds = array<i64: 32, 32>}, {pipeline_mode = #tpu.pipeline_mode<synchronous>, transform_indices = @transform_44, window_bounds = array<i64: 1, 32>}, {pipeline_mode = #tpu.pipeline_mode<synchronous>, transform_indices = @transform_45, window_bounds = array<i64: 32, 128>}, {pipeline_mode = #tpu.pipeline_mode<synchronous>, transform_indices = @transform_46, window_bounds = array<i64: 1, 128>}, {pipeline_mode = #tpu.pipeline_mode<synchronous>, transform_indices = @transform_47, window_bounds = array<i64: 2, 2, 128>}]} {
    %c0_i32 = arith.constant 0 : i32
    %0 = arith.cmpi eq, %arg0, %c0_i32 : i32
    %1 = arith.extui %0 : i1 to i32
    %c0_i32_0 = arith.constant 0 : i32
    %2 = arith.cmpi ne, %1, %c0_i32_0 : i32
    scf.if %2 {
      %c0_141 = arith.constant 0 : index
      %c0_142 = arith.constant 0 : index
      %161 = vector.load %arg1[%c0_141, %c0_142] : memref<16x16xf32, #tpu.memory_space<vmem>>, vector<16x16xf32>
      %c0_143 = arith.constant 0 : index
      %c0_144 = arith.constant 0 : index
      %162 = vector.load %arg49[%c0_143, %c0_144] : memref<16x16xf32, #tpu.memory_space<vmem>>, vector<16x16xf32>
      tpu.vector_store %arg49[%c0_143, %c0_144], %161 {strides = array<i32>} : memref<16x16xf32, #tpu.memory_space<vmem>>, vector<16x16xf32>,
      %c0_145 = arith.constant 0 : index
      %c0_146 = arith.constant 0 : index
      %163 = vector.load %arg2[%c0_145, %c0_146] : memref<2x16xf32, #tpu.memory_space<vmem>>, vector<2x16xf32>
      %c0_147 = arith.constant 0 : index
      %c0_148 = arith.constant 0 : index
      %164 = vector.load %arg50[%c0_147, %c0_148] : memref<2x16xf32, #tpu.memory_space<vmem>>, vector<2x16xf32>
      tpu.vector_store %arg50[%c0_147, %c0_148], %163 {strides = array<i32>} : memref<2x16xf32, #tpu.memory_space<vmem>>, vector<2x16xf32>,
    } else {
    }
    %c0 = arith.constant 0 : index
    %c0_1 = arith.constant 0 : index
    %3 = vector.load %arg49[%c0, %c0_1] : memref<16x16xf32, #tpu.memory_space<vmem>>, vector<16x16xf32>
    %c0_2 = arith.constant 0 : index
    %c0_3 = arith.constant 0 : index
    %4 = vector.load %arg50[%c0_2, %c0_3] : memref<2x16xf32, #tpu.memory_space<vmem>>, vector<2x16xf32>
    %c0_4 = arith.constant 0 : index
    %c0_5 = arith.constant 0 : index
    %5 = vector.load %arg3[%c0_4, %c0_5] : memref<128x16xbf16, #tpu.memory_space<vmem>>, vector<128x16xbf16>
    %6 = arith.extf %5 : vector<128x16xbf16> to vector<128x16xf32>
    %c0_6 = arith.constant 0 : index
    %c0_7 = arith.constant 0 : index
    %7 = vector.load %arg4[%c0_6, %c0_7] : memref<128x16xbf16, #tpu.memory_space<vmem>>, vector<128x16xbf16>
    %8 = arith.extf %7 : vector<128x16xbf16> to vector<128x16xf32>
    %c0_8 = arith.constant 0 : index
    %c0_9 = arith.constant 0 : index
    %9 = vector.load %arg5[%c0_8, %c0_9] : memref<16x128xbf16, #tpu.memory_space<vmem>>, vector<16x128xbf16>
    %10 = arith.extf %9 : vector<16x128xbf16> to vector<16x128xf32>
    %c0_10 = arith.constant 0 : index
    %c0_11 = arith.constant 0 : index
    %11 = vector.load %arg6[%c0_10, %c0_11] : memref<16x2xf32, #tpu.memory_space<vmem>>, vector<16x2xf32>
    %c0_12 = arith.constant 0 : index
    %c0_13 = arith.constant 0 : index
    %12 = vector.load %arg7[%c0_12, %c0_13] : memref<2x16xf32, #tpu.memory_space<vmem>>, vector<2x16xf32>
    %cst = arith.constant dense<0.000000e+00> : vector<16x16xf32>
    %13 = tpu.matmul %11, %4, %cst {dimension_numbers = #tpu.dot_dimension_numbers<[1], [0], [0], [1], [0, 0, 1, 1], [], []>} : vector<16x2xf32>, vector<2x16xf32>, vector<16x16xf32> -> vector<16x16xf32>
    %c0_14 = arith.constant 0 : index
    %c0_15 = arith.constant 0 : index
    %14 = vector.load %arg8[%c0_14, %c0_15] : memref<16x32xf32, #tpu.memory_space<vmem>>, vector<16x32xf32>
    %cst_16 = arith.constant dense<0.000000e+00> : vector<16x32xf32>
    %15 = tpu.matmul %3, %14, %cst_16 {dimension_numbers = #tpu.dot_dimension_numbers<[1], [0], [0], [1], [0, 0, 1, 1], [], []>} : vector<16x16xf32>, vector<16x32xf32>, vector<16x32xf32> -> vector<16x32xf32>
    %c0_17 = arith.constant 0 : index
    %c0_18 = arith.constant 0 : index
    %16 = vector.load %arg10[%c0_17, %c0_18] : memref<16x32xf32, #tpu.memory_space<vmem>>, vector<16x32xf32>
    %cst_19 = arith.constant dense<0.000000e+00> : vector<16x32xf32>
    %17 = tpu.matmul %13, %16, %cst_19 {dimension_numbers = #tpu.dot_dimension_numbers<[1], [0], [0], [1], [0, 0, 1, 1], [], []>} : vector<16x16xf32>, vector<16x32xf32>, vector<16x32xf32> -> vector<16x32xf32>
    %18 = arith.addf %15, %17 : vector<16x32xf32>
    %c0_20 = arith.constant 0 : index
    %c0_21 = arith.constant 0 : index
    %19 = vector.load %arg9[%c0_20, %c0_21] : memref<16x32xf32, #tpu.memory_space<vmem>>, vector<16x32xf32>
    %cst_22 = arith.constant dense<0.000000e+00> : vector<16x32xf32>
    %20 = tpu.matmul %3, %19, %cst_22 {dimension_numbers = #tpu.dot_dimension_numbers<[1], [0], [0], [1], [0, 0, 1, 1], [], []>} : vector<16x16xf32>, vector<16x32xf32>, vector<16x32xf32> -> vector<16x32xf32>
    %cst_23 = arith.constant dense<0.000000e+00> : vector<128x32xf32>
    %21 = tpu.matmul %6, %18, %cst_23 {dimension_numbers = #tpu.dot_dimension_numbers<[1], [0], [0], [1], [0, 0, 1, 1], [], []>} : vector<128x16xf32>, vector<16x32xf32>, vector<128x32xf32> -> vector<128x32xf32>
    %cst_24 = arith.constant dense<0.000000e+00> : vector<128x32xf32>
    %22 = tpu.matmul %8, %20, %cst_24 {dimension_numbers = #tpu.dot_dimension_numbers<[1], [0], [0], [1], [0, 0, 1, 1], [], []>} : vector<128x16xf32>, vector<16x32xf32>, vector<128x32xf32> -> vector<128x32xf32>
    %23 = arith.addf %21, %22 : vector<128x32xf32>
    %c0_25 = arith.constant 0 : index
    %c0_26 = arith.constant 0 : index
    %24 = vector.load %arg11[%c0_25, %c0_26] : memref<1x32xf32, #tpu.memory_space<vmem>>, vector<1x32xf32>
    %25 = vector.broadcast %24 : vector<1x32xf32> to vector<128x32xf32>
    %26 = arith.addf %23, %25 : vector<128x32xf32>
    %cst_27 = arith.constant 0.000000e+00 : f32
    %27 = vector.broadcast %cst_27 : f32 to vector<128x32xf32>
    %28 = arith.maximumf %26, %27 : vector<128x32xf32>
    %c0_28 = arith.constant 0 : index
    %c0_29 = arith.constant 0 : index
    %29 = vector.load %arg12[%c0_28, %c0_29] : memref<32x32xf32, #tpu.memory_space<vmem>>, vector<32x32xf32>
    %cst_30 = arith.constant dense<0.000000e+00> : vector<128x32xf32>
    %30 = tpu.matmul %28, %29, %cst_30 {dimension_numbers = #tpu.dot_dimension_numbers<[1], [0], [0], [1], [0, 0, 1, 1], [], []>} : vector<128x32xf32>, vector<32x32xf32>, vector<128x32xf32> -> vector<128x32xf32>
    %c0_31 = arith.constant 0 : index
    %c0_32 = arith.constant 0 : index
    %31 = vector.load %arg13[%c0_31, %c0_32] : memref<1x32xf32, #tpu.memory_space<vmem>>, vector<1x32xf32>
    %32 = vector.broadcast %31 : vector<1x32xf32> to vector<128x32xf32>
    %33 = arith.addf %30, %32 : vector<128x32xf32>
    %cst_33 = arith.constant 0.000000e+00 : f32
    %34 = vector.broadcast %cst_33 : f32 to vector<128x32xf32>
    %35 = arith.maximumf %33, %34 : vector<128x32xf32>
    %c0_34 = arith.constant 0 : index
    %c0_35 = arith.constant 0 : index
    %36 = vector.load %arg14[%c0_34, %c0_35] : memref<32x16xf32, #tpu.memory_space<vmem>>, vector<32x16xf32>
    %cst_36 = arith.constant dense<0.000000e+00> : vector<128x16xf32>
    %37 = tpu.matmul %35, %36, %cst_36 {dimension_numbers = #tpu.dot_dimension_numbers<[1], [0], [0], [1], [0, 0, 1, 1], [], []>} : vector<128x32xf32>, vector<32x16xf32>, vector<128x16xf32> -> vector<128x16xf32>
    %c0_37 = arith.constant 0 : index
    %c0_38 = arith.constant 0 : index
    %38 = vector.load %arg15[%c0_37, %c0_38] : memref<1x16xf32, #tpu.memory_space<vmem>>, vector<1x16xf32>
    %39 = vector.broadcast %38 : vector<1x16xf32> to vector<128x16xf32>
    %40 = arith.addf %37, %39 : vector<128x16xf32>
    %c0_39 = arith.constant 0 : index
    %c0_40 = arith.constant 0 : index
    %41 = vector.load %arg16[%c0_39, %c0_40] : memref<16x32xf32, #tpu.memory_space<vmem>>, vector<16x32xf32>
    %cst_41 = arith.constant dense<0.000000e+00> : vector<16x32xf32>
    %42 = tpu.matmul %3, %41, %cst_41 {dimension_numbers = #tpu.dot_dimension_numbers<[1], [0], [0], [1], [0, 0, 1, 1], [], []>} : vector<16x16xf32>, vector<16x32xf32>, vector<16x32xf32> -> vector<16x32xf32>
    %c0_42 = arith.constant 0 : index
    %c0_43 = arith.constant 0 : index
    %43 = vector.load %arg18[%c0_42, %c0_43] : memref<16x32xf32, #tpu.memory_space<vmem>>, vector<16x32xf32>
    %cst_44 = arith.constant dense<0.000000e+00> : vector<16x32xf32>
    %44 = tpu.matmul %13, %43, %cst_44 {dimension_numbers = #tpu.dot_dimension_numbers<[1], [0], [0], [1], [0, 0, 1, 1], [], []>} : vector<16x16xf32>, vector<16x32xf32>, vector<16x32xf32> -> vector<16x32xf32>
    %45 = arith.addf %42, %44 : vector<16x32xf32>
    %cst_45 = arith.constant dense<0.000000e+00> : vector<128x32xf32>
    %46 = tpu.matmul %8, %45, %cst_45 {dimension_numbers = #tpu.dot_dimension_numbers<[1], [0], [0], [1], [0, 0, 1, 1], [], []>} : vector<128x16xf32>, vector<16x32xf32>, vector<128x32xf32> -> vector<128x32xf32>
    %c0_46 = arith.constant 0 : index
    %c0_47 = arith.constant 0 : index
    %47 = vector.load %arg17[%c0_46, %c0_47] : memref<16x32xf32, #tpu.memory_space<vmem>>, vector<16x32xf32>
    %cst_48 = arith.constant dense<0.000000e+00> : vector<128x32xf32>
    %48 = tpu.matmul %40, %47, %cst_48 {dimension_numbers = #tpu.dot_dimension_numbers<[1], [0], [0], [1], [0, 0, 1, 1], [], []>} : vector<128x16xf32>, vector<16x32xf32>, vector<128x32xf32> -> vector<128x32xf32>
    %49 = arith.addf %46, %48 : vector<128x32xf32>
    %c0_49 = arith.constant 0 : index
    %c0_50 = arith.constant 0 : index
    %50 = vector.load %arg19[%c0_49, %c0_50] : memref<1x32xf32, #tpu.memory_space<vmem>>, vector<1x32xf32>
    %51 = vector.broadcast %50 : vector<1x32xf32> to vector<128x32xf32>
    %52 = arith.addf %49, %51 : vector<128x32xf32>
    %cst_51 = arith.constant 0.000000e+00 : f32
    %53 = vector.broadcast %cst_51 : f32 to vector<128x32xf32>
    %54 = arith.maximumf %52, %53 : vector<128x32xf32>
    %c0_52 = arith.constant 0 : index
    %c0_53 = arith.constant 0 : index
    %55 = vector.load %arg20[%c0_52, %c0_53] : memref<32x16xf32, #tpu.memory_space<vmem>>, vector<32x16xf32>
    %cst_54 = arith.constant dense<0.000000e+00> : vector<128x16xf32>
    %56 = tpu.matmul %54, %55, %cst_54 {dimension_numbers = #tpu.dot_dimension_numbers<[1], [0], [0], [1], [0, 0, 1, 1], [], []>} : vector<128x32xf32>, vector<32x16xf32>, vector<128x16xf32> -> vector<128x16xf32>
    %c0_55 = arith.constant 0 : index
    %c0_56 = arith.constant 0 : index
    %57 = vector.load %arg21[%c0_55, %c0_56] : memref<1x16xf32, #tpu.memory_space<vmem>>, vector<1x16xf32>
    %58 = vector.broadcast %57 : vector<1x16xf32> to vector<128x16xf32>
    %59 = arith.addf %56, %58 : vector<128x16xf32>
    %60 = arith.negf %59 : vector<128x16xf32>
    %61 = math.exp %60 : vector<128x16xf32>
    %cst_57 = arith.constant 1.000000e+00 : f32
    %62 = vector.broadcast %cst_57 : f32 to vector<128x16xf32>
    %63 = arith.addf %62, %61 : vector<128x16xf32>
    %64 = arith.divf %62, %63 : vector<128x16xf32>
    %65 = arith.mulf %40, %64 : vector<128x16xf32>
    %cst_58 = arith.constant dense<0.000000e+00> : vector<16x16xf32>
    %66 = tpu.matmul %10, %65, %cst_58 {dimension_numbers = #tpu.dot_dimension_numbers<[1], [0], [0], [1], [0, 0, 1, 1], [], []>} : vector<16x128xf32>, vector<128x16xf32>, vector<16x16xf32> -> vector<16x16xf32>
    %c0_59 = arith.constant 0 : index
    %c0_60 = arith.constant 0 : index
    %67 = vector.load %arg22[%c0_59, %c0_60] : memref<16x32xf32, #tpu.memory_space<vmem>>, vector<16x32xf32>
    %cst_61 = arith.constant dense<0.000000e+00> : vector<16x32xf32>
    %68 = tpu.matmul %3, %67, %cst_61 {dimension_numbers = #tpu.dot_dimension_numbers<[1], [0], [0], [1], [0, 0, 1, 1], [], []>} : vector<16x16xf32>, vector<16x32xf32>, vector<16x32xf32> -> vector<16x32xf32>
    %c0_62 = arith.constant 0 : index
    %c0_63 = arith.constant 0 : index
    %69 = vector.load %arg23[%c0_62, %c0_63] : memref<16x32xf32, #tpu.memory_space<vmem>>, vector<16x32xf32>
    %cst_64 = arith.constant dense<0.000000e+00> : vector<16x32xf32>
    %70 = tpu.matmul %66, %69, %cst_64 {dimension_numbers = #tpu.dot_dimension_numbers<[1], [0], [0], [1], [0, 0, 1, 1], [], []>} : vector<16x16xf32>, vector<16x32xf32>, vector<16x32xf32> -> vector<16x32xf32>
    %71 = arith.addf %68, %70 : vector<16x32xf32>
    %c0_65 = arith.constant 0 : index
    %c0_66 = arith.constant 0 : index
    %72 = vector.load %arg24[%c0_65, %c0_66] : memref<16x32xf32, #tpu.memory_space<vmem>>, vector<16x32xf32>
    %cst_67 = arith.constant dense<0.000000e+00> : vector<16x32xf32>
    %73 = tpu.matmul %13, %72, %cst_67 {dimension_numbers = #tpu.dot_dimension_numbers<[1], [0], [0], [1], [0, 0, 1, 1], [], []>} : vector<16x16xf32>, vector<16x32xf32>, vector<16x32xf32> -> vector<16x32xf32>
    %74 = arith.addf %71, %73 : vector<16x32xf32>
    %c0_68 = arith.constant 0 : index
    %c0_69 = arith.constant 0 : index
    %75 = vector.load %arg25[%c0_68, %c0_69] : memref<1x32xf32, #tpu.memory_space<vmem>>, vector<1x32xf32>
    %76 = vector.broadcast %75 : vector<1x32xf32> to vector<16x32xf32>
    %77 = arith.addf %74, %76 : vector<16x32xf32>
    %cst_70 = arith.constant 0.000000e+00 : f32
    %78 = vector.broadcast %cst_70 : f32 to vector<16x32xf32>
    %79 = arith.maximumf %77, %78 : vector<16x32xf32>
    %c0_71 = arith.constant 0 : index
    %c0_72 = arith.constant 0 : index
    %80 = vector.load %arg26[%c0_71, %c0_72] : memref<32x32xf32, #tpu.memory_space<vmem>>, vector<32x32xf32>
    %cst_73 = arith.constant dense<0.000000e+00> : vector<16x32xf32>
    %81 = tpu.matmul %79, %80, %cst_73 {dimension_numbers = #tpu.dot_dimension_numbers<[1], [0], [0], [1], [0, 0, 1, 1], [], []>} : vector<16x32xf32>, vector<32x32xf32>, vector<16x32xf32> -> vector<16x32xf32>
    %c0_74 = arith.constant 0 : index
    %c0_75 = arith.constant 0 : index
    %82 = vector.load %arg27[%c0_74, %c0_75] : memref<1x32xf32, #tpu.memory_space<vmem>>, vector<1x32xf32>
    %83 = vector.broadcast %82 : vector<1x32xf32> to vector<16x32xf32>
    %84 = arith.addf %81, %83 : vector<16x32xf32>
    %cst_76 = arith.constant 0.000000e+00 : f32
    %85 = vector.broadcast %cst_76 : f32 to vector<16x32xf32>
    %86 = arith.maximumf %84, %85 : vector<16x32xf32>
    %c0_77 = arith.constant 0 : index
    %c0_78 = arith.constant 0 : index
    %87 = vector.load %arg28[%c0_77, %c0_78] : memref<32x16xf32, #tpu.memory_space<vmem>>, vector<32x16xf32>
    %cst_79 = arith.constant dense<0.000000e+00> : vector<16x16xf32>
    %88 = tpu.matmul %86, %87, %cst_79 {dimension_numbers = #tpu.dot_dimension_numbers<[1], [0], [0], [1], [0, 0, 1, 1], [], []>} : vector<16x32xf32>, vector<32x16xf32>, vector<16x16xf32> -> vector<16x16xf32>
    %c0_80 = arith.constant 0 : index
    %c0_81 = arith.constant 0 : index
    %89 = vector.load %arg29[%c0_80, %c0_81] : memref<1x16xf32, #tpu.memory_space<vmem>>, vector<1x16xf32>
    %90 = vector.broadcast %89 : vector<1x16xf32> to vector<16x16xf32>
    %91 = arith.addf %88, %90 : vector<16x16xf32>
    %c0_82 = arith.constant 0 : index
    %c0_83 = arith.constant 0 : index
    %92 = vector.load %arg30[%c0_82, %c0_83] : memref<16x32xf32, #tpu.memory_space<vmem>>, vector<16x32xf32>
    %cst_84 = arith.constant dense<0.000000e+00> : vector<16x32xf32>
    %93 = tpu.matmul %91, %92, %cst_84 {dimension_numbers = #tpu.dot_dimension_numbers<[1], [0], [0], [1], [0, 0, 1, 1], [], []>} : vector<16x16xf32>, vector<16x32xf32>, vector<16x32xf32> -> vector<16x32xf32>
    %c0_85 = arith.constant 0 : index
    %c0_86 = arith.constant 0 : index
    %94 = vector.load %arg31[%c0_85, %c0_86] : memref<16x32xf32, #tpu.memory_space<vmem>>, vector<16x32xf32>
    %cst_87 = arith.constant dense<0.000000e+00> : vector<16x32xf32>
    %95 = tpu.matmul %13, %94, %cst_87 {dimension_numbers = #tpu.dot_dimension_numbers<[1], [0], [0], [1], [0, 0, 1, 1], [], []>} : vector<16x16xf32>, vector<16x32xf32>, vector<16x32xf32> -> vector<16x32xf32>
    %96 = arith.addf %93, %95 : vector<16x32xf32>
    %c0_88 = arith.constant 0 : index
    %c0_89 = arith.constant 0 : index
    %97 = vector.load %arg32[%c0_88, %c0_89] : memref<1x32xf32, #tpu.memory_space<vmem>>, vector<1x32xf32>
    %98 = vector.broadcast %97 : vector<1x32xf32> to vector<16x32xf32>
    %99 = arith.addf %96, %98 : vector<16x32xf32>
    %cst_90 = arith.constant 0.000000e+00 : f32
    %100 = vector.broadcast %cst_90 : f32 to vector<16x32xf32>
    %101 = arith.maximumf %99, %100 : vector<16x32xf32>
    %c0_91 = arith.constant 0 : index
    %c0_92 = arith.constant 0 : index
    %102 = vector.load %arg33[%c0_91, %c0_92] : memref<32x16xf32, #tpu.memory_space<vmem>>, vector<32x16xf32>
    %cst_93 = arith.constant dense<0.000000e+00> : vector<16x16xf32>
    %103 = tpu.matmul %101, %102, %cst_93 {dimension_numbers = #tpu.dot_dimension_numbers<[1], [0], [0], [1], [0, 0, 1, 1], [], []>} : vector<16x32xf32>, vector<32x16xf32>, vector<16x16xf32> -> vector<16x16xf32>
    %c0_94 = arith.constant 0 : index
    %c0_95 = arith.constant 0 : index
    %104 = vector.load %arg34[%c0_94, %c0_95] : memref<1x16xf32, #tpu.memory_space<vmem>>, vector<1x16xf32>
    %105 = vector.broadcast %104 : vector<1x16xf32> to vector<16x16xf32>
    %106 = arith.addf %103, %105 : vector<16x16xf32>
    %107 = arith.negf %106 : vector<16x16xf32>
    %108 = math.exp %107 : vector<16x16xf32>
    %cst_96 = arith.constant 1.000000e+00 : f32
    %109 = vector.broadcast %cst_96 : f32 to vector<16x16xf32>
    %110 = arith.addf %109, %108 : vector<16x16xf32>
    %111 = arith.divf %109, %110 : vector<16x16xf32>
    %112 = arith.mulf %91, %111 : vector<16x16xf32>
    %cst_97 = arith.constant dense<0.000000e+00> : vector<2x16xf32>
    %113 = tpu.matmul %12, %112, %cst_97 {dimension_numbers = #tpu.dot_dimension_numbers<[1], [0], [0], [1], [0, 0, 1, 1], [], []>} : vector<2x16xf32>, vector<16x16xf32>, vector<2x16xf32> -> vector<2x16xf32>
    %c0_98 = arith.constant 0 : index
    %c0_99 = arith.constant 0 : index
    %114 = vector.load %arg35[%c0_98, %c0_99] : memref<16x32xf32, #tpu.memory_space<vmem>>, vector<16x32xf32>
    %cst_100 = arith.constant dense<0.000000e+00> : vector<2x32xf32>
    %115 = tpu.matmul %113, %114, %cst_100 {dimension_numbers = #tpu.dot_dimension_numbers<[1], [0], [0], [1], [0, 0, 1, 1], [], []>} : vector<2x16xf32>, vector<16x32xf32>, vector<2x32xf32> -> vector<2x32xf32>
    %c0_101 = arith.constant 0 : index
    %c0_102 = arith.constant 0 : index
    %116 = vector.load %arg36[%c0_101, %c0_102] : memref<16x32xf32, #tpu.memory_space<vmem>>, vector<16x32xf32>
    %cst_103 = arith.constant dense<0.000000e+00> : vector<2x32xf32>
    %117 = tpu.matmul %4, %116, %cst_103 {dimension_numbers = #tpu.dot_dimension_numbers<[1], [0], [0], [1], [0, 0, 1, 1], [], []>} : vector<2x16xf32>, vector<16x32xf32>, vector<2x32xf32> -> vector<2x32xf32>
    %118 = arith.addf %115, %117 : vector<2x32xf32>
    %c0_104 = arith.constant 0 : index
    %c0_105 = arith.constant 0 : index
    %119 = vector.load %arg37[%c0_104, %c0_105] : memref<1x32xf32, #tpu.memory_space<vmem>>, vector<1x32xf32>
    %120 = vector.broadcast %119 : vector<1x32xf32> to vector<2x32xf32>
    %121 = arith.addf %118, %120 : vector<2x32xf32>
    %cst_106 = arith.constant 0.000000e+00 : f32
    %122 = vector.broadcast %cst_106 : f32 to vector<2x32xf32>
    %123 = arith.maximumf %121, %122 : vector<2x32xf32>
    %c0_107 = arith.constant 0 : index
    %c0_108 = arith.constant 0 : index
    %124 = vector.load %arg38[%c0_107, %c0_108] : memref<32x32xf32, #tpu.memory_space<vmem>>, vector<32x32xf32>
    %cst_109 = arith.constant dense<0.000000e+00> : vector<2x32xf32>
    %125 = tpu.matmul %123, %124, %cst_109 {dimension_numbers = #tpu.dot_dimension_numbers<[1], [0], [0], [1], [0, 0, 1, 1], [], []>} : vector<2x32xf32>, vector<32x32xf32>, vector<2x32xf32> -> vector<2x32xf32>
    %c0_110 = arith.constant 0 : index
    %c0_111 = arith.constant 0 : index
    %126 = vector.load %arg39[%c0_110, %c0_111] : memref<1x32xf32, #tpu.memory_space<vmem>>, vector<1x32xf32>
    %127 = vector.broadcast %126 : vector<1x32xf32> to vector<2x32xf32>
    %128 = arith.addf %125, %127 : vector<2x32xf32>
    %cst_112 = arith.constant 0.000000e+00 : f32
    %129 = vector.broadcast %cst_112 : f32 to vector<2x32xf32>
    %130 = arith.maximumf %128, %129 : vector<2x32xf32>
    %c0_113 = arith.constant 0 : index
    %c0_114 = arith.constant 0 : index
    %131 = vector.load %arg40[%c0_113, %c0_114] : memref<32x16xf32, #tpu.memory_space<vmem>>, vector<32x16xf32>
    %cst_115 = arith.constant dense<0.000000e+00> : vector<2x16xf32>
    %132 = tpu.matmul %130, %131, %cst_115 {dimension_numbers = #tpu.dot_dimension_numbers<[1], [0], [0], [1], [0, 0, 1, 1], [], []>} : vector<2x32xf32>, vector<32x16xf32>, vector<2x16xf32> -> vector<2x16xf32>
    %c0_116 = arith.constant 0 : index
    %c0_117 = arith.constant 0 : index
    %133 = vector.load %arg41[%c0_116, %c0_117] : memref<1x16xf32, #tpu.memory_space<vmem>>, vector<1x16xf32>
    %134 = vector.broadcast %133 : vector<1x16xf32> to vector<2x16xf32>
    %135 = arith.addf %132, %134 : vector<2x16xf32>
    %c0_118 = arith.constant 0 : index
    %c0_119 = arith.constant 0 : index
    %136 = vector.load %arg42[%c0_118, %c0_119] : memref<16x32xf32, #tpu.memory_space<vmem>>, vector<16x32xf32>
    %cst_120 = arith.constant dense<0.000000e+00> : vector<2x32xf32>
    %137 = tpu.matmul %135, %136, %cst_120 {dimension_numbers = #tpu.dot_dimension_numbers<[1], [0], [0], [1], [0, 0, 1, 1], [], []>} : vector<2x16xf32>, vector<16x32xf32>, vector<2x32xf32> -> vector<2x32xf32>
    %c0_121 = arith.constant 0 : index
    %c0_122 = arith.constant 0 : index
    %138 = vector.load %arg43[%c0_121, %c0_122] : memref<1x32xf32, #tpu.memory_space<vmem>>, vector<1x32xf32>
    %139 = vector.broadcast %138 : vector<1x32xf32> to vector<2x32xf32>
    %140 = arith.addf %137, %139 : vector<2x32xf32>
    %cst_123 = arith.constant 0.000000e+00 : f32
    %141 = vector.broadcast %cst_123 : f32 to vector<2x32xf32>
    %142 = arith.maximumf %140, %141 : vector<2x32xf32>
    %c0_124 = arith.constant 0 : index
    %c0_125 = arith.constant 0 : index
    %143 = vector.load %arg44[%c0_124, %c0_125] : memref<32x32xf32, #tpu.memory_space<vmem>>, vector<32x32xf32>
    %cst_126 = arith.constant dense<0.000000e+00> : vector<2x32xf32>
    %144 = tpu.matmul %142, %143, %cst_126 {dimension_numbers = #tpu.dot_dimension_numbers<[1], [0], [0], [1], [0, 0, 1, 1], [], []>} : vector<2x32xf32>, vector<32x32xf32>, vector<2x32xf32> -> vector<2x32xf32>
    %c0_127 = arith.constant 0 : index
    %c0_128 = arith.constant 0 : index
    %145 = vector.load %arg45[%c0_127, %c0_128] : memref<1x32xf32, #tpu.memory_space<vmem>>, vector<1x32xf32>
    %146 = vector.broadcast %145 : vector<1x32xf32> to vector<2x32xf32>
    %147 = arith.addf %144, %146 : vector<2x32xf32>
    %cst_129 = arith.constant 0.000000e+00 : f32
    %148 = vector.broadcast %cst_129 : f32 to vector<2x32xf32>
    %149 = arith.maximumf %147, %148 : vector<2x32xf32>
    %c0_130 = arith.constant 0 : index
    %c0_131 = arith.constant 0 : index
    %150 = vector.load %arg46[%c0_130, %c0_131] : memref<32x128xf32, #tpu.memory_space<vmem>>, vector<32x128xf32>
    %cst_132 = arith.constant dense<0.000000e+00> : vector<2x128xf32>
    %151 = tpu.matmul %149, %150, %cst_132 {dimension_numbers = #tpu.dot_dimension_numbers<[1], [0], [0], [1], [0, 0, 1, 1], [], []>} : vector<2x32xf32>, vector<32x128xf32>, vector<2x128xf32> -> vector<2x128xf32>
    %c0_133 = arith.constant 0 : index
    %c0_134 = arith.constant 0 : index
    %152 = vector.load %arg47[%c0_133, %c0_134] : memref<1x128xf32, #tpu.memory_space<vmem>>, vector<1x128xf32>
    %153 = vector.broadcast %152 : vector<1x128xf32> to vector<2x128xf32>
    %154 = arith.addf %151, %153 : vector<2x128xf32>
    %c0_135 = arith.constant 0 : index
    %c0_136 = arith.constant 0 : index
    %155 = vector.load %arg49[%c0_135, %c0_136] : memref<16x16xf32, #tpu.memory_space<vmem>>, vector<16x16xf32>
    tpu.vector_store %arg49[%c0_135, %c0_136], %91 {strides = array<i32>} : memref<16x16xf32, #tpu.memory_space<vmem>>, vector<16x16xf32>,
    %c0_137 = arith.constant 0 : index
    %c0_138 = arith.constant 0 : index
    %156 = vector.load %arg50[%c0_137, %c0_138] : memref<2x16xf32, #tpu.memory_space<vmem>>, vector<2x16xf32>
    tpu.vector_store %arg50[%c0_137, %c0_138], %135 {strides = array<i32>} : memref<2x16xf32, #tpu.memory_space<vmem>>, vector<2x16xf32>,
    %157 = arith.index_cast %arg0 : i32 to index
    %c0_139 = arith.constant 0 : index
    %c0_140 = arith.constant 0 : index
    %158 = vector.load %arg48[%157, %c0_139, %c0_140] : memref<2x2x128xf32, #tpu.memory_space<vmem>>, vector<1x2x128xf32>
    %159 = vector.shape_cast %158 : vector<1x2x128xf32> to vector<2x128xf32>
    %160 = vector.shape_cast %154 : vector<2x128xf32> to vector<1x2x128xf32>
    tpu.vector_store %arg48[%157, %c0_139, %c0_140], %160 {strides = array<i32>} : memref<2x2x128xf32, #tpu.memory_space<vmem>>, vector<1x2x128xf32>,
    return
  }
  func.func @transform_0(%arg0: i32) -> (i32, i32) {
    %c0_i32 = arith.constant 0 : i32
    %c0_i32_0 = arith.constant 0 : i32
    %c0_i32_1 = arith.constant 0 : i32
    return %c0_i32, %c0_i32_0 : i32, i32
  }
  func.func @transform_1(%arg0: i32) -> (i32, i32) {
    %c0_i32 = arith.constant 0 : i32
    %c0_i32_0 = arith.constant 0 : i32
    %c0_i32_1 = arith.constant 0 : i32
    return %c0_i32, %c0_i32_0 : i32, i32
  }
  func.func @transform_2(%arg0: i32) -> (i32, i32) {
    %c0_i32 = arith.constant 0 : i32
    %c0_i32_0 = arith.constant 0 : i32
    %c0_i32_1 = arith.constant 0 : i32
    return %c0_i32, %c0_i32_0 : i32, i32
  }
  func.func @transform_3(%arg0: i32) -> (i32, i32) {
    %c0_i32 = arith.constant 0 : i32
    %c0_i32_0 = arith.constant 0 : i32
    %c0_i32_1 = arith.constant 0 : i32
    return %c0_i32, %c0_i32_0 : i32, i32
  }
  func.func @transform_4(%arg0: i32) -> (i32, i32) {
    %c0_i32 = arith.constant 0 : i32
    %c0_i32_0 = arith.constant 0 : i32
    %c0_i32_1 = arith.constant 0 : i32
    return %c0_i32, %c0_i32_0 : i32, i32
  }
  func.func @transform_5(%arg0: i32) -> (i32, i32) {
    %c0_i32 = arith.constant 0 : i32
    %c0_i32_0 = arith.constant 0 : i32
    %c0_i32_1 = arith.constant 0 : i32
    return %c0_i32, %c0_i32_0 : i32, i32
  }
  func.func @transform_6(%arg0: i32) -> (i32, i32) {
    %c0_i32 = arith.constant 0 : i32
    %c0_i32_0 = arith.constant 0 : i32
    %c0_i32_1 = arith.constant 0 : i32
    return %c0_i32, %c0_i32_0 : i32, i32
  }
  func.func @transform_7(%arg0: i32) -> (i32, i32) {
    %c0_i32 = arith.constant 0 : i32
    %c0_i32_0 = arith.constant 0 : i32
    %c0_i32_1 = arith.constant 0 : i32
    return %c0_i32, %c0_i32_0 : i32, i32
  }
  func.func @transform_8(%arg0: i32) -> (i32, i32) {
    %c0_i32 = arith.constant 0 : i32
    %c0_i32_0 = arith.constant 0 : i32
    %c0_i32_1 = arith.constant 0 : i32
    return %c0_i32, %c0_i32_0 : i32, i32
  }
  func.func @transform_9(%arg0: i32) -> (i32, i32) {
    %c0_i32 = arith.constant 0 : i32
    %c0_i32_0 = arith.constant 0 : i32
    %c0_i32_1 = arith.constant 0 : i32
    return %c0_i32, %c0_i32_0 : i32, i32
  }
  func.func @transform_10(%arg0: i32) -> (i32, i32) {
    %c0_i32 = arith.constant 0 : i32
    %c0_i32_0 = arith.constant 0 : i32
    %c0_i32_1 = arith.constant 0 : i32
    return %c0_i32, %c0_i32_0 : i32, i32
  }
  func.func @transform_11(%arg0: i32) -> (i32, i32) {
    %c0_i32 = arith.constant 0 : i32
    %c0_i32_0 = arith.constant 0 : i32
    %c0_i32_1 = arith.constant 0 : i32
    return %c0_i32, %c0_i32_0 : i32, i32
  }
  func.func @transform_12(%arg0: i32) -> (i32, i32) {
    %c0_i32 = arith.constant 0 : i32
    %c0_i32_0 = arith.constant 0 : i32
    %c0_i32_1 = arith.constant 0 : i32
    return %c0_i32, %c0_i32_0 : i32, i32
  }
  func.func @transform_13(%arg0: i32) -> (i32, i32) {
    %c0_i32 = arith.constant 0 : i32
    %c0_i32_0 = arith.constant 0 : i32
    %c0_i32_1 = arith.constant 0 : i32
    return %c0_i32, %c0_i32_0 : i32, i32
  }
  func.func @transform_14(%arg0: i32) -> (i32, i32) {
    %c0_i32 = arith.constant 0 : i32
    %c0_i32_0 = arith.constant 0 : i32
    %c0_i32_1 = arith.constant 0 : i32
    return %c0_i32, %c0_i32_0 : i32, i32
  }
  func.func @transform_15(%arg0: i32) -> (i32, i32) {
    %c0_i32 = arith.constant 0 : i32
    %c0_i32_0 = arith.constant 0 : i32
    %c0_i32_1 = arith.constant 0 : i32
    return %c0_i32, %c0_i32_0 : i32, i32
  }
  func.func @transform_16(%arg0: i32) -> (i32, i32) {
    %c0_i32 = arith.constant 0 : i32
    %c0_i32_0 = arith.constant 0 : i32
    %c0_i32_1 = arith.constant 0 : i32
    return %c0_i32, %c0_i32_0 : i32, i32
  }
  func.func @transform_17(%arg0: i32) -> (i32, i32) {
    %c0_i32 = arith.constant 0 : i32
    %c0_i32_0 = arith.constant 0 : i32
    %c0_i32_1 = arith.constant 0 : i32
    return %c0_i32, %c0_i32_0 : i32, i32
  }
  func.func @transform_18(%arg0: i32) -> (i32, i32) {
    %c0_i32 = arith.constant 0 : i32
    %c0_i32_0 = arith.constant 0 : i32
    %c0_i32_1 = arith.constant 0 : i32
    return %c0_i32, %c0_i32_0 : i32, i32
  }
  func.func @transform_19(%arg0: i32) -> (i32, i32) {
    %c0_i32 = arith.constant 0 : i32
    %c0_i32_0 = arith.constant 0 : i32
    %c0_i32_1 = arith.constant 0 : i32
    return %c0_i32, %c0_i32_0 : i32, i32
  }
  func.func @transform_20(%arg0: i32) -> (i32, i32) {
    %c0_i32 = arith.constant 0 : i32
    %c0_i32_0 = arith.constant 0 : i32
    %c0_i32_1 = arith.constant 0 : i32
    return %c0_i32, %c0_i32_0 : i32, i32
  }
  func.func @transform_21(%arg0: i32) -> (i32, i32) {
    %c0_i32 = arith.constant 0 : i32
    %c0_i32_0 = arith.constant 0 : i32
    %c0_i32_1 = arith.constant 0 : i32
    return %c0_i32, %c0_i32_0 : i32, i32
  }
  func.func @transform_22(%arg0: i32) -> (i32, i32) {
    %c0_i32 = arith.constant 0 : i32
    %c0_i32_0 = arith.constant 0 : i32
    %c0_i32_1 = arith.constant 0 : i32
    return %c0_i32, %c0_i32_0 : i32, i32
  }
  func.func @transform_23(%arg0: i32) -> (i32, i32) {
    %c0_i32 = arith.constant 0 : i32
    %c0_i32_0 = arith.constant 0 : i32
    %c0_i32_1 = arith.constant 0 : i32
    return %c0_i32, %c0_i32_0 : i32, i32
  }
  func.func @transform_24(%arg0: i32) -> (i32, i32) {
    %c0_i32 = arith.constant 0 : i32
    %c0_i32_0 = arith.constant 0 : i32
    %c0_i32_1 = arith.constant 0 : i32
    return %c0_i32, %c0_i32_0 : i32, i32
  }
  func.func @transform_25(%arg0: i32) -> (i32, i32) {
    %c0_i32 = arith.constant 0 : i32
    %c0_i32_0 = arith.constant 0 : i32
    %c0_i32_1 = arith.constant 0 : i32
    return %c0_i32, %c0_i32_0 : i32, i32
  }
  func.func @transform_26(%arg0: i32) -> (i32, i32) {
    %c0_i32 = arith.constant 0 : i32
    %c0_i32_0 = arith.constant 0 : i32
    %c0_i32_1 = arith.constant 0 : i32
    return %c0_i32, %c0_i32_0 : i32, i32
  }
  func.func @transform_27(%arg0: i32) -> (i32, i32) {
    %c0_i32 = arith.constant 0 : i32
    %c0_i32_0 = arith.constant 0 : i32
    %c0_i32_1 = arith.constant 0 : i32
    return %c0_i32, %c0_i32_0 : i32, i32
  }
  func.func @transform_28(%arg0: i32) -> (i32, i32) {
    %c0_i32 = arith.constant 0 : i32
    %c0_i32_0 = arith.constant 0 : i32
    %c0_i32_1 = arith.constant 0 : i32
    return %c0_i32, %c0_i32_0 : i32, i32
  }
  func.func @transform_29(%arg0: i32) -> (i32, i32) {
    %c0_i32 = arith.constant 0 : i32
    %c0_i32_0 = arith.constant 0 : i32
    %c0_i32_1 = arith.constant 0 : i32
    return %c0_i32, %c0_i32_0 : i32, i32
  }
  func.func @transform_30(%arg0: i32) -> (i32, i32) {
    %c0_i32 = arith.constant 0 : i32
    %c0_i32_0 = arith.constant 0 : i32
    %c0_i32_1 = arith.constant 0 : i32
    return %c0_i32, %c0_i32_0 : i32, i32
  }
  func.func @transform_31(%arg0: i32) -> (i32, i32) {
    %c0_i32 = arith.constant 0 : i32
    %c0_i32_0 = arith.constant 0 : i32
    %c0_i32_1 = arith.constant 0 : i32
    return %c0_i32, %c0_i32_0 : i32, i32
  }
  func.func @transform_32(%arg0: i32) -> (i32, i32) {
    %c0_i32 = arith.constant 0 : i32
    %c0_i32_0 = arith.constant 0 : i32
    %c0_i32_1 = arith.constant 0 : i32
    return %c0_i32, %c0_i32_0 : i32, i32
  }
  func.func @transform_33(%arg0: i32) -> (i32, i32) {
    %c0_i32 = arith.constant 0 : i32
    %c0_i32_0 = arith.constant 0 : i32
    %c0_i32_1 = arith.constant 0 : i32
    return %c0_i32, %c0_i32_0 : i32, i32
  }
  func.func @transform_34(%arg0: i32) -> (i32, i32) {
    %c0_i32 = arith.constant 0 : i32
    %c0_i32_0 = arith.constant 0 : i32
    %c0_i32_1 = arith.constant 0 : i32
    return %c0_i32, %c0_i32_0 : i32, i32
  }
  func.func @transform_35(%arg0: i32) -> (i32, i32) {
    %c0_i32 = arith.constant 0 : i32
    %c0_i32_0 = arith.constant 0 : i32
    %c0_i32_1 = arith.constant 0 : i32
    return %c0_i32, %c0_i32_0 : i32, i32
  }
  func.func @transform_36(%arg0: i32) -> (i32, i32) {
    %c0_i32 = arith.constant 0 : i32
    %c0_i32_0 = arith.constant 0 : i32
    %c0_i32_1 = arith.constant 0 : i32
    return %c0_i32, %c0_i32_0 : i32, i32
  }
  func.func @transform_37(%arg0: i32) -> (i32, i32) {
    %c0_i32 = arith.constant 0 : i32
    %c0_i32_0 = arith.constant 0 : i32
    %c0_i32_1 = arith.constant 0 : i32
    return %c0_i32, %c0_i32_0 : i32, i32
  }
  func.func @transform_38(%arg0: i32) -> (i32, i32) {
    %c0_i32 = arith.constant 0 : i32
    %c0_i32_0 = arith.constant 0 : i32
    %c0_i32_1 = arith.constant 0 : i32
    return %c0_i32, %c0_i32_0 : i32, i32
  }
  func.func @transform_39(%arg0: i32) -> (i32, i32) {
    %c0_i32 = arith.constant 0 : i32
    %c0_i32_0 = arith.constant 0 : i32
    %c0_i32_1 = arith.constant 0 : i32
    return %c0_i32, %c0_i32_0 : i32, i32
  }
  func.func @transform_40(%arg0: i32) -> (i32, i32) {
    %c0_i32 = arith.constant 0 : i32
    %c0_i32_0 = arith.constant 0 : i32
    %c0_i32_1 = arith.constant 0 : i32
    return %c0_i32, %c0_i32_0 : i32, i32
  }
  func.func @transform_41(%arg0: i32) -> (i32, i32) {
    %c0_i32 = arith.constant 0 : i32
    %c0_i32_0 = arith.constant 0 : i32
    %c0_i32_1 = arith.constant 0 : i32
    return %c0_i32, %c0_i32_0 : i32, i32
  }
  func.func @transform_42(%arg0: i32) -> (i32, i32) {
    %c0_i32 = arith.constant 0 : i32
    %c0_i32_0 = arith.constant 0 : i32
    %c0_i32_1 = arith.constant 0 : i32
    return %c0_i32, %c0_i32_0 : i32, i32
  }
  func.func @transform_43(%arg0: i32) -> (i32, i32) {
    %c0_i32 = arith.constant 0 : i32
    %c0_i32_0 = arith.constant 0 : i32
    %c0_i32_1 = arith.constant 0 : i32
    return %c0_i32, %c0_i32_0 : i32, i32
  }
  func.func @transform_44(%arg0: i32) -> (i32, i32) {
    %c0_i32 = arith.constant 0 : i32
    %c0_i32_0 = arith.constant 0 : i32
    %c0_i32_1 = arith.constant 0 : i32
    return %c0_i32, %c0_i32_0 : i32, i32
  }
  func.func @transform_45(%arg0: i32) -> (i32, i32) {
    %c0_i32 = arith.constant 0 : i32
    %c0_i32_0 = arith.constant 0 : i32
    %c0_i32_1 = arith.constant 0 : i32
    return %c0_i32, %c0_i32_0 : i32, i32
  }
  func.func @transform_46(%arg0: i32) -> (i32, i32) {
    %c0_i32 = arith.constant 0 : i32
    %c0_i32_0 = arith.constant 0 : i32
    %c0_i32_1 = arith.constant 0 : i32
    return %c0_i32, %c0_i32_0 : i32, i32
  }
  func.func @transform_47(%arg0: i32) -> (i32, i32, i32) {
    %c0_i32 = arith.constant 0 : i32
    %c0_i32_0 = arith.constant 0 : i32
    %c0_i32_1 = arith.constant 0 : i32
    %c0_i32_2 = arith.constant 0 : i32
    return %c0_i32, %c0_i32_0, %c0_i32_1 : i32, i32, i32
  }
}

</mosaic_0001>

<bundles_post_ra>
// kernel: n_gnn_a_forward.1
= control target key start
LH: loop header
LB: loop body
LE: loop exit
PB: predicated region body
PF: predicated region fallthrough
CT: control target
= control target key end

     0   :  { %s7208_s6 = smov 1   ;;  %s7209_s10 = smov 2   ;;  %s8221_s0 = inlined_call_operand.smem [shape: u32[48], index: -1, kind: input, shape index: {}] }
   0x1   :  { %s7285_s5 = sld [smem:[%s8221_s0]]   ;;  %s7210_s14 = smov 3  }
   0x2   :  { %s7290_s9 = sld [smem:[%s8221_s0 + %s7208_s6]]   ;;  %s7211_s18 = smov 4  }
   0x3   :  { %s7295_s13 = sld [smem:[%s8221_s0 + %s7209_s10]]   ;;  %s7212_s22 = smov 5  }
   0x4   :  { %s7300_s17 = sld [smem:[%s8221_s0 + %s7210_s14]]   ;;  %s7213_s26 = smov 6  }
   0x5   :  { %s7305_s21 = sld [smem:[%s8221_s0 + %s7211_s18]]   ;;  %s7214_s30 = smov 7  }
   0x6   :  { %s7310_s25 = sld [smem:[%s8221_s0 + %s7212_s22]]   ;;  %s7215_s4 = smov 8  }
   0x7   :  { %8265 = sst [smem:[#allocation42_spill]] %s7285_s5  ;;  %s7216_s10 = smov 9  }
   0x8   :  { %8266 = sst [smem:[#allocation43_spill]] %s7290_s9  ;;  %s7217_s15 = smov 10  }
   0x9   :  { %8267 = sst [smem:[#allocation44_spill]] %s7295_s13  ;;  %s7218_s20 = smov 11  }
   0xa   :  { %8268 = sst [smem:[#allocation45_spill]] %s7300_s17  ;;  %s7220_s1 = smov 13  }
   0xb   :  { %8269 = sst [smem:[#allocation46_spill]] %s7305_s21  ;;  %s7221_s7 = smov 14  }
   0xc   :  { %8270 = sst [smem:[#allocation47_spill]] %s7310_s25  ;;  %s7223_s22 = smov 16  }
   0xd   :  { %s7315_s29 = sld [smem:[%s8221_s0 + %s7213_s26]]   ;;  %s7219_s26 = smov 12  }
   0xe   :  { %s7320_s3 = sld [smem:[%s8221_s0 + %s7214_s30]]   ;;  %s7224_s28 = smov 17  }
   0xf   :  { %s7325_s8 = sld [smem:[%s8221_s0 + %s7215_s4]]  }
  0x10   :  { %s7330_s14 = sld [smem:[%s8221_s0 + %s7216_s10]]  }
  0x11   :  { %s7335_s19 = sld [smem:[%s8221_s0 + %s7217_s15]]   ;;  %s7222_s15 = smov 15  }
  0x12   :  { %s7340_s24 = sld [smem:[%s8221_s0 + %s7218_s20]]  }
  0x13   :  { %s7345_s30 = sld [smem:[%s8221_s0 + %s7219_s26]]  }
  0x14   :  { %8271 = sst [smem:[#allocation48_spill]] %s7320_s3 }
  0x15   :  { %8272 = sst [smem:[#allocation49_spill]] %s7325_s8 }
  0x16   :  { %8273 = sst [smem:[#allocation50_spill]] %s7330_s14 }
  0x17   :  { %s7350_s6 = sld [smem:[%s8221_s0 + %s7220_s1]]  }
  0x18   :  { %8274 = sst [smem:[#allocation51_spill]] %s7340_s24 }
  0x19   :  { %s7355_s12 = sld [smem:[%s8221_s0 + %s7221_s7]]   ;;  %s7225_s7 = smov 18  }
  0x1a   :  { %s7360_s20 = sld [smem:[%s8221_s0 + %s7222_s15]]   ;;  %s7226_s15 = smov 19  }
  0x1b   :  { %s7365_s27 = sld [smem:[%s8221_s0 + %s7223_s22]]   ;;  %s7227_s22 = smov 20  }
  0x1c   :  { %s7370_s4 = sld [smem:[%s8221_s0 + %s7224_s28]]   ;;  %s7228_s28 = smov 21  }
  0x1d   :  { %8275 = sst [smem:[#allocation52_spill]] %s7350_s6 }
  0x1e   :  { %s7375_s21 = sld [smem:[%s8221_s0 + %s7225_s7]]   ;;  %s7229_s7 = smov 22  }
  0x1f   :  { %s7390_s6 = sld [smem:[%s8221_s0 + %s7228_s28]]   ;;  %s7232_s28 = smov 25  }
  0x20   :  { %8276 = sst [smem:[#allocation53_spill]] %s7360_s20 }
  0x21   :  { %8277 = sst [smem:[#allocation54_spill]] %s7365_s27 }
  0x22   :  { %8278 = sst [smem:[#allocation55_spill]] %s7370_s4 }
  0x23   :  { %s7380_s20 = sld [smem:[%s8221_s0 + %s7226_s15]]   ;;  %s7230_s15 = smov 23  }
  0x24   :  { %s7385_s27 = sld [smem:[%s8221_s0 + %s7227_s22]]   ;;  %s7231_s22 = smov 24  }
  0x25   :  { %8280 = sst [smem:[#allocation57_spill]] %s7390_s6 }
  0x26   :  { %s7395_s4 = sld [smem:[%s8221_s0 + %s7229_s7]]   ;;  %s7233_s7 = smov 26  }
  0x27   :  { %s7405_s24 = sld [smem:[%s8221_s0 + %s7231_s22]]   ;;  %s7235_s22 = smov 28  }
  0x28   :  { %s7410_s6 = sld [smem:[%s8221_s0 + %s7232_s28]]   ;;  %s7236_s28 = smov 29  }
  0x29   :  { %8279 = sst [smem:[#allocation56_spill]] %s7380_s20 }
  0x2a   :  { %s7400_s20 = sld [smem:[%s8221_s0 + %s7230_s15]]   ;;  %s7234_s15 = smov 27  }
  0x2b   :  { %s7425_s17 = sld [smem:[%s8221_s0 + %s7235_s22]]   ;;  %s7239_s22 = smov 32  }
  0x2c   :  { %8281 = sst [smem:[#allocation58_spill]] %s7395_s4 }
  0x2d   :  { %s7415_s4 = sld [smem:[%s8221_s0 + %s7233_s7]]   ;;  %s7237_s7 = smov 30  }
  0x2e   :  { %8283 = sst [smem:[#allocation60_spill]] %s7410_s6 }
  0x2f   :  { %s7430_s6 = sld [smem:[%s8221_s0 + %s7236_s28]]   ;;  %s7240_s28 = smov 33  }
  0x30   :  { %8282 = sst [smem:[#allocation59_spill]] %s7400_s20 }
  0x31   :  { %s7420_s20 = sld [smem:[%s8221_s0 + %s7234_s15]]   ;;  %s7238_s15 = smov 31  }
  0x32   :  { %s7435_s13 = sld [smem:[%s8221_s0 + %s7237_s7]]   ;;  %s7241_s7 = smov 34  }
  0x33   :  { %8284 = sst [smem:[#allocation61_spill]] %s7415_s4 }
  0x34   :  { %s7445_s8 = sld [smem:[%s8221_s0 + %s7239_s22]]   ;;  %s7243_s22 = smov 36  }
  0x35   :  { %8286 = sst [smem:[#allocation63_spill]] %s7430_s6 }
  0x36   :  { %s7450_s6 = sld [smem:[%s8221_s0 + %s7240_s28]]   ;;  %s7244_s28 = smov 37  }
  0x37   :  { %8285 = sst [smem:[#allocation62_spill]] %s7420_s20 }
  0x38   :  { %8287 = sst [smem:[#allocation64_spill]] %s7435_s13 }
  0x39   :  { %s7440_s20 = sld [smem:[%s8221_s0 + %s7238_s15]]   ;;  %s7242_s15 = smov 35  }
  0x3a   :  { %8288 = sst [smem:[#allocation65_spill]] %s7445_s8 }
  0x3b   :  { %s7455_s13 = sld [smem:[%s8221_s0 + %s7241_s7]]   ;;  %s7245_s7 = smov 38  }
  0x3c   :  { %s7460_s3 = sld [smem:[%s8221_s0 + %s7242_s15]]   ;;  %s7246_s15 = smov 39  }
  0x3d   :  { %s7465_s8 = sld [smem:[%s8221_s0 + %s7243_s22]]   ;;  %s7247_s22 = smov 40  }
  0x3e   :  { %s7470_s14 = sld [smem:[%s8221_s0 + %s7244_s28]]   ;;  %s7248_s28 = smov 41  }
  0x3f   :  { %s7480_s25 = sld [smem:[%s8221_s0 + %s7246_s15]]   ;;  %s7250_s15 = smov 43  }
  0x40   :  { %s7485_s9 = sld [smem:[%s8221_s0 + %s7247_s22]]   ;;  %s7251_s22 = smov 44  }
  0x41   :  { %8289 = sst [smem:[#allocation66_spill]] %s7455_s13 }
  0x42   :  { %8290 = sst [smem:[#allocation67_spill]] %s7460_s3 }
  0x43   :  { %8291 = sst [smem:[#allocation68_spill]] %s7465_s8 }
  0x44   :  { %8292 = sst [smem:[#allocation69_spill]] %s7470_s14 }
  0x45   :  { %s7475_s13 = sld [smem:[%s8221_s0 + %s7245_s7]]   ;;  %s7249_s7 = smov 42  }
  0x46   :  { %8293 = sst [smem:[#allocation70_spill]] %s7480_s25 }
  0x47   :  { %8294 = sst [smem:[#allocation71_spill]] %s7485_s9 }
  0x48   :  { %s7490_s14 = sld [smem:[%s8221_s0 + %s7248_s28]]   ;;  %s7252_s28 = smov 45  }
  0x49   :  { %s7495_s5 = sld [smem:[%s8221_s0 + %s7249_s7]]   ;;  %s7253_s7 = smov 46  }
  0x4a   :  { %s7500_s25 = sld [smem:[%s8221_s0 + %s7250_s15]]   ;;  %s7254_s15 = smov 47  }
  0x4b   :  { %s7505_s9 = sld [smem:[%s8221_s0 + %s7251_s22]]  }
  0x4c   :  { %s7515_s8 = sld [smem:[%s8221_s0 + %s7253_s7]]  }
  0x4e   :  { %8295 = sst [smem:[#allocation72_spill]] %s7490_s14 }
  0x4f   :  { %s7510_s14 = sld [smem:[%s8221_s0 + %s7252_s28]]  }
  0x50   :  { %8296 = sst [smem:[#allocation73_spill]] %s7500_s25 }
  0x51   :  { %s7520_s25 = sld [smem:[%s8221_s0 + %s7254_s15]]  }
  0x52   :  { %100 = vsyncpa [#allocation5], 0 }
  0x53   :  { %101 = vsyncpa [#allocation7], 0 }
  0x54   :  { %102 = vsyncpa [#allocation10], 0 }
  0x55   :  { %103 = vsyncpa [#allocation13], 0 }
  0x56   :  { %104 = vsyncpa [#allocation16], 0 }
  0x57   :  { %105 = vsyncpa [#allocation19], 0 }
  0x58   :  { %106 = vsyncpa [#allocation22], 0 }
  0x59   :  { %107 = vsyncpa [#allocation25], 0 }
  0x5a   :  { %108 = vsyncpa [#allocation28], 0 }
  0x5b   :  { %109 = vsyncpa [#allocation31], 0  ;;  %s7522_s22 = smov 0  }
  0x5c LB: > { %s7255_s0 = smov [#allocation6]   ;;  %s7528_s26 = sadd.s32 4294967295, %s7206_s22   ;;  %s7206_s22 = sphi %s7522_s22, %s115_s22  }
  0x5d   : > { %s1179_s23 = sshll.u32 %s7255_s0, 4  ;;  %p5404_p0 = scmp.ge.s32.totalorder %s7206_s22, 1  ;;  %s1180_s23 = int_to_ptr.vmem [resolvable:$true] %s1179_s23 }
  0x5e   : > { %p1128_p1 = scmp.lt.s32.totalorder %s7206_s22, 3  ;;  %p8247_p3 = scmp.eq.s32.totalorder %s7528_s26, 0 }
  0x5f   : > { %s7256_s1 = smov [#allocation9]   ;;  %s7257_s7 = smov [#allocation12]  }
  0x60   : > { %p7534_p4 = pnand %p5404_p0, %p1128_p1  ;;  %s1207_s2 = sshll.u32 %s7256_s1, 4  ;;  %s7540_s2 = int_to_ptr.vmem [resolvable:$true] %s1207_s2 }
  0x61   : > { %s1241_s10 = sshll.u32 %s7257_s7, 4  ;;  %s7258_s15 = smov [#allocation15]   ;;  %s7548_s10 = int_to_ptr.vmem [resolvable:$true] %s1241_s10 }
  0x62   : > { %s8297_s28 = scalar_select %p7534_p4, 1, 0 }
  0x63   : > { %p6449_p5 = pneg %p7534_p4  ;;  %s1275_s16 = sshll.u32 %s7258_s15, 4  ;;  %s7550_s16 = int_to_ptr.vmem [resolvable:$true] %s1275_s16 }
  0x64   : > { %s6703_s0 = scalar_lea.vmem %s1180_s23, 16  ;;  %s6710_s1 = scalar_lea.vmem %s1180_s23, 32 }
  0x65   : > { %p7544_p6 = pnand %p8247_p3, %p6449_p5  ;;  %p6704_p8 = scmp.ne.s32.totalorder %s1180_s23, %s6703_s0 }
  0x66   : > { %p6711_p11 = scmp.lt.s32.totalorder %s1180_s23, %s1180_s23  ;;  %p6712_p12 = scmp.lt.s32.totalorder %s6710_s1, %s6703_s0 }
  0x67   : > { %p7554_p7 = pneg %p7544_p6 }
  0x68   : > { %p6713_p13 = por %p6712_p12, %p6711_p11 }
  0x69   : > { %p6706_p9 = pnand %p6704_p8, %p7554_p7 }
  0x6b   : > { %p6707_p10 = pneg %p6706_p9 }
  0x6d   : > { %p6714_p0 = pnand %p6713_p13, %p6707_p10 }
  0x6f   : > { %6717 = shalt.err (!%p6714_p0)
}
  0x70   : > { %6455 = dma.hbm_to_vmem [thread:$0]  (!%p7544_p6), %s7335_s19, 16, %s1180_s23, [#allocation7]  }
  0x71   : > { %s6729_s7 = scalar_lea.vmem %s7540_s2, 16  ;;  %s6736_s15 = scalar_lea.vmem %s7540_s2, 32 }
  0x72   : > { %p6730_p1 = scmp.ne.s32.totalorder %s7540_s2, %s6729_s7  ;;  %p6737_p9 = scmp.lt.s32.totalorder %s7540_s2, %s7540_s2 }
  0x73   : > { %p6738_p11 = scmp.lt.s32.totalorder %s6736_s15, %s6729_s7 }
  0x74   : > { %p6732_p5 = pnand %p6730_p1, %p7554_p7 }
  0x75   : > { %p6739_p10 = por %p6738_p11, %p6737_p9 }
  0x76   : > { %p6733_p8 = pneg %p6732_p5 }
  0x78   : > { %p6740_p12 = pnand %p6739_p10, %p6733_p8 }
  0x7a   : > { %6743 = shalt.err (!%p6740_p12)
}
  0x7b   : > { %6461 = dma.hbm_to_vmem [thread:$0]  (!%p7544_p6), %s7355_s12, 16, %s7540_s2, [#allocation10]  }
  0x7c   : > { %s6755_s23 = scalar_lea.vmem %s7548_s10, 16  ;;  %s6762_s0 = scalar_lea.vmem %s7548_s10, 32 }
  0x7d   : > { %p6756_p13 = scmp.ne.s32.totalorder %s7548_s10, %s6755_s23  ;;  %p6763_p5 = scmp.lt.s32.totalorder %s7548_s10, %s7548_s10 }
  0x7e   : > { %p6764_p8 = scmp.lt.s32.totalorder %s6762_s0, %s6755_s23 }
  0x7f   : > { %p6758_p0 = pnand %p6756_p13, %p7554_p7 }
  0x80   : > { %p6765_p9 = por %p6764_p8, %p6763_p5 }
  0x81   : > { %p6759_p1 = pneg %p6758_p0 }
  0x83   : > { %p6766_p11 = pnand %p6765_p9, %p6759_p1 }
  0x85   : > { %6769 = shalt.err (!%p6766_p11)
}
  0x86   : > { %6467 = dma.hbm_to_vmem [thread:$0]  (!%p7544_p6), %s7385_s27, 16, %s7548_s10, [#allocation13]  }
  0x87   : > { %s6781_s2 = scalar_lea.vmem %s7550_s16, 16  ;;  %s6788_s1 = scalar_lea.vmem %s7550_s16, 32 }
  0x88   : > { %p6782_p10 = scmp.ne.s32.totalorder %s7550_s16, %s6781_s2  ;;  %p6789_p0 = scmp.lt.s32.totalorder %s7550_s16, %s7550_s16 }
  0x89   : > { %p6790_p1 = scmp.lt.s32.totalorder %s6788_s1, %s6781_s2 }
  0x8a   : > { %p6784_p12 = pnand %p6782_p10, %p7554_p7 }
  0x8b   : > { %p6791_p5 = por %p6790_p1, %p6789_p0 }
  0x8c   : > { %p6785_p13 = pneg %p6784_p12 }
  0x8e   : > { %p6792_p8 = pnand %p6791_p5, %p6785_p13 }
  0x90   : > { %6795 = shalt.err (!%p6792_p8)
}
  0x91   : > { %s8300_s4 = sld [smem:[#allocation61_spill]]  ;;  %s7259_s7 = smov [#allocation18]  }
  0x92   : > { %s1306_s10 = sshll.u32 %s7259_s7, 4  ;;  %s7260_s15 = smov [#allocation21]   ;;  %s1307_s10 = int_to_ptr.vmem [resolvable:$true] %s1306_s10 }
  0x93   : > { %s1333_s23 = sshll.u32 %s7260_s15, 4  ;;  %s6807_s0 = scalar_lea.vmem %s1307_s10, 16  ;;  %s1334_s23 = int_to_ptr.vmem [resolvable:$true] %s1333_s23 }
  0x94   : > { %p6808_p9 = scmp.ne.s32.totalorder %s1307_s10, %s6807_s0  ;;  %s6814_s2 = scalar_lea.vmem %s1307_s10, 32 }
  0x95   : > { %p6815_p12 = scmp.lt.s32.totalorder %s1307_s10, %s1307_s10  ;;  %p6816_p13 = scmp.lt.s32.totalorder %s6814_s2, %s6807_s0 }
  0x96   : > { %p6810_p11 = pnand %p6808_p9, %p7554_p7 }
  0x97   : > { %6473 = dma.hbm_to_vmem [thread:$0]  (!%p7544_p6), %s8300_s4, 16, %s7550_s16, [#allocation16]  }
  0x98   : > { %p6811_p10 = pneg %p6810_p11  ;;  %p6817_p0 = por %p6816_p13, %p6815_p12 }
  0x9a   : > { %p6818_p1 = pnand %p6817_p0, %p6811_p10 }
  0x9c   : > { %6821 = shalt.err (!%p6818_p1)
}
  0x9d   : > { %6479 = dma.hbm_to_vmem [thread:$0]  (!%p7544_p6), %s7440_s20, 16, %s1307_s10, [#allocation19]  }
  0x9e   : > { %s6833_s16 = scalar_lea.vmem %s1334_s23, 256  ;;  %p6841_p3 = scmp.lt.s32.totalorder %s1334_s23, %s1334_s23 }
  0x9f   : > { %p6834_p5 = scmp.ne.s32.totalorder %s1334_s23, %s6833_s16  ;;  %p6842_p9 = scmp.lt.s32.totalorder %s6833_s16, %s6833_s16 }
  0xa1   : > { %p6836_p8 = pnand %p6834_p5, %p7554_p7  ;;  %p6843_p11 = por %p6842_p9, %p6841_p3 }
  0xa3   : > { %p6837_p2 = pneg %p6836_p8 }
  0xa5   : > { %p6844_p4 = pnand %p6843_p11, %p6837_p2 }
  0xa7   : > { %6847 = shalt.err (!%p6844_p4)
}
  0xa8   : > { %s8249_s1 = smov 128   ;;  %s8301_s3 = sld [smem:[#allocation67_spill]] }
  0xa9   : > { %s8250_s7 = smov 8   ;;  %s7263_s10 = smov [#allocation24]  }
  0xaa   : > { %s1361_s15 = sshll.u32 %s7263_s10, 4  ;;  %s7264_s0 = smov [#allocation27]   ;;  %s1362_s15 = int_to_ptr.vmem [resolvable:$true] %s1361_s15 }
  0xab   : > { %s1391_s2 = sshll.u32 %s7264_s0, 4  ;;  %s6859_s4 = scalar_lea.vmem %s1362_s15, 16  ;;  %s1392_s2 = int_to_ptr.vmem [resolvable:$true] %s1391_s2 }
  0xac   : > { %p6860_p10 = scmp.ne.s32.totalorder %s1362_s15, %s6859_s4  ;;  %s6866_s16 = scalar_lea.vmem %s1362_s15, 32 }
  0xad   : > { %p6867_p4 = scmp.lt.s32.totalorder %s1362_s15, %s1362_s15  ;;  %p6868_p12 = scmp.lt.s32.totalorder %s6866_s16, %s6859_s4 }
  0xae   : > { %6485 = dma.hbm_to_vmem [thread:$0]  (!%p7544_p6), %s8301_s3, 256, %s1334_s23, [#allocation22], %s8249_s1, %s8249_s1, %s8250_s7  }
  0xaf   : > { %p6862_p2 = pnand %p6860_p10, %p7554_p7  ;;  %p6869_p13 = por %p6868_p12, %p6867_p4 }
  0xb1   : > { %p6863_p3 = pneg %p6862_p2 }
  0xb3   : > { %p6870_p0 = pnand %p6869_p13, %p6863_p3 }
  0xb5   : > { %6873 = shalt.err (!%p6870_p0)
}
  0xb6   : > { %6491 = dma.hbm_to_vmem [thread:$0]  (!%p7544_p6), %s7475_s13, 16, %s1362_s15, [#allocation25]  }
  0xb7   : > { %s6885_s23 = scalar_lea.vmem %s1392_s2, 16  ;;  %s6892_s10 = scalar_lea.vmem %s1392_s2, 32 }
  0xb8   : > { %p6886_p1 = scmp.ne.s32.totalorder %s1392_s2, %s6885_s23  ;;  %p6893_p9 = scmp.lt.s32.totalorder %s1392_s2, %s1392_s2 }
  0xb9   : > { %p6894_p11 = scmp.lt.s32.totalorder %s6892_s10, %s6885_s23 }
  0xba   : > { %p6888_p5 = pnand %p6886_p1, %p7554_p7 }
  0xbb   : > { %p6895_p10 = por %p6894_p11, %p6893_p9 }
  0xbc   : > { %p6889_p8 = pneg %p6888_p5 }
  0xbe   : > { %p6896_p2 = pnand %p6895_p10, %p6889_p8 }
  0xc0   : > { %6899 = shalt.err (!%p6896_p2)
}
  0xc1   : > { %6497 = dma.hbm_to_vmem [thread:$0]  (!%p7544_p6), %s7495_s5, 16, %s1392_s2, [#allocation28]  }
  0xc2   : > { %s7265_s4 = smov [#allocation4]   ;;  %s7266_s15 = smov [#allocation8]  }
  0xc3   : > { %s1159_s0 = sshll.u32 %s7265_s4, 4  ;;  %s1193_s16 = sshll.u32 %s7266_s15, 4  ;;  %s1160_s0 = int_to_ptr.vmem [resolvable:$true] %s1159_s0  ;;  %s1194_s16 = int_to_ptr.vmem [resolvable:$true] %s1193_s16 }
  0xc4   : > { %s6911_s1 = scalar_lea.vmem %s1160_s0, 32  ;;  %p6919_p13 = scmp.lt.s32.totalorder %s1160_s0, %s1160_s0 }
  0xc5   : > { %p6912_p3 = scmp.ne.s32.totalorder %s1160_s0, %s6911_s1  ;;  %p6920_p0 = scmp.lt.s32.totalorder %s6911_s1, %s6911_s1 }
  0xc7   : > { %p6914_p4 = pnand %p6912_p3, %p7554_p7  ;;  %p6921_p1 = por %p6920_p0, %p6919_p13 }
  0xc9   : > { %p6915_p12 = pneg %p6914_p4 }
  0xcb   : > { %p6922_p5 = pnand %p6921_p1, %p6915_p12 }
  0xcd   : > { %6925 = shalt.err (!%p6922_p5)
}
  0xce   : > { %6452 = dma.hbm_to_vmem [thread:$0]  (!%p7544_p6), %s7315_s29, 32, %s1160_s0, [#allocation5]  }
  0xcf   : > { %s6937_s2 = scalar_lea.vmem %s1194_s16, 16  ;;  %s6944_s23 = scalar_lea.vmem %s1194_s16, 32 }
  0xd0   : > { %p6938_p8 = scmp.ne.s32.totalorder %s1194_s16, %s6937_s2  ;;  %p6945_p10 = scmp.lt.s32.totalorder %s1194_s16, %s1194_s16 }
  0xd1   : > { %p6946_p2 = scmp.lt.s32.totalorder %s6944_s23, %s6937_s2 }
  0xd2   : > { %p6940_p9 = pnand %p6938_p8, %p7554_p7 }
  0xd3   : > { %p6947_p3 = por %p6946_p2, %p6945_p10 }
  0xd4   : > { %p6941_p11 = pneg %p6940_p9 }
  0xd6   : > { %p6948_p4 = pnand %p6947_p3, %p6941_p11 }
  0xd8   : > { %6951 = shalt.err (!%p6948_p4)
}
  0xd9   : > { %6458 = dma.hbm_to_vmem [thread:$0]  (!%p7544_p6), %s7345_s30, 16, %s1194_s16, [#allocation7]  }
  0xda   : > { %s7267_s1 = smov [#allocation11]   ;;  %s7268_s4 = smov [#allocation14]  }
  0xdb   : > { %s1227_s10 = sshll.u32 %s7267_s1, 4  ;;  %s1261_s0 = sshll.u32 %s7268_s4, 4  ;;  %s1228_s10 = int_to_ptr.vmem [resolvable:$true] %s1227_s10  ;;  %s1262_s0 = int_to_ptr.vmem [resolvable:$true] %s1261_s0 }
  0xdc   : > { %s6963_s15 = scalar_lea.vmem %s1228_s10, 16  ;;  %s6970_s7 = scalar_lea.vmem %s1228_s10, 32 }
  0xdd   : > { %p6964_p12 = scmp.ne.s32.totalorder %s1228_s10, %s6963_s15  ;;  %p6971_p1 = scmp.lt.s32.totalorder %s1228_s10, %s1228_s10 }
  0xde   : > { %p6972_p5 = scmp.lt.s32.totalorder %s6970_s7, %s6963_s15 }
  0xdf   : > { %p6966_p13 = pnand %p6964_p12, %p7554_p7 }
  0xe0   : > { %p6973_p8 = por %p6972_p5, %p6971_p1 }
  0xe1   : > { %p6967_p0 = pneg %p6966_p13 }
  0xe3   : > { %p6974_p9 = pnand %p6973_p8, %p6967_p0 }
  0xe5   : > { %6977 = shalt.err (!%p6974_p9)
}
  0xe6   : > { %6464 = dma.hbm_to_vmem [thread:$0]  (!%p7544_p6), %s7375_s21, 16, %s1228_s10, [#allocation10]  }
  0xe7   : > { %s6989_s16 = scalar_lea.vmem %s1262_s0, 16  ;;  %s6996_s2 = scalar_lea.vmem %s1262_s0, 32 }
  0xe8   : > { %p6990_p11 = scmp.ne.s32.totalorder %s1262_s0, %s6989_s16  ;;  %p6997_p3 = scmp.lt.s32.totalorder %s1262_s0, %s1262_s0 }
  0xe9   : > { %p6998_p4 = scmp.lt.s32.totalorder %s6996_s2, %s6989_s16 }
  0xea   : > { %p6992_p10 = pnand %p6990_p11, %p7554_p7 }
  0xeb   : > { %p6999_p12 = por %p6998_p4, %p6997_p3 }
  0xec   : > { %p6993_p2 = pneg %p6992_p10 }
  0xee   : > { %p7000_p13 = pnand %p6999_p12, %p6993_p2 }
  0xf0   : > { %7003 = shalt.err (!%p7000_p13)
}
  0xf1   : > { %6470 = dma.hbm_to_vmem [thread:$0]  (!%p7544_p6), %s7405_s24, 16, %s1262_s0, [#allocation13]  }
  0xf2   : > { %s7269_s7 = smov [#allocation17]   ;;  %s7270_s1 = smov [#allocation20]  }
  0xf3   : > { %s1289_s23 = sshll.u32 %s7269_s7, 4  ;;  %s1320_s10 = sshll.u32 %s7270_s1, 4  ;;  %s1290_s23 = int_to_ptr.vmem [resolvable:$true] %s1289_s23  ;;  %s1321_s10 = int_to_ptr.vmem [resolvable:$true] %s1320_s10 }
  0xf4   : > { %s7015_s4 = scalar_lea.vmem %s1290_s23, 16  ;;  %s7022_s15 = scalar_lea.vmem %s1290_s23, 32 }
  0xf5   : > { %p7016_p0 = scmp.ne.s32.totalorder %s1290_s23, %s7015_s4  ;;  %p7023_p8 = scmp.lt.s32.totalorder %s1290_s23, %s1290_s23 }
  0xf6   : > { %p7024_p9 = scmp.lt.s32.totalorder %s7022_s15, %s7015_s4 }
  0xf7   : > { %p7018_p1 = pnand %p7016_p0, %p7554_p7 }
  0xf8   : > { %p7025_p11 = por %p7024_p9, %p7023_p8 }
  0xf9   : > { %p7019_p5 = pneg %p7018_p1 }
  0xfb   : > { %p7026_p10 = pnand %p7025_p11, %p7019_p5 }
  0xfd   : > { %7029 = shalt.err (!%p7026_p10)
}
  0xfe   : > { %6476 = dma.hbm_to_vmem [thread:$0]  (!%p7544_p6), %s7425_s17, 16, %s1290_s23, [#allocation16]  }
  0xff   : > { %s7041_s0 = scalar_lea.vmem %s1321_s10, 16  ;;  %s7048_s16 = scalar_lea.vmem %s1321_s10, 32 }
 0x100   : > { %p7042_p2 = scmp.ne.s32.totalorder %s1321_s10, %s7041_s0  ;;  %p7049_p12 = scmp.lt.s32.totalorder %s1321_s10, %s1321_s10 }
 0x101   : > { %p7050_p13 = scmp.lt.s32.totalorder %s7048_s16, %s7041_s0 }
 0x102   : > { %p7044_p3 = pnand %p7042_p2, %p7554_p7 }
 0x103   : > { %p7051_p0 = por %p7050_p13, %p7049_p12 }
 0x104   : > { %p7045_p4 = pneg %p7044_p3 }
 0x106   : > { %p7052_p1 = pnand %p7051_p0, %p7045_p4 }
 0x108   : > { %7055 = shalt.err (!%p7052_p1)
}
 0x109   : > { %6482 = dma.hbm_to_vmem [thread:$0]  (!%p7544_p6), %s7450_s6, 16, %s1321_s10, [#allocation19]  }
 0x10a   : > { %s7271_s2 = smov [#allocation23]   ;;  %s7272_s23 = smov [#allocation26]  }
 0x10b   : > { %s1347_s7 = sshll.u32 %s7271_s2, 4  ;;  %s1377_s1 = sshll.u32 %s7272_s23, 4  ;;  %s1348_s7 = int_to_ptr.vmem [resolvable:$true] %s1347_s7  ;;  %s1378_s1 = int_to_ptr.vmem [resolvable:$true] %s1377_s1 }
 0x10c   : > { %s7067_s4 = scalar_lea.vmem %s1348_s7, 16  ;;  %s7074_s15 = scalar_lea.vmem %s1348_s7, 32 }
 0x10d   : > { %p7068_p5 = scmp.ne.s32.totalorder %s1348_s7, %s7067_s4  ;;  %p7075_p11 = scmp.lt.s32.totalorder %s1348_s7, %s1348_s7 }
 0x10e   : > { %p7076_p10 = scmp.lt.s32.totalorder %s7074_s15, %s7067_s4 }
 0x10f   : > { %p7070_p8 = pnand %p7068_p5, %p7554_p7 }
 0x110   : > { %p7077_p2 = por %p7076_p10, %p7075_p11 }
 0x111   : > { %p7071_p9 = pneg %p7070_p8 }
 0x113   : > { %p7078_p3 = pnand %p7077_p2, %p7071_p9 }
 0x115   : > { %7081 = shalt.err (!%p7078_p3)
}
 0x116   : > { %s8302_s0 = sld [smem:[#allocation68_spill]]  ;;  %s7093_s10 = scalar_lea.vmem %s1378_s1, 256 }
 0x117   : > { %p7094_p4 = scmp.ne.s32.totalorder %s1378_s1, %s7093_s10  ;;  %p7101_p0 = scmp.lt.s32.totalorder %s1378_s1, %s1378_s1 }
 0x118   : > { %p7102_p1 = scmp.lt.s32.totalorder %s7093_s10, %s7093_s10 }
 0x119   : > { %p7096_p12 = pnand %p7094_p4, %p7554_p7 }
 0x11a   : > { %p7103_p5 = por %p7102_p1, %p7101_p0 }
 0x11b   : > { %p7097_p13 = pneg %p7096_p12 }
 0x11c   : > { %6488 = dma.hbm_to_vmem [thread:$0]  (!%p7544_p6), %s8302_s0, 16, %s1348_s7, [#allocation22]  }
 0x11d   : > { %p7104_p8 = pnand %p7103_p5, %p7097_p13 }
 0x11f   : > { %7107 = shalt.err (!%p7104_p8)
}
 0x120   : > { %s8303_s16 = smov 8   ;;  %s8304_s2 = smov 128  }
 0x121   : > { %s8305_s23 = sld [smem:[#allocation72_spill]]  ;;  %s7273_s7 = smov [#allocation29]  }
 0x122   : > { %s1405_s4 = sshll.u32 %s7273_s7, 4  ;;  %s7274_s15 = smov [#allocation30]   ;;  %s1406_s4 = int_to_ptr.vmem [resolvable:$true] %s1405_s4 }
 0x123   : > { %s1419_s0 = sshll.u32 %s7274_s15, 4  ;;  %s7119_s3 = scalar_lea.vmem %s1406_s4, 16  ;;  %s1420_s0 = int_to_ptr.vmem [resolvable:$true] %s1419_s0 }
 0x124   : > { %p7120_p9 = scmp.ne.s32.totalorder %s1406_s4, %s7119_s3  ;;  %s7126_s10 = scalar_lea.vmem %s1406_s4, 32 }
 0x125   : > { %p7127_p2 = scmp.lt.s32.totalorder %s1406_s4, %s1406_s4  ;;  %p7128_p3 = scmp.lt.s32.totalorder %s7126_s10, %s7119_s3 }
 0x126   : > { %p7122_p11 = pnand %p7120_p9, %p7554_p7 }
 0x127   : > { %6494 = dma.hbm_to_vmem [thread:$0]  (!%p7544_p6), %s8305_s23, 256, %s1378_s1, [#allocation25], %s8304_s2, %s8304_s2, %s8303_s16  }
 0x128   : > { %p7123_p10 = pneg %p7122_p11  ;;  %p7129_p4 = por %p7128_p3, %p7127_p2 }
 0x12a   : > { %p7130_p12 = pnand %p7129_p4, %p7123_p10 }
 0x12c   : > { %7133 = shalt.err (!%p7130_p12)
}
 0x12d   : > { %6500 = dma.hbm_to_vmem [thread:$0]  (!%p7544_p6), %s7505_s9, 16, %s1406_s4, [#allocation28]  }
 0x12e   : > { %s7145_s1 = scalar_lea.vmem %s1420_s0, 16  ;;  %s7152_s16 = scalar_lea.vmem %s1420_s0, 32 }
 0x12f   : > { %p7146_p13 = scmp.ne.s32.totalorder %s1420_s0, %s7145_s1  ;;  %p7153_p5 = scmp.lt.s32.totalorder %s1420_s0, %s1420_s0 }
 0x130   : > { %p7154_p8 = scmp.lt.s32.totalorder %s7152_s16, %s7145_s1 }
 0x131   : > { %p7148_p0 = pnand %p7146_p13, %p7554_p7 }
 0x132   : > { %p7155_p9 = por %p7154_p8, %p7153_p5 }
 0x133   : > { %p7149_p1 = pneg %p7148_p0 }
 0x135   : > { %p7156_p11 = pnand %p7155_p9, %p7149_p1 }
 0x137   : > { %7159 = shalt.err (!%p7156_p11)
}
 0x138   : > { %6503 = dma.hbm_to_vmem [thread:$0]  (!%p7544_p6), %s7515_s8, 16, %s1420_s0, [#allocation31]  }
 0x139   : > { %p8306_p10 = scmp.ne.s32.totalorder %s8297_s28, 0 }
 0x13a   : > { %p8307_p2 = scmp.eq.s32.totalorder (!%p8306_p10), %s7528_s26, 0 }
 0x13b   : > { %1432 = sbr.rel (%p8306_p10) target bundleno = 4501 (0x1195), region = 208 }
 0x140   : > { %7165 = dma.done.wait (%p8307_p2), [#allocation5], 32   ;;  %p8308_p3 = pmov %p8307_p2 }
 0x141   : > { %p8309_p7 = pmov %p8307_p2 }
 0x142   : > { %7167 = vsyncadd (%p8308_p3), [#allocation5], 4294967264 }
 0x143   : > { %7169 = dma.done.wait (%p8309_p7), [#allocation7], 32   ;;  %p8310_p4 = pmov %p8307_p2 }
 0x144   : > { %p8311_p12 = pmov %p8307_p2 }
 0x145   : > { %7171 = vsyncadd (%p8310_p4), [#allocation7], 4294967264 }
 0x146   : > { %7173 = dma.done.wait (%p8311_p12), [#allocation10], 32   ;;  %p8312_p6 = pmov %p8307_p2 }
 0x147   : > { %p8313_p13 = pmov %p8307_p2 }
 0x148   : > { %7175 = vsyncadd (%p8312_p6), [#allocation10], 4294967264 }
 0x149   : > { %7177 = dma.done.wait (%p8313_p13), [#allocation13], 32   ;;  %p8314_p0 = pmov %p8307_p2 }
 0x14b   : > { %7179 = vsyncadd (%p8314_p0), [#allocation13], 4294967264  ;;  %p8315_p1 = pmov %p8314_p0 }
 0x14c   : > { %p8316_p5 = pmov %p8314_p0 }
 0x14d   : > { %7181 = dma.done.wait (%p8315_p1), [#allocation16], 32  }
 0x14e   : > { %7183 = vsyncadd (%p8316_p5), [#allocation16], 4294967264  ;;  %p8317_p8 = pmov %p8314_p0 }
 0x14f   : > { %p8318_p9 = pmov %p8314_p0 }
 0x150   : > { %7185 = dma.done.wait (%p8317_p8), [#allocation19], 32  }
 0x151   : > { %7187 = vsyncadd (%p8318_p9), [#allocation19], 4294967264  ;;  %p8319_p11 = pmov %p8314_p0 }
 0x152   : > { %p8320_p10 = pmov %p8314_p0 }
 0x153   : > { %7189 = dma.done.wait (%p8319_p11), [#allocation22], 272  }
 0x154   : > { %7191 = vsyncadd (%p8320_p10), [#allocation22], 4294967024  ;;  %p8321_p2 = pmov %p8314_p0 }
 0x155   : > { %p8322_p3 = pmov %p8314_p0 }
 0x156   : > { %7193 = dma.done.wait (%p8321_p2), [#allocation25], 272  }
 0x157   : > { %7195 = vsyncadd (%p8322_p3), [#allocation25], 4294967024  ;;  %p8323_p7 = pmov %p8314_p0 }
 0x158   : > { %p8324_p4 = pmov %p8314_p0 }
 0x159   : > { %7197 = dma.done.wait (%p8323_p7), [#allocation28], 32  }
 0x15a   : > { %7199 = vsyncadd (%p8324_p4), [#allocation28], 4294967264  ;;  %p8325_p12 = pmov %p8314_p0 }
 0x15b   : > { %p8326_p6 = pmov %p8314_p0 }
 0x15c   : > { %7201 = dma.done.wait (%p8325_p12), [#allocation31], 16  }
 0x15d   : > { %7203 = vsyncadd (%p8326_p6), [#allocation31], 4294967280  ;;  %p8327_p13 = scmp.ne.s32.totalorder %s7528_s26, 0 }
 0x15e   : > { %s8328_s3 = sld [smem:[#allocation42_spill]] (!%p8327_p13) }
 0x15f   : > { %1605 = sbr.rel (%p8327_p13) target bundleno = 359 (0x167), region = 284  ;;  %s8329_s28 = sld [smem:[#allocation43_spill]] (!%p8327_p13) }
 0x164   : > { %v1606_v0 = vld [vmem:[%s8328_s3] sm:$0xff]  ;;  %vm1608_vm0 = vcmask 130048   ;;  %v1607_v1 = vld [vmem:[%s8328_s3 + $0x8] sm:$0xff]  ;;  %vm1612_vm1 = vcmask 123904  }
 0x165   : > { %v1611_v2 = vld [vmem:[%s8329_s28] sm:$0x3]  ;;  %1609 = vst.msk [vmem:[#allocation2] sm:$0xff] %vm1608_vm0, %v1606_v0  ;;  %1610 = vst.msk [vmem:[#allocation2 + $0x8] sm:$0xff] %vm1608_vm0, %v1607_v1 }
 0x166   : > { %1613 = vst.msk [vmem:[#allocation3] sm:$0x3] %vm1612_vm1, %v1611_v2 }
 0x167 PF: > { %s8330_s11 = sld [smem:[#allocation47_spill]]  ;;  %vm1695_vm2 = vcmask 1041408   ;;  %vm1688_vm3 = vcmask 15360   ;;  %vm1778_vm4 = vcmask 130048   ;;  %vm2454_vm5 = vcmask 261120  }
 0x168   : > { %s8331_s18 = sld [smem:[#allocation50_spill]]  ;;  %vm7276_vm6 = vmmov 0   ;;  %vm5159_vm7 = vcmask 123904  }
 0x169   : > { %s8332_s2 = sld [smem:[#allocation48_spill]] }
 0x16a   : > { %s8333_s23 = sld [smem:[#allocation49_spill]] }
 0x16b   : > { %s8334_s7 = sld [smem:[#allocation44_spill]] }
 0x16c   : > { %v7725_v10 = vld [vmem:[#allocation2] sm:$0xff]  ;;  %v7727_v11 = vld [vmem:[#allocation2 + $0x8] sm:$0xff]  ;;  %s8335_s4 = sld [smem:[#allocation45_spill]] }
 0x16d   : > { %v1616_v3 = vld [vmem:[#allocation3] sm:$0x3]  ;;  %v1685_v4 = vld [vmem:[%s8330_s11] sm:$0xff]  ;;  %v1686_v5 = vld [vmem:[%s8330_s11 + $0x8] sm:$0xff]  ;;  %s8336_s15 = sld [smem:[#allocation51_spill]] }
 0x16e   : > { %5954 = vmatprep.subr.msk.mxu0 %vm1695_vm2, %v1616_v3  ;;  %5956 = vmatprep.mubr.msk.f32.mxu0 %vm1688_vm3, %v1685_v4  ;;  %v1777_v6 = vld [vmem:[%s8331_s18 + $0x8] sm:$0xff]  ;;  %v1776_v8 = vld [vmem:[%s8331_s18] sm:$0xff]  ;;  %s8337_s0 = sld [smem:[#allocation55_spill]] }
 0x16f   : > { %5955 = vmatpush3.msk.msra.mxu0 %vm1695_vm2, %v1616_v3  ;;  %v1775_v7 = vld [vmem:[%s8332_s2 + $0x8] sm:$0xff]  ;;  %5959 = vmatprep.subr.mxu1 %v1777_v6  ;;  %v1774_v9 = vld [vmem:[%s8332_s2] sm:$0xff]  ;;  %s8338_s10 = sld [smem:[#allocation52_spill]] }
 0x170   : > { %5957 = vmatmul.mubr.msk.f32.vlgmr.msra.gmra.mxu0 %vm1688_vm3, %v1686_v5  ;;  %5966 = vmatprep.subr.mxu0 %v1775_v7  ;;  %v1942_v12 = vld [vmem:[%s8333_s23 + $0x8] sm:$0xff]  ;;  %v1941_v15 = vld [vmem:[%s8333_s23] sm:$0xff]  ;;  %s8339_s1 = sld [smem:[#allocation53_spill]] }
 0x171   : > { %5960 = vmatpush3.msra.mxu1 %v1777_v6  ;;  %5967 = vmatpush3.msra.mxu0 %v1775_v7  ;;  %v5630_v16 = vld [vmem:[%s8334_s7] sm:$0xff]   ;;  %v5697_v24 = vld [vmem:[%s8334_s7 + $0x8] sm:$0xff]   ;;  %v5698_v32 = vld [vmem:[%s8334_s7 + $0x10] sm:$0xff]   ;;  %s8340_s16 = sld [smem:[#allocation54_spill]] }
 0x172   : > { %5961 = vmatprep.subr.mxu1 %v1776_v8  ;;  %5968 = vmatprep.subr.mxu0 %v1774_v9  ;;  %v5631_v17 = vunpack.c.l.bf16 %v5630_v16  ;;  %v7749_v18 = vld [vmem:[%s8335_s4] sm:$0xff]   ;;  %v5632_v27 = vunpack.c.h.bf16 %v5630_v16  ;;  %v7758_v28 = vld [vmem:[%s8335_s4 + $0x8] sm:$0xff]   ;;  %v5635_v30 = vunpack.c.l.bf16 %v5697_v24  ;;  %v5636_v36 = vunpack.c.h.bf16 %v5697_v24  ;;  %v7766_v37 = vld [vmem:[%s8335_s4 + $0x10] sm:$0xff]   ;;  %s8341_s28 = sld [smem:[#allocation56_spill]] }
 0x173   : > { %5962 = vmatpush3.msra.mxu1 %v1776_v8  ;;  %5969 = vmatpush3.msra.mxu0 %v1774_v9  ;;  %v5663_v19 = vunpack.c.l.bf16 %v7749_v18  ;;  %v5664_v31 = vunpack.c.h.bf16 %v7749_v18  ;;  %v5667_v34 = vunpack.c.l.bf16 %v7758_v28  ;;  %v2446_v35 = vld [vmem:[%s8336_s15 + $0x18] sm:$0xff]  ;;  %v5639_v38 = vunpack.c.l.bf16 %v5698_v32  ;;  %v2445_v39 = vld [vmem:[%s8336_s15 + $0x10] sm:$0xff]  ;;  %v2444_v43 = vld [vmem:[%s8336_s15 + $0x8] sm:$0xff]  ;;  %s8346_s2 = sld [smem:[#allocation59_spill]] }
 0x174   : > { %5970 = vmatprep.mubr.msk.f32.mxu0 %vm1778_vm4, %v7725_v10  ;;  %5973 = vmatprep.subr.mxu1 %v1942_v12  ;;  %v5668_v40 = vunpack.c.h.bf16 %v7758_v28  ;;  %v5699_v41 = vld [vmem:[%s8334_s7 + $0x18] sm:$0xff]   ;;  %v5671_v42 = vunpack.c.l.bf16 %v7766_v37  ;;  %v5640_v44 = vunpack.c.h.bf16 %v5698_v32  ;;  %v5672_v47 = vunpack.c.h.bf16 %v7766_v37  ;;  %v5700_v48 = vld [vmem:[%s8334_s7 + $0x20] sm:$0xff]   ;;  %v5701_v54 = vld [vmem:[%s8334_s7 + $0x28] sm:$0xff]   ;;  %s8347_s3 = sld [smem:[#allocation60_spill]] }
 0x175   : > { %5971 = vmatmul.mubr.msk.f32.vlgmr.msra.gmra.mxu0 %vm1778_vm4, %v7727_v11  ;;  %v7782_v45 = vld [vmem:[%s8335_s4 + $0x18] sm:$0xff]   ;;  %v5643_v46 = vunpack.c.l.bf16 %v5699_v41  ;;  %v5644_v50 = vunpack.c.h.bf16 %v5699_v41  ;;  %v7796_v51 = vld [vmem:[%s8335_s4 + $0x20] sm:$0xff]   ;;  %v5647_v52 = vunpack.c.l.bf16 %v5700_v48  ;;  %v5648_v56 = vunpack.c.h.bf16 %v5700_v48  ;;  %v7810_v57 = vld [vmem:[%s8335_s4 + $0x28] sm:$0xff]  }
 0x176   : > { %5984 = vmatprep.mubr.msk.f32.mxu0 %vm1778_vm4, %v5663_v19  ;;  %v5675_v49 = vunpack.c.l.bf16 %v7782_v45  ;;  %v5676_v53 = vunpack.c.h.bf16 %v7782_v45  ;;  %v5679_v55 = vunpack.c.l.bf16 %v7796_v51  ;;  %v5651_v58 = vunpack.c.l.bf16 %v5701_v54  ;;  %v5702_v60 = vld [vmem:[%s8334_s7 + $0x30] sm:$0xff]   ;;  %v5703_v2 = vld [vmem:[%s8334_s7 + $0x38] sm:$0xff]   ;;  %v2871_v16 = vld [vmem:[%s8337_s0 + $0x8] sm:$0xff] }
 0x177   : > { %v5680_v59 = vunpack.c.h.bf16 %v7796_v51  ;;  %v5683_v61 = vunpack.c.l.bf16 %v7810_v57  ;;  %v5652_v62 = vunpack.c.h.bf16 %v5701_v54  ;;  %v7824_v63 = vld [vmem:[%s8335_s4 + $0x30] sm:$0xff]   ;;  %v5655_v0 = vunpack.c.l.bf16 %v5702_v60  ;;  %v7838_v5 = vld [vmem:[%s8335_s4 + $0x38] sm:$0xff]  }
 0x178   : > { %v5684_v1 = vunpack.c.h.bf16 %v7810_v57  ;;  %v5687_v3 = vunpack.c.l.bf16 %v7824_v63  ;;  %v5656_v4 = vunpack.c.h.bf16 %v5702_v60  ;;  %v5659_v6 = vunpack.c.l.bf16 %v5703_v2  ;;  %v3404_v18 = vld [vmem:[%s8341_s28 + $0x18] sm:$0xff]  ;;  %v3403_v28 = vld [vmem:[%s8341_s28 + $0x10] sm:$0xff] }
 0x179   : > { %v5688_v7 = vunpack.c.h.bf16 %v7824_v63  ;;  %v5691_v8 = vunpack.c.l.bf16 %v7838_v5  ;;  %v5660_v9 = vunpack.c.h.bf16 %v5703_v2 }
 0x230   : > { %v7734_v13 = vpop.f32.mrf.mxu0 }
 0x232   : > { %v7736_v14 = vpop.f32.mrf.mxu0 }
 0x233   : > { %5963 = vmatprep.mubr.msk.f32.mxu1 %vm1778_vm4, %v7736_v14 }
 0x234   : > { %5964 = vmatmul.mubr.msk.f32.vlgmr.msra.gmra.mxu1 %vm1778_vm4, %v7734_v13 }
 0x235   : > { %5974 = vmatpush3.msra.mxu1 %v1942_v12  ;;  %5977 = vmatprep.mubr.msk.f32.mxu1 %vm1778_vm4, %v7725_v10  ;;  %v5972_v20 = vpop.f32.mrf.mxu0  ;;  %v5692_v12 = vunpack.c.h.bf16 %v7838_v5 }
 0x236   : > { %5975 = vmatprep.subr.mxu1 %v1941_v15 }
 0x237   : > { %5976 = vmatpush3.msra.mxu1 %v1941_v15  ;;  %v1932_v22 = vpop.f32.mrf.mxu0  ;;  %v2443_v15 = vld [vmem:[%s8336_s15] sm:$0xff] }
 0x238   : > { %5978 = vmatmul.mubr.msk.f32.vlgmr.msra.gmra.mxu1 %vm1778_vm4, %v7727_v11 }
 0x239   : > { %6012 = vmatprep.mubr.msk.f32.mxu1 %vm1778_vm4, %v5631_v17  ;;  %v2667_v17 = vld [vmem:[%s8338_s10 + $0x18] sm:$0xff] }
 0x2f4   : > { %v5965_v21 = vpop.f32.mrf.mxu1 }
 0x2f5   : > { %v1938_v23 = vadd.f32 %v5972_v20, %v5965_v21  ;;  %v2666_v20 = vld [vmem:[%s8338_s10 + $0x10] sm:$0xff]  ;;  %v2665_v21 = vld [vmem:[%s8338_s10 + $0x8] sm:$0xff] }
 0x2f6   : > { %v1851_v25 = vpop.f32.mrf.mxu1 }
 0x2f7   : > { %v1933_v26 = vadd.f32 %v1932_v22, %v1851_v25  ;;  %6008 = vmatprep.subr.mxu1 %v1938_v23 }
 0x2f8   : > { %v5979_v29 = vpop.f32.mrf.mxu1  ;;  %6009 = vmatpush3.msra.mxu1 %v1938_v23 }
 0x2f9   : > { %5980 = vmatprep.subr.mxu0 %v5979_v29  ;;  %6010 = vmatprep.subr.mxu1 %v1933_v26 }
 0x2fa   : > { %v2009_v33 = vpop.f32.mrf.mxu1  ;;  %5981 = vmatpush3.msra.mxu0 %v5979_v29  ;;  %6011 = vmatpush3.msra.mxu1 %v1933_v26  ;;  %v7867_v26 = vld [vmem:[#allocation6] ss:$0 sm:$0xff] }
 0x2fb   : > { %5982 = vmatprep.subr.mxu0 %v2009_v33  ;;  %6013 = vmatmul.mubr.msk.f32.vlgmr.msra.gmra.mxu1 %vm1778_vm4, %v5632_v27 }
 0x2fc   : > { %5983 = vmatpush3.msra.mxu0 %v2009_v33  ;;  %6015 = vmatprep.mubr.msk.f32.mxu1 %vm1778_vm4, %v5635_v30 }
 0x2fd   : > { %5985 = vmatmul.mubr.msk.f32.vlgmr.msra.gmra.mxu0 %vm1778_vm4, %v5664_v31  ;;  %6036 = vmatprep.subr.mxu0 %v2446_v35 }
 0x2fe   : > { %5987 = vmatprep.mubr.msk.f32.mxu0 %vm1778_vm4, %v5667_v34  ;;  %6037 = vmatpush3.msra.mxu0 %v2446_v35 }
 0x2ff   : > { %6016 = vmatmul.mubr.msk.f32.gmra.mxu1 %vm1778_vm4, %v5636_v36  ;;  %6038 = vmatprep.subr.mxu0 %v2445_v39 }
 0x300   : > { %6018 = vmatprep.mubr.msk.f32.mxu1 %vm1778_vm4, %v5639_v38  ;;  %6039 = vmatpush3.msra.mxu0 %v2445_v39 }
 0x301   : > { %5988 = vmatmul.mubr.msk.f32.gmra.mxu0 %vm1778_vm4, %v5668_v40  ;;  %6040 = vmatprep.subr.mxu0 %v2444_v43 }
 0x302   : > { %5990 = vmatprep.mubr.msk.f32.mxu0 %vm1778_vm4, %v5671_v42  ;;  %6041 = vmatpush3.msra.mxu0 %v2444_v43 }
 0x303   : > { %6019 = vmatmul.mubr.msk.f32.gmra.mxu1 %vm1778_vm4, %v5640_v44  ;;  %6042 = vmatprep.subr.mxu0 %v2443_v15 }
 0x304   : > { %6021 = vmatprep.mubr.msk.f32.mxu1 %vm1778_vm4, %v5643_v46  ;;  %6043 = vmatpush3.msra.mxu0 %v2443_v15 }
 0x305   : > { %5991 = vmatmul.mubr.msk.f32.gmra.mxu0 %vm1778_vm4, %v5672_v47  ;;  %6100 = vmatprep.subr.mxu0 %v2871_v16 }
 0x306   : > { %5993 = vmatprep.mubr.msk.f32.mxu0 %vm1778_vm4, %v5675_v49  ;;  %6068 = vmatprep.subr.mxu1 %v2667_v17 }
 0x307   : > { %6022 = vmatmul.mubr.msk.f32.gmra.mxu1 %vm1778_vm4, %v5644_v50 }
 0x308   : > { %6024 = vmatprep.mubr.msk.f32.mxu1 %vm1778_vm4, %v5647_v52  ;;  %6069 = vmatpush3.msra.mxu1 %v2667_v17 }
 0x309   : > { %5994 = vmatmul.mubr.msk.f32.gmra.mxu0 %vm1778_vm4, %v5676_v53  ;;  %6070 = vmatprep.subr.mxu1 %v2666_v20 }
 0x30a   : > { %5996 = vmatprep.mubr.msk.f32.mxu0 %vm1778_vm4, %v5679_v55  ;;  %6071 = vmatpush3.msra.mxu1 %v2666_v20 }
 0x30b   : > { %6025 = vmatmul.mubr.msk.f32.gmra.mxu1 %vm1778_vm4, %v5648_v56  ;;  %6072 = vmatprep.subr.mxu1 %v2665_v21 }
 0x30c   : > { %6027 = vmatprep.mubr.msk.f32.mxu1 %vm1778_vm4, %v5651_v58  ;;  %6073 = vmatpush3.msra.mxu1 %v2665_v21  ;;  %v2870_v58 = vld [vmem:[%s8337_s0] sm:$0xff]  ;;  %s8342_s0 = sld [smem:[#allocation64_spill]] }
 0x30d   : > { %5997 = vmatmul.mubr.msk.f32.gmra.mxu0 %vm1778_vm4, %v5680_v59 }
 0x30e   : > { %5999 = vmatprep.mubr.msk.f32.mxu0 %vm1778_vm4, %v5683_v61 }
 0x30f   : > { %6028 = vmatmul.mubr.msk.f32.gmra.mxu1 %vm1778_vm4, %v5652_v62 }
 0x310   : > { %6030 = vmatprep.mubr.msk.f32.mxu1 %vm1778_vm4, %v5655_v0 }
 0x311   : > { %6000 = vmatmul.mubr.msk.f32.gmra.mxu0 %vm1778_vm4, %v5684_v1 }
 0x312   : > { %6002 = vmatprep.mubr.msk.f32.mxu0 %vm1778_vm4, %v5687_v3  ;;  %v4231_v37 = vld [vmem:[%s8342_s0 + $0x8] sm:$0xff] }
 0x313   : > { %6031 = vmatmul.mubr.msk.f32.gmra.mxu1 %vm1778_vm4, %v5656_v4 }
 0x314   : > { %6033 = vmatprep.mubr.msk.f32.mxu1 %vm1778_vm4, %v5659_v6 }
 0x315   : > { %6003 = vmatmul.mubr.msk.f32.gmra.mxu0 %vm1778_vm4, %v5688_v7 }
 0x316   : > { %6005 = vmatprep.mubr.msk.f32.mxu0 %vm1778_vm4, %v5691_v8 }
 0x317   : > { %6034 = vmatmul.mubr.msk.f32.gmra.mxu1 %vm1778_vm4, %v5660_v9 }
 0x319   : > { %6006 = vmatmul.mubr.msk.f32.gmra.mxu0 %vm1778_vm4, %v5692_v12 }
 0x3bb   : > { %v6014_v22 = vpop.f32.mrf.mxu1 }
 0x3bd   : > { %v5986_v23 = vpop.f32.mrf.mxu0  ;;  %v2325_v24 = vpop.f32.mrf.mxu1 }
 0x3be   : > { %v2331_v25 = vadd.f32 %v6014_v22, %v5986_v23 }
 0x3bf   : > { %v2132_v27 = vpop.f32.mrf.mxu0  ;;  %v6017_v29 = vpop.f32.mrf.mxu1 }
 0x3c0   : > { %v2326_v30 = vadd.f32 %v2325_v24, %v2132_v27  ;;  %v2412_v32 = vadd.f32 %v7867_v26, %v2331_v25 }
 0x3c1   : > { %v5989_v33 = vpop.f32.mrf.mxu0  ;;  %v2335_v35 = vpop.f32.mrf.mxu1 }
 0x3c2   : > { %v2411_v36 = vadd.f32 %v7867_v26, %v2326_v30  ;;  %v2341_v38 = vadd.f32 %v6017_v29, %v5989_v33  ;;  %v2428_v46 = vmax.f32 %v2412_v32, 0.0 }
 0x3c3   : > { %v2142_v39 = vpop.f32.mrf.mxu0  ;;  %v6020_v41 = vpop.f32.mrf.mxu1 }
 0x3c4   : > { %v2427_v43 = vmax.f32 %v2411_v36, 0.0  ;;  %v2336_v44 = vadd.f32 %v2335_v35, %v2142_v39  ;;  %v2414_v48 = vadd.f32 %v7867_v26, %v2341_v38 }
 0x3c5   : > { %v5992_v50 = vpop.f32.mrf.mxu0  ;;  %v2345_v52 = vpop.f32.mrf.mxu1 }
 0x3c6   : > { %v2413_v54 = vadd.f32 %v7867_v26, %v2336_v44  ;;  %v2351_v56 = vadd.f32 %v6020_v41, %v5992_v50  ;;  %6044 = vmatprep.mubr.msk.f32.mxu0 %vm2454_vm5, %v2427_v43  ;;  %v2430_v4 = vmax.f32 %v2414_v48, 0.0 }
 0x3c7   : > { %v2152_v60 = vpop.f32.mrf.mxu0  ;;  %v6023_v62 = vpop.f32.mrf.mxu1  ;;  %6045 = vmatmul.mubr.msk.f32.vlgmr.msra.gmra.mxu0 %vm2454_vm5, %v2428_v46 }
 0x3c8   : > { %v2429_v0 = vmax.f32 %v2413_v54, 0.0  ;;  %v2346_v2 = vadd.f32 %v2345_v52, %v2152_v60  ;;  %6101 = vmatpush3.msra.mxu0 %v2871_v16  ;;  %v2416_v6 = vadd.f32 %v7867_v26, %v2351_v56 }
 0x3c9   : > { %v5995_v9 = vpop.f32.mrf.mxu0  ;;  %v2355_v15 = vpop.f32.mrf.mxu1  ;;  %6102 = vmatprep.subr.mxu0 %v2870_v58 }
 0x3ca   : > { %v2415_v17 = vadd.f32 %v7867_v26, %v2346_v2  ;;  %v2361_v20 = vadd.f32 %v6023_v62, %v5995_v9  ;;  %6047 = vmatprep.mubr.msk.f32.mxu0 %vm2454_vm5, %v2429_v0  ;;  %6103 = vmatpush3.msra.mxu0 %v2870_v58  ;;  %v2432_v25 = vmax.f32 %v2416_v6, 0.0 }
 0x3cb   : > { %v2162_v21 = vpop.f32.mrf.mxu0  ;;  %v6026_v22 = vpop.f32.mrf.mxu1  ;;  %6048 = vmatmul.mubr.msk.f32.gmra.mxu0 %vm2454_vm5, %v2430_v4 }
 0x3cc   : > { %v2431_v23 = vmax.f32 %v2415_v17, 0.0  ;;  %v2356_v24 = vadd.f32 %v2355_v15, %v2162_v21  ;;  %v2418_v16 = vadd.f32 %v7867_v26, %v2361_v20 }
 0x3cd   : > { %v5998_v27 = vpop.f32.mrf.mxu0  ;;  %v2365_v29 = vpop.f32.mrf.mxu1 }
 0x3ce   : > { %v2417_v30 = vadd.f32 %v7867_v26, %v2356_v24  ;;  %v2371_v32 = vadd.f32 %v6026_v22, %v5998_v27  ;;  %6050 = vmatprep.mubr.msk.f32.mxu0 %vm2454_vm5, %v2431_v23  ;;  %v2434_v39 = vmax.f32 %v2418_v16, 0.0 }
 0x3cf   : > { %v2172_v33 = vpop.f32.mrf.mxu0  ;;  %v6029_v35 = vpop.f32.mrf.mxu1  ;;  %6051 = vmatmul.mubr.msk.f32.gmra.mxu0 %vm2454_vm5, %v2432_v25 }
 0x3d0   : > { %v2433_v36 = vmax.f32 %v2417_v30, 0.0  ;;  %v2366_v38 = vadd.f32 %v2365_v29, %v2172_v33  ;;  %v2420_v41 = vadd.f32 %v7867_v26, %v2371_v32 }
 0x3d1   : > { %v6001_v43 = vpop.f32.mrf.mxu0  ;;  %v2375_v44 = vpop.f32.mrf.mxu1 }
 0x3d2   : > { %v2419_v46 = vadd.f32 %v7867_v26, %v2366_v38  ;;  %v2381_v48 = vadd.f32 %v6029_v35, %v6001_v43  ;;  %6053 = vmatprep.mubr.msk.f32.mxu0 %vm2454_vm5, %v2433_v36  ;;  %v2436_v58 = vmax.f32 %v2420_v41, 0.0  ;;  %v2664_v38 = vld [vmem:[%s8338_s10] sm:$0xff] }
 0x3d3   : > { %v2182_v50 = vpop.f32.mrf.mxu0  ;;  %v6032_v52 = vpop.f32.mrf.mxu1  ;;  %6054 = vmatmul.mubr.msk.f32.gmra.mxu0 %vm2454_vm5, %v2434_v39  ;;  %6074 = vmatprep.subr.mxu1 %v2664_v38  ;;  %v5485_v39 = vld [vmem:[#allocation8] ss:$0 sm:$0xff] }
 0x3d4   : > { %v2435_v54 = vmax.f32 %v2419_v46, 0.0  ;;  %v2376_v56 = vadd.f32 %v2375_v44, %v2182_v50  ;;  %v2422_v60 = vadd.f32 %v7867_v26, %v2381_v48  ;;  %6075 = vmatpush3.msra.mxu1 %v2664_v38 }
 0x3d5   : > { %v6004_v62 = vpop.f32.mrf.mxu0  ;;  %v2385_v0 = vpop.f32.mrf.mxu1 }
 0x3d6   : > { %v2421_v2 = vadd.f32 %v7867_v26, %v2376_v56  ;;  %v2391_v4 = vadd.f32 %v6032_v52, %v6004_v62  ;;  %6056 = vmatprep.mubr.msk.f32.mxu0 %vm2454_vm5, %v2435_v54  ;;  %v2438_v20 = vmax.f32 %v2422_v60, 0.0  ;;  %v2868_v60 = vld [vmem:[%s8339_s1] sm:$0xff] }
 0x3d7   : > { %v2192_v6 = vpop.f32.mrf.mxu0  ;;  %v6035_v9 = vpop.f32.mrf.mxu1  ;;  %6057 = vmatmul.mubr.msk.f32.gmra.mxu0 %vm2454_vm5, %v2436_v58 }
 0x3d8   : > { %v2437_v15 = vmax.f32 %v2421_v2, 0.0  ;;  %v2386_v17 = vadd.f32 %v2385_v0, %v2192_v6  ;;  %v2424_v21 = vadd.f32 %v7867_v26, %v2391_v4 }
 0x3d9   : > { %v6007_v22 = vpop.f32.mrf.mxu0  ;;  %v2395_v25 = vpop.f32.mrf.mxu1 }
 0x3da   : > { %v2423_v23 = vadd.f32 %v7867_v26, %v2386_v17  ;;  %v2401_v24 = vadd.f32 %v6035_v9, %v6007_v22  ;;  %6059 = vmatprep.mubr.msk.f32.mxu0 %vm2454_vm5, %v2437_v15  ;;  %v2440_v30 = vmax.f32 %v2424_v21, 0.0 }
 0x3db   : > { %v2202_v16 = vpop.f32.mrf.mxu0  ;;  %6060 = vmatmul.mubr.msk.f32.gmra.mxu0 %vm2454_vm5, %v2438_v20 }
 0x3dc   : > { %v2439_v27 = vmax.f32 %v2423_v23, 0.0  ;;  %v2396_v29 = vadd.f32 %v2395_v25, %v2202_v16  ;;  %v2426_v32 = vadd.f32 %v7867_v26, %v2401_v24 }
 0x3de   : > { %v2425_v33 = vadd.f32 %v7867_v26, %v2396_v29  ;;  %6062 = vmatprep.mubr.msk.f32.mxu0 %vm2454_vm5, %v2439_v27  ;;  %v2442_v36 = vmax.f32 %v2426_v32, 0.0  ;;  %v2869_v26 = vld [vmem:[%s8339_s1 + $0x8] sm:$0xff]  ;;  %s8345_s1 = sld [smem:[#allocation57_spill]] }
 0x3df   : > { %6063 = vmatmul.mubr.msk.f32.gmra.mxu0 %vm2454_vm5, %v2440_v30  ;;  %6107 = vmatprep.subr.mxu1 %v2869_v26 }
 0x3e0   : > { %v2441_v35 = vmax.f32 %v2425_v33, 0.0 }
 0x3e2   : > { %6065 = vmatprep.mubr.msk.f32.mxu0 %vm2454_vm5, %v2441_v35 }
 0x3e3   : > { %6066 = vmatmul.mubr.msk.f32.gmra.mxu0 %vm2454_vm5, %v2442_v36 }
 0x3e4   : > { %6104 = vmatprep.mubr.msk.f32.mxu0 %vm1778_vm4, %v7736_v14 }
 0x3e7   : > { %6105 = vmatmul.mubr.msk.f32.vlgmr.msra.gmra.mxu0 %vm1778_vm4, %v7734_v13 }
 0x487   : > { %v6046_v41 = vpop.f32.mrf.mxu0 }
 0x488   : > { %v2575_v43 = vadd.f32 %v6046_v41, %v5485_v39 }
 0x489   : > { %v2569_v44 = vpop.f32.mrf.mxu0 }
 0x48a   : > { %v2570_v46 = vadd.f32 %v5485_v39, %v2569_v44  ;;  %v2649_v52 = vmax.f32 %v2575_v43, 0.0 }
 0x48b   : > { %v6049_v48 = vpop.f32.mrf.mxu0 }
 0x48c   : > { %v2648_v50 = vmax.f32 %v2570_v46, 0.0  ;;  %v2585_v54 = vadd.f32 %v6049_v48, %v5485_v39 }
 0x48d   : > { %v2579_v56 = vpop.f32.mrf.mxu0 }
 0x48e   : > { %v2580_v58 = vadd.f32 %v5485_v39, %v2579_v56  ;;  %6076 = vmatprep.mubr.msk.f32.mxu1 %vm2454_vm5, %v2648_v50  ;;  %v2651_v2 = vmax.f32 %v2585_v54, 0.0 }
 0x48f   : > { %v6052_v62 = vpop.f32.mrf.mxu0  ;;  %6077 = vmatmul.mubr.msk.f32.vlgmr.msra.gmra.mxu1 %vm2454_vm5, %v2649_v52 }
 0x490   : > { %v2650_v0 = vmax.f32 %v2580_v58, 0.0  ;;  %6108 = vmatpush3.msra.mxu1 %v2869_v26  ;;  %v2595_v4 = vadd.f32 %v6052_v62, %v5485_v39 }
 0x491   : > { %v2589_v6 = vpop.f32.mrf.mxu0  ;;  %6109 = vmatprep.subr.mxu1 %v2868_v60 }
 0x492   : > { %v2590_v9 = vadd.f32 %v5485_v39, %v2589_v6  ;;  %6079 = vmatprep.mubr.msk.f32.mxu1 %vm2454_vm5, %v2650_v0  ;;  %6110 = vmatpush3.msra.mxu1 %v2868_v60  ;;  %v2653_v20 = vmax.f32 %v2595_v4, 0.0  ;;  %v3022_v4 = vld [vmem:[%s8340_s16] sm:$0xff] }
 0x493   : > { %v6055_v15 = vpop.f32.mrf.mxu0  ;;  %6080 = vmatmul.mubr.msk.f32.gmra.mxu1 %vm2454_vm5, %v2651_v2 }
 0x494   : > { %v2652_v17 = vmax.f32 %v2590_v9, 0.0  ;;  %v2605_v21 = vadd.f32 %v6055_v15, %v5485_v39  ;;  %v5502_v9 = vld [vmem:[#allocation9] ss:$0 sm:$0xff] }
 0x495   : > { %v2599_v22 = vpop.f32.mrf.mxu0 }
 0x496   : > { %v2600_v23 = vadd.f32 %v5485_v39, %v2599_v22  ;;  %6082 = vmatprep.mubr.msk.f32.mxu1 %vm2454_vm5, %v2652_v17  ;;  %v2655_v16 = vmax.f32 %v2605_v21, 0.0 }
 0x497   : > { %v6058_v24 = vpop.f32.mrf.mxu0  ;;  %6083 = vmatmul.mubr.msk.f32.gmra.mxu1 %vm2454_vm5, %v2653_v20 }
 0x498   : > { %v2654_v25 = vmax.f32 %v2600_v23, 0.0  ;;  %v2615_v27 = vadd.f32 %v6058_v24, %v5485_v39 }
 0x499   : > { %v2609_v29 = vpop.f32.mrf.mxu0 }
 0x49a   : > { %v2610_v30 = vadd.f32 %v5485_v39, %v2609_v29  ;;  %6085 = vmatprep.mubr.msk.f32.mxu1 %vm2454_vm5, %v2654_v25  ;;  %v2657_v35 = vmax.f32 %v2615_v27, 0.0 }
 0x49b   : > { %v6061_v32 = vpop.f32.mrf.mxu0  ;;  %6086 = vmatmul.mubr.msk.f32.gmra.mxu1 %vm2454_vm5, %v2655_v16 }
 0x49c   : > { %v2656_v33 = vmax.f32 %v2610_v30, 0.0  ;;  %v2625_v36 = vadd.f32 %v6061_v32, %v5485_v39 }
 0x49d   : > { %v2619_v38 = vpop.f32.mrf.mxu0 }
 0x49e   : > { %v2620_v26 = vadd.f32 %v5485_v39, %v2619_v38  ;;  %6088 = vmatprep.mubr.msk.f32.mxu1 %vm2454_vm5, %v2656_v33  ;;  %v2659_v44 = vmax.f32 %v2625_v36, 0.0 }
 0x49f   : > { %v6064_v41 = vpop.f32.mrf.mxu0  ;;  %6089 = vmatmul.mubr.msk.f32.gmra.mxu1 %vm2454_vm5, %v2657_v35 }
 0x4a0   : > { %v2658_v43 = vmax.f32 %v2620_v26, 0.0  ;;  %v2635_v46 = vadd.f32 %v6064_v41, %v5485_v39 }
 0x4a1   : > { %v2629_v48 = vpop.f32.mrf.mxu0 }
 0x4a2   : > { %v2630_v50 = vadd.f32 %v5485_v39, %v2629_v48  ;;  %6091 = vmatprep.mubr.msk.f32.mxu1 %vm2454_vm5, %v2658_v43  ;;  %v2661_v56 = vmax.f32 %v2635_v46, 0.0 }
 0x4a3   : > { %v6067_v52 = vpop.f32.mrf.mxu0  ;;  %6092 = vmatmul.mubr.msk.f32.gmra.mxu1 %vm2454_vm5, %v2659_v44 }
 0x4a4   : > { %v2660_v54 = vmax.f32 %v2630_v50, 0.0  ;;  %v2645_v58 = vadd.f32 %v6067_v52, %v5485_v39 }
 0x4a5   : > { %v2639_v60 = vpop.f32.mrf.mxu0 }
 0x4a6   : > { %v2640_v62 = vadd.f32 %v5485_v39, %v2639_v60  ;;  %6094 = vmatprep.mubr.msk.f32.mxu1 %vm2454_vm5, %v2660_v54  ;;  %v2663_v2 = vmax.f32 %v2645_v58, 0.0  ;;  %v3023_v39 = vld [vmem:[%s8340_s16 + $0x8] sm:$0xff] }
 0x4a7   : > { %6095 = vmatmul.mubr.msk.f32.gmra.mxu1 %vm2454_vm5, %v2661_v56  ;;  %6114 = vmatprep.subr.mxu0 %v3023_v39  ;;  %v6106_v54 = vpop.f32.mrf.mxu0 }
 0x4a8   : > { %v2662_v0 = vmax.f32 %v2640_v62, 0.0  ;;  %6115 = vmatpush3.msra.mxu0 %v3023_v39 }
 0x4a9   : > { %6116 = vmatprep.subr.mxu0 %v3022_v4 }
 0x4aa   : > { %6097 = vmatprep.mubr.msk.f32.mxu1 %vm2454_vm5, %v2662_v0  ;;  %6117 = vmatpush3.msra.mxu0 %v3022_v4 }
 0x4ab   : > { %6098 = vmatmul.mubr.msk.f32.gmra.mxu1 %vm2454_vm5, %v2663_v2  ;;  %v2938_v2 = vpop.f32.mrf.mxu0  ;;  %6170 = vmatprep.subr.mxu0 %v3404_v18 }
 0x4ac   : > { %6111 = vmatprep.mubr.msk.f32.mxu1 %vm1778_vm4, %v7725_v10 }
 0x4af   : > { %6112 = vmatmul.mubr.msk.f32.vlgmr.msra.gmra.mxu1 %vm1778_vm4, %v7727_v11 }
 0x4b0   : > { %6146 = vmatprep.mubr.msk.f32.mxu1 %vm1778_vm4, %v5663_v19 }
 0x54f   : > { %v6078_v6 = vpop.f32.mrf.mxu1 }
 0x550   : > { %v7936_v20 = vadd.f32 %v6078_v6, %v5502_v9 }
 0x551   : > { %v2789_v15 = vpop.f32.mrf.mxu1 }
 0x552   : > { %v7934_v17 = vadd.f32 %v5502_v9, %v2789_v15 }
 0x553   : > { %v6081_v10 = vpop.f32.mrf.mxu1 }
 0x554   : > { %6118 = vmatprep.mubr.msk.f32.mxu0 %vm1778_vm4, %v7934_v17  ;;  %v7944_v21 = vadd.f32 %v6081_v10, %v5502_v9 }
 0x555   : > { %v2799_v11 = vpop.f32.mrf.mxu1  ;;  %6119 = vmatmul.mubr.msk.f32.vlgmr.msra.gmra.mxu0 %vm1778_vm4, %v7936_v20 }
 0x556   : > { %v7942_v19 = vadd.f32 %v5502_v9, %v2799_v11  ;;  %6171 = vmatpush3.msra.mxu0 %v3404_v18 }
 0x557   : > { %v6084_v22 = vpop.f32.mrf.mxu1  ;;  %6172 = vmatprep.subr.mxu0 %v3403_v28 }
 0x558   : > { %6121 = vmatprep.mubr.msk.f32.mxu0 %vm1778_vm4, %v7942_v19  ;;  %v7952_v25 = vadd.f32 %v6084_v22, %v5502_v9  ;;  %6173 = vmatpush3.msra.mxu0 %v3403_v28 }
 0x559   : > { %v2809_v23 = vpop.f32.mrf.mxu1  ;;  %6122 = vmatmul.mubr.msk.f32.gmra.mxu0 %vm1778_vm4, %v7944_v21 }
 0x55a   : > { %v7950_v24 = vadd.f32 %v5502_v9, %v2809_v23 }
 0x55b   : > { %v6087_v16 = vpop.f32.mrf.mxu1 }
 0x55c   : > { %6124 = vmatprep.mubr.msk.f32.mxu0 %vm1778_vm4, %v7950_v24  ;;  %v7960_v30 = vadd.f32 %v6087_v16, %v5502_v9 }
 0x55d   : > { %v2819_v27 = vpop.f32.mrf.mxu1  ;;  %6125 = vmatmul.mubr.msk.f32.gmra.mxu0 %vm1778_vm4, %v7952_v25 }
 0x55e   : > { %v7958_v29 = vadd.f32 %v5502_v9, %v2819_v27 }
 0x55f   : > { %v6090_v32 = vpop.f32.mrf.mxu1 }
 0x560   : > { %6127 = vmatprep.mubr.msk.f32.mxu0 %vm1778_vm4, %v7958_v29  ;;  %v7968_v36 = vadd.f32 %v6090_v32, %v5502_v9  ;;  %v4230_v32 = vld [vmem:[%s8342_s0] sm:$0xff]  ;;  %s8343_s0 = sld [smem:[#allocation46_spill]] }
 0x561   : > { %v2829_v33 = vpop.f32.mrf.mxu1  ;;  %6128 = vmatmul.mubr.msk.f32.gmra.mxu0 %vm1778_vm4, %v7960_v30 }
 0x562   : > { %v7966_v35 = vadd.f32 %v5502_v9, %v2829_v33 }
 0x563   : > { %v6093_v38 = vpop.f32.mrf.mxu1 }
 0x564   : > { %6130 = vmatprep.mubr.msk.f32.mxu0 %vm1778_vm4, %v7966_v35  ;;  %v7976_v43 = vadd.f32 %v6093_v38, %v5502_v9 }
 0x565   : > { %v2839_v26 = vpop.f32.mrf.mxu1  ;;  %6131 = vmatmul.mubr.msk.f32.gmra.mxu0 %vm1778_vm4, %v7968_v36 }
 0x566   : > { %v7974_v41 = vadd.f32 %v5502_v9, %v2839_v26 }
 0x567   : > { %v6096_v44 = vpop.f32.mrf.mxu1 }
 0x568   : > { %6133 = vmatprep.mubr.msk.f32.mxu0 %vm1778_vm4, %v7974_v41  ;;  %v7984_v50 = vadd.f32 %v6096_v44, %v5502_v9 }
 0x569   : > { %v2849_v46 = vpop.f32.mrf.mxu1  ;;  %6134 = vmatmul.mubr.msk.f32.gmra.mxu0 %vm1778_vm4, %v7976_v43 }
 0x56a   : > { %v7982_v48 = vadd.f32 %v5502_v9, %v2849_v46 }
 0x56b   : > { %v6099_v52 = vpop.f32.mrf.mxu1 }
 0x56c   : > { %6136 = vmatprep.mubr.msk.f32.mxu0 %vm1778_vm4, %v7982_v48  ;;  %v7992_v60 = vadd.f32 %v6099_v52, %v5502_v9 }
 0x56d   : > { %v2859_v56 = vpop.f32.mrf.mxu1  ;;  %6137 = vmatmul.mubr.msk.f32.gmra.mxu0 %vm1778_vm4, %v7984_v50 }
 0x56e   : > { %v7990_v58 = vadd.f32 %v5502_v9, %v2859_v56 }
 0x56f   : > { %v6113_v62 = vpop.f32.mrf.mxu1 }
 0x570   : > { %v3019_v0 = vadd.f32 %v6113_v62, %v6106_v54  ;;  %6139 = vmatprep.mubr.msk.f32.mxu0 %vm1778_vm4, %v7990_v58 }
 0x571   : > { %v3013_v39 = vpop.f32.mrf.mxu1  ;;  %6140 = vmatmul.mubr.msk.f32.gmra.mxu0 %vm1778_vm4, %v7992_v60 }
 0x572   : > { %v3014_v4 = vadd.f32 %v3013_v39, %v2938_v2  ;;  %6142 = vmatprep.subr.mxu1 %v3019_v0 }
 0x573   : > { %6143 = vmatpush3.msra.mxu1 %v3019_v0 }
 0x574   : > { %6144 = vmatprep.subr.mxu1 %v3014_v4 }
 0x575   : > { %6145 = vmatpush3.msra.mxu1 %v3014_v4 }
 0x576   : > { %6147 = vmatmul.mubr.msk.f32.vlgmr.msra.gmra.mxu1 %vm1778_vm4, %v5664_v31  ;;  %v3402_v31 = vld [vmem:[%s8341_s28 + $0x8] sm:$0xff] }
 0x577   : > { %6149 = vmatprep.mubr.msk.f32.mxu1 %vm1778_vm4, %v5667_v34  ;;  %6174 = vmatprep.subr.mxu0 %v3402_v31  ;;  %v3401_v34 = vld [vmem:[%s8341_s28] sm:$0xff] }
 0x578   : > { %6175 = vmatpush3.msra.mxu0 %v3402_v31 }
 0x579   : > { %6176 = vmatprep.subr.mxu0 %v3401_v34 }
 0x57a   : > { %6150 = vmatmul.mubr.msk.f32.gmra.mxu1 %vm1778_vm4, %v5668_v40  ;;  %6177 = vmatpush3.msra.mxu0 %v3401_v34 }
 0x57b   : > { %6152 = vmatprep.mubr.msk.f32.mxu1 %vm1778_vm4, %v5671_v42  ;;  %6280 = vmatprep.subr.mxu0 %v4231_v37 }
 0x57e   : > { %6153 = vmatmul.mubr.msk.f32.gmra.mxu1 %vm1778_vm4, %v5672_v47 }
 0x57f   : > { %6155 = vmatprep.mubr.msk.f32.mxu1 %vm1778_vm4, %v5675_v49 }
 0x582   : > { %6156 = vmatmul.mubr.msk.f32.gmra.mxu1 %vm1778_vm4, %v5676_v53 }
 0x583   : > { %6158 = vmatprep.mubr.msk.f32.mxu1 %vm1778_vm4, %v5679_v55 }
 0x586   : > { %6159 = vmatmul.mubr.msk.f32.gmra.mxu1 %vm1778_vm4, %v5680_v59 }
 0x587   : > { %6161 = vmatprep.mubr.msk.f32.mxu1 %vm1778_vm4, %v5683_v61  ;;  %v8048_v61 = vld [vmem:[#allocation11] ss:$0 sm:$0xff] }
 0x58a   : > { %6162 = vmatmul.mubr.msk.f32.gmra.mxu1 %vm1778_vm4, %v5684_v1 }
 0x58b   : > { %6164 = vmatprep.mubr.msk.f32.mxu1 %vm1778_vm4, %v5687_v3 }
 0x58e   : > { %6165 = vmatmul.mubr.msk.f32.gmra.mxu1 %vm1778_vm4, %v5688_v7 }
 0x58f   : > { %6167 = vmatprep.mubr.msk.f32.mxu1 %vm1778_vm4, %v5691_v8 }
 0x592   : > { %6168 = vmatmul.mubr.msk.f32.gmra.mxu1 %vm1778_vm4, %v5692_v12 }
 0x615   : > { %v6120_v40 = vpop.f32.mrf.mxu0 }
 0x617   : > { %v3138_v42 = vpop.f32.mrf.mxu0 }
 0x619   : > { %v6123_v45 = vpop.f32.mrf.mxu0 }
 0x61b   : > { %v3148_v47 = vpop.f32.mrf.mxu0 }
 0x61d   : > { %v6126_v49 = vpop.f32.mrf.mxu0 }
 0x61f   : > { %v3158_v51 = vpop.f32.mrf.mxu0 }
 0x621   : > { %v6129_v53 = vpop.f32.mrf.mxu0 }
 0x623   : > { %v3168_v55 = vpop.f32.mrf.mxu0 }
 0x625   : > { %v6132_v63 = vpop.f32.mrf.mxu0 }
 0x627   : > { %v3178_v6 = vpop.f32.mrf.mxu0 }
 0x629   : > { %v6135_v33 = vpop.f32.mrf.mxu0 }
 0x62b   : > { %v3188_v0 = vpop.f32.mrf.mxu0 }
 0x636   : > { %v6148_v57 = vpop.f32.mrf.mxu1 }
 0x637   : > { %v3289_v59 = vadd.f32 %v6148_v57, %v6120_v40  ;;  %v6138_v40 = vpop.f32.mrf.mxu0 }
 0x638   : > { %v3283_v1 = vpop.f32.mrf.mxu1 }
 0x639   : > { %v3284_v3 = vadd.f32 %v3283_v1, %v3138_v42  ;;  %v3370_v5 = vadd.f32 %v8048_v61, %v3289_v59  ;;  %v3198_v59 = vpop.f32.mrf.mxu0 }
 0x63a   : > { %v6151_v7 = vpop.f32.mrf.mxu1 }
 0x63b   : > { %v3369_v8 = vadd.f32 %v8048_v61, %v3284_v3  ;;  %v3299_v12 = vadd.f32 %v6151_v7, %v6123_v45  ;;  %v3386_v11 = vmax.f32 %v3370_v5, 0.0 }
 0x63c   : > { %v3293_v9 = vpop.f32.mrf.mxu1 }
 0x63d   : > { %v3385_v15 = vmax.f32 %v3369_v8, 0.0  ;;  %v3294_v10 = vadd.f32 %v3293_v9, %v3148_v47  ;;  %v3372_v22 = vadd.f32 %v8048_v61, %v3299_v12  ;;  %v6141_v9 = vpop.f32.mrf.mxu0 }
 0x63e   : > { %v6154_v23 = vpop.f32.mrf.mxu1 }
 0x63f   : > { %v3371_v16 = vadd.f32 %v8048_v61, %v3294_v10  ;;  %v3309_v27 = vadd.f32 %v6154_v23, %v6126_v49  ;;  %6178 = vmatprep.mubr.msk.f32.mxu0 %vm2454_vm5, %v3385_v15  ;;  %v3388_v46 = vmax.f32 %v3372_v22, 0.0 }
 0x640   : > { %v3303_v38 = vpop.f32.mrf.mxu1  ;;  %6179 = vmatmul.mubr.msk.f32.vlgmr.msra.gmra.mxu0 %vm2454_vm5, %v3386_v11 }
 0x641   : > { %v3387_v26 = vmax.f32 %v3371_v16, 0.0  ;;  %v3304_v44 = vadd.f32 %v3303_v38, %v3158_v51  ;;  %6281 = vmatpush3.msra.mxu0 %v4231_v37  ;;  %v3374_v52 = vadd.f32 %v8048_v61, %v3309_v27 }
 0x642   : > { %v6157_v54 = vpop.f32.mrf.mxu1  ;;  %6282 = vmatprep.subr.mxu0 %v4230_v32 }
 0x643   : > { %v3373_v56 = vadd.f32 %v8048_v61, %v3304_v44  ;;  %v3319_v62 = vadd.f32 %v6157_v54, %v6129_v53  ;;  %6181 = vmatprep.mubr.msk.f32.mxu0 %vm2454_vm5, %v3387_v26  ;;  %6283 = vmatpush3.msra.mxu0 %v4230_v32  ;;  %v3390_v18 = vmax.f32 %v3374_v52, 0.0 }
 0x644   : > { %v3313_v2 = vpop.f32.mrf.mxu1  ;;  %6182 = vmatmul.mubr.msk.f32.gmra.mxu0 %vm2454_vm5, %v3388_v46 }
 0x645   : > { %v3389_v39 = vmax.f32 %v3373_v56, 0.0  ;;  %v3314_v4 = vadd.f32 %v3313_v2, %v3168_v55  ;;  %v3376_v28 = vadd.f32 %v8048_v61, %v3319_v62 }
 0x646   : > { %v6160_v31 = vpop.f32.mrf.mxu1 }
 0x647   : > { %v3375_v34 = vadd.f32 %v8048_v61, %v3314_v4  ;;  %v3329_v37 = vadd.f32 %v6160_v31, %v6132_v63  ;;  %6184 = vmatprep.mubr.msk.f32.mxu0 %vm2454_vm5, %v3389_v39  ;;  %v3392_v49 = vmax.f32 %v3376_v28, 0.0 }
 0x648   : > { %v3323_v42 = vpop.f32.mrf.mxu1  ;;  %6185 = vmatmul.mubr.msk.f32.gmra.mxu0 %vm2454_vm5, %v3390_v18 }
 0x649   : > { %v3391_v45 = vmax.f32 %v3375_v34, 0.0  ;;  %v3324_v47 = vadd.f32 %v3323_v42, %v3178_v6  ;;  %v3378_v51 = vadd.f32 %v8048_v61, %v3329_v37 }
 0x64a   : > { %v6163_v53 = vpop.f32.mrf.mxu1 }
 0x64b   : > { %v3377_v55 = vadd.f32 %v8048_v61, %v3324_v47  ;;  %v3339_v57 = vadd.f32 %v6163_v53, %v6135_v33  ;;  %6187 = vmatprep.mubr.msk.f32.mxu0 %vm2454_vm5, %v3391_v45  ;;  %v3394_v5 = vmax.f32 %v3378_v51, 0.0  ;;  %v3208_v33 = vpop.f32.mrf.mxu0 }
 0x64c   : > { %v3333_v1 = vpop.f32.mrf.mxu1  ;;  %6188 = vmatmul.mubr.msk.f32.gmra.mxu0 %vm2454_vm5, %v3392_v49  ;;  %v5556_v49 = vld [vmem:[#allocation12] ss:$0 sm:$0xff] }
 0x64d   : > { %v3393_v63 = vmax.f32 %v3377_v55, 0.0  ;;  %v3334_v3 = vadd.f32 %v3333_v1, %v3188_v0  ;;  %v3380_v7 = vadd.f32 %v8048_v61, %v3339_v57  ;;  %v8088_v0 = vld [vmem:[%s8343_s0] sm:$0xff]   ;;  %s8344_s0 = sld [smem:[#allocation58_spill]] }
 0x64e   : > { %v6166_v8 = vpop.f32.mrf.mxu1 }
 0x64f   : > { %v3379_v12 = vadd.f32 %v8048_v61, %v3334_v3  ;;  %v3349_v6 = vadd.f32 %v6166_v8, %v6138_v40  ;;  %6190 = vmatprep.mubr.msk.f32.mxu0 %vm2454_vm5, %v3393_v63  ;;  %v3396_v22 = vmax.f32 %v3380_v7, 0.0 }
 0x650   : > { %v3343_v15 = vpop.f32.mrf.mxu1  ;;  %6191 = vmatmul.mubr.msk.f32.gmra.mxu0 %vm2454_vm5, %v3394_v5 }
 0x651   : > { %v3395_v10 = vmax.f32 %v3379_v12, 0.0  ;;  %v3344_v11 = vadd.f32 %v3343_v15, %v3198_v59  ;;  %v3382_v23 = vadd.f32 %v8048_v61, %v3349_v6 }
 0x652   : > { %v6169_v16 = vpop.f32.mrf.mxu1 }
 0x653   : > { %v3381_v27 = vadd.f32 %v8048_v61, %v3344_v11  ;;  %v3359_v32 = vadd.f32 %v6169_v16, %v6141_v9  ;;  %6193 = vmatprep.mubr.msk.f32.mxu0 %vm2454_vm5, %v3395_v10  ;;  %v3398_v46 = vmax.f32 %v3382_v23, 0.0 }
 0x654   : > { %v3353_v38 = vpop.f32.mrf.mxu1  ;;  %6194 = vmatmul.mubr.msk.f32.gmra.mxu0 %vm2454_vm5, %v3396_v22 }
 0x655   : > { %v3397_v26 = vmax.f32 %v3381_v27, 0.0  ;;  %v3354_v44 = vadd.f32 %v3353_v38, %v3208_v33  ;;  %v3384_v52 = vadd.f32 %v8048_v61, %v3359_v32 }
 0x657   : > { %v3383_v54 = vadd.f32 %v8048_v61, %v3354_v44  ;;  %6196 = vmatprep.mubr.msk.f32.mxu0 %vm2454_vm5, %v3397_v26  ;;  %v3400_v62 = vmax.f32 %v3384_v52, 0.0  ;;  %v5695_v61 = vunpack.c.l.bf16 %v8088_v0 }
 0x658   : > { %6197 = vmatmul.mubr.msk.f32.gmra.mxu0 %vm2454_vm5, %v3398_v46 }
 0x659   : > { %v3399_v56 = vmax.f32 %v3383_v54, 0.0  ;;  %6234 = vmatprep.mubr.f32.mxu1 %v5695_v61 }
 0x65b   : > { %6199 = vmatprep.mubr.msk.f32.mxu0 %vm2454_vm5, %v3399_v56 }
 0x65c   : > { %6200 = vmatmul.mubr.msk.f32.gmra.mxu0 %vm2454_vm5, %v3400_v62 }
 0x65d   : > { %6284 = vmatprep.mubr.msk.f32.mxu0 %vm1778_vm4, %v7736_v14 }
 0x660   : > { %6285 = vmatmul.mubr.msk.f32.vlgmr.msra.gmra.mxu0 %vm1778_vm4, %v7734_v13 }
 0x700   : > { %v6180_v2 = vpop.f32.mrf.mxu0 }
 0x702   : > { %v8091_v39 = vpop.f32.mrf.mxu0 }
 0x704   : > { %v6183_v4 = vpop.f32.mrf.mxu0 }
 0x705   : > { %v3542_v33 = vadd.f32 %v6183_v4, %v5556_v49 }
 0x706   : > { %v3536_v18 = vpop.f32.mrf.mxu0 }
 0x707   : > { %v5576_v52 = vmul.f32 -1.442695, %v3542_v33  ;;  %v3537_v62 = vadd.f32 %v5556_v49, %v3536_v18 }
 0x708   : > { %v6186_v28 = vpop.f32.mrf.mxu0 }
 0x709   : > { %v3552_v38 = vadd.f32 %v6186_v28, %v5556_v49 }
 0x70a   : > { %v3546_v31 = vpop.f32.mrf.mxu0 }
 0x70b   : > { %v3547_v44 = vadd.f32 %v5556_v49, %v3546_v31  ;;  %v5578_v56 = vmul.f32 -1.442695, %v3552_v38  ;;  %v3527_v31 = vadd.f32 %v5556_v49, %v8091_v39 }
 0x70c   : > { %v6189_v34 = vpop.f32.mrf.mxu0 }
 0x70d   : > { %v3562_v23 = vadd.f32 %v6189_v34, %v5556_v49  ;;  %v5577_v61 = vmul.f32 -1.442695, %v3547_v44 }
 0x70e   : > { %v3556_v37 = vpop.f32.mrf.mxu0 }
 0x70f   : > { %v3557_v27 = vadd.f32 %v5556_v49, %v3556_v37  ;;  %v5580_v26 = vmul.f32 -1.442695, %v3562_v23 }
 0x710   : > { %v6192_v40 = vpop.f32.mrf.mxu0 }
 0x711   : > { %v3572_v15 = vadd.f32 %v6192_v40, %v5556_v49  ;;  %v5579_v46 = vmul.f32 -1.442695, %v3557_v27 }
 0x712   : > { %v3566_v42 = vpop.f32.mrf.mxu0 }
 0x713   : > { %v3567_v11 = vadd.f32 %v5556_v49, %v3566_v42  ;;  %v5582_v16 = vmul.f32 -1.442695, %v3572_v15  ;;  %v3532_v42 = vadd.f32 %v6180_v2, %v5556_v49  ;;  %v5573_v2 = vmul.f32 -1.442695, %v3527_v31 }
 0x714   : > { %v6195_v45 = vpop.f32.mrf.mxu0 }
 0x715   : > { %v3582_v57 = vadd.f32 %v6195_v45, %v5556_v49  ;;  %v5581_v32 = vmul.f32 -1.442695, %v3567_v11  ;;  %v5574_v18 = vmul.f32 -1.442695, %v3532_v42 }
 0x716   : > { %v3576_v47 = vpop.f32.mrf.mxu0 }
 0x717   : > { %v3577_v7 = vadd.f32 %v5556_v49, %v3576_v47  ;;  %v5584_v12 = vmul.f32 -1.442695, %v3582_v57  ;;  %v5575_v47 = vmul.f32 -1.442695, %v3537_v62 }
 0x718   : > { %v6198_v51 = vpop.f32.mrf.mxu0 }
 0x719   : > { %v3592_v53 = vadd.f32 %v6198_v51, %v5556_v49  ;;  %v5583_v22 = vmul.f32 -1.442695, %v3577_v7 }
 0x71a   : > { %v3586_v55 = vpop.f32.mrf.mxu0 }
 0x71b   : > { %v5586_v59 = vmul.f32 -1.442695, %v3592_v53  ;;  %v3587_v1 = vadd.f32 %v5556_v49, %v3586_v55 }
 0x71c   : > { %v6201_v63 = vpop.f32.mrf.mxu0 }
 0x71d   : > { %v5585_v3 = vmul.f32 -1.442695, %v3587_v1  ;;  %v3602_v5 = vadd.f32 %v6201_v63, %v5556_v49  ;;  %6617 = vpow2.f32 %v5586_v59 }
 0x71e   : > { %v3596_v8 = vpop.f32.mrf.mxu0 }
 0x71f   : > { %v5588_v6 = vmul.f32 -1.442695, %v3602_v5  ;;  %v3597_v9 = vadd.f32 %v5556_v49, %v3596_v8  ;;  %6619 = vpow2.f32 %v5585_v3 }
 0x721   : > { %v5587_v10 = vmul.f32 -1.442695, %v3597_v9  ;;  %6621 = vpow2.f32 %v5588_v6 }
 0x722   : > { %6623 = vpow2.f32 %v5584_v12 }
 0x723   : > { %6625 = vpow2.f32 %v5587_v10 }
 0x724   : > { %6627 = vpow2.f32 %v5583_v22 }
 0x725   : > { %6629 = vpow2.f32 %v5582_v16 }
 0x726   : > { %6631 = vpow2.f32 %v5581_v32 }
 0x727   : > { %6633 = vpow2.f32 %v5580_v26 }
 0x728   : > { %6635 = vpow2.f32 %v5579_v46 }
 0x729   : > { %6637 = vpow2.f32 %v5576_v52 }
 0x72a   : > { %v6618_v54 = vpop.eup %6617  ;;  %6639 = vpow2.f32 %v5578_v56 }
 0x72b   : > { %v3666_v37 = vadd.f32 1.0, %v6618_v54  ;;  %6641 = vpow2.f32 %v5577_v61 }
 0x72c   : > { %v6620_v40 = vpop.eup %6619 }
 0x72d   : > { %v3665_v51 = vadd.f32 1.0, %v6620_v40 }
 0x72e   : > { %v6622_v34 = vpop.eup %6621 }
 0x72f   : > { %v6624_v45 = vpop.eup %6623  ;;  %v3668_v4 = vadd.f32 1.0, %v6622_v34 }
 0x730   : > { %v6626_v28 = vpop.eup %6625  ;;  %v3664_v57 = vadd.f32 1.0, %v6624_v45 }
 0x731   : > { %6643 = vrcp.f32 %v3668_v4  ;;  %v3667_v53 = vadd.f32 1.0, %v6626_v28  ;;  %v6628_v55 = vpop.eup %6627 }
 0x732   : > { %6645 = vrcp.f32 %v3666_v37  ;;  %v6630_v59 = vpop.eup %6629  ;;  %v3663_v1 = vadd.f32 1.0, %v6628_v55  ;;  %v5696_v55 = vunpack.c.h.bf16 %v8088_v0  ;;  %v6689_v0 = vld [vmem:[#allocation2] sm:$0xff] }
 0x733   : > { %6647 = vrcp.f32 %v3667_v53  ;;  %v6632_v63 = vpop.eup %6631  ;;  %v3662_v3 = vadd.f32 1.0, %v6630_v59  ;;  %v3953_v59 = vld [vmem:[%s8346_s2 + $0x8] sm:$0xff] }
 0x734   : > { %6649 = vpow2.f32 %v5575_v47  ;;  %v6634_v39 = vpop.eup %6633  ;;  %v3661_v49 = vadd.f32 1.0, %v6632_v63  ;;  %v4045_v63 = vld [vmem:[%s8347_s3 + $0x18] sm:$0xff] }
 0x735   : > { %6651 = vrcp.f32 %v3665_v51  ;;  %v6636_v5 = vpop.eup %6635  ;;  %v3660_v8 = vadd.f32 1.0, %v6634_v39  ;;  %v4043_v39 = vld [vmem:[%s8347_s3 + $0x8] sm:$0xff] }
 0x736   : > { %6653 = vpow2.f32 %v5574_v18  ;;  %v6638_v7 = vpop.eup %6637  ;;  %v3659_v9 = vadd.f32 1.0, %v6636_v5 }
 0x737   : > { %6655 = vrcp.f32 %v3664_v57  ;;  %v6640_v12 = vpop.eup %6639  ;;  %v3656_v26 = vadd.f32 1.0, %v6638_v7 }
 0x738   : > { %6657 = vpow2.f32 %v5573_v2  ;;  %v6642_v6 = vpop.eup %6641  ;;  %v3658_v11 = vadd.f32 1.0, %v6640_v12  ;;  %v3952_v2 = vld [vmem:[%s8346_s2] sm:$0xff]  ;;  %s8350_s2 = sld [smem:[#allocation65_spill]] }
 0x739   : > { %6659 = vrcp.f32 %v3663_v1  ;;  %v3657_v27 = vadd.f32 1.0, %v6642_v6  ;;  %v6690_v1 = vld [vmem:[#allocation2 + $0x8] sm:$0xff] }
 0x73a   : > { %6661 = vrcp.f32 %v3662_v3  ;;  %v4044_v3 = vld [vmem:[%s8347_s3 + $0x10] sm:$0xff] }
 0x73b   : > { %6663 = vrcp.f32 %v3661_v49  ;;  %v4042_v49 = vld [vmem:[%s8347_s3] sm:$0xff] }
 0x73c   : > { %6665 = vrcp.f32 %v3660_v8 }
 0x73d   : > { %6667 = vrcp.f32 %v3659_v9 }
 0x73e   : > { %v6644_v15 = vpop.eup %6643  ;;  %6669 = vrcp.f32 %v3658_v11 }
 0x73f   : > { %v6646_v10 = vpop.eup %6645  ;;  %v3716_v22 = vmul.f32 %v6644_v15, %v7992_v60  ;;  %6671 = vrcp.f32 %v3657_v27  ;;  %v5595_v15 = vld [vmem:[#allocation14] ss:$0 sm:$0xff] }
 0x740   : > { %v6648_v23 = vpop.eup %6647  ;;  %v3714_v44 = vmul.f32 %v6646_v10, %v7984_v50  ;;  %6673 = vrcp.f32 %v3656_v26 }
 0x741   : > { %v6650_v16 = vpop.eup %6649  ;;  %6202 = vmatprep.subr.mxu1 %v3716_v22  ;;  %v3715_v32 = vmul.f32 %v6648_v23, %v7990_v58 }
 0x742   : > { %v6652_v33 = vpop.eup %6651  ;;  %6203 = vmatpush3.msra.mxu1 %v3716_v22  ;;  %v3655_v54 = vadd.f32 1.0, %v6650_v16 }
 0x743   : > { %v6654_v38 = vpop.eup %6653  ;;  %6204 = vmatprep.subr.mxu1 %v3715_v32  ;;  %v3713_v60 = vmul.f32 %v6652_v33, %v7982_v48 }
 0x744   : > { %v6656_v46 = vpop.eup %6655  ;;  %6205 = vmatpush3.msra.mxu1 %v3715_v32  ;;  %v3654_v62 = vadd.f32 1.0, %v6654_v38  ;;  %6675 = vrcp.f32 %v3655_v54 }
 0x745   : > { %v6658_v52 = vpop.eup %6657  ;;  %6206 = vmatprep.subr.mxu1 %v3714_v44  ;;  %v3712_v58 = vmul.f32 %v6656_v46, %v7976_v43 }
 0x746   : > { %v6660_v56 = vpop.eup %6659  ;;  %6207 = vmatpush3.msra.mxu1 %v3714_v44  ;;  %v3653_v40 = vadd.f32 1.0, %v6658_v52  ;;  %6677 = vrcp.f32 %v3654_v62  ;;  %v5596_v44 = vld [vmem:[#allocation15] ss:$0 sm:$0xff] }
 0x747   : > { %6208 = vmatprep.subr.mxu1 %v3713_v60  ;;  %v6662_v61 = vpop.eup %6661  ;;  %v3711_v50 = vmul.f32 %v6660_v56, %v7974_v41 }
 0x748   : > { %6209 = vmatpush3.msra.mxu1 %v3713_v60  ;;  %v6664_v34 = vpop.eup %6663  ;;  %v3710_v48 = vmul.f32 %v6662_v61, %v7968_v36  ;;  %6679 = vrcp.f32 %v3653_v40  ;;  %v5599_v40 = vld [vmem:[#allocation17] ss:$0 sm:$0xff] }
 0x749   : > { %6210 = vmatprep.subr.mxu1 %v3712_v58  ;;  %v6666_v42 = vpop.eup %6665  ;;  %v3709_v37 = vmul.f32 %v6664_v34, %v7966_v35 }
 0x74a   : > { %6211 = vmatpush3.msra.mxu1 %v3712_v58  ;;  %v6668_v43 = vpop.eup %6667  ;;  %v3708_v45 = vmul.f32 %v6666_v42, %v7960_v30 }
 0x74b   : > { %6212 = vmatprep.subr.mxu1 %v3711_v50  ;;  %v6670_v4 = vpop.eup %6669  ;;  %v3707_v41 = vmul.f32 %v6668_v43, %v7958_v29  ;;  %v4401_v43 = vld [vmem:[%s8350_s2 + $0x10] sm:$0xff] }
 0x74c   : > { %6213 = vmatpush3.msra.mxu1 %v3711_v50  ;;  %v6672_v28 = vpop.eup %6671  ;;  %v3706_v36 = vmul.f32 %v6670_v4, %v7952_v25  ;;  %v4399_v4 = vld [vmem:[%s8350_s2] sm:$0xff] }
 0x74d   : > { %6214 = vmatprep.subr.mxu1 %v3710_v48  ;;  %v6674_v31 = vpop.eup %6673  ;;  %v3705_v35 = vmul.f32 %v6672_v28, %v7950_v24 }
 0x74e   : > { %6215 = vmatpush3.msra.mxu1 %v3710_v48  ;;  %v3704_v30 = vmul.f32 %v6674_v31, %v7944_v21  ;;  %v3795_v21 = vld [vmem:[%s8344_s0 + $0x8] sm:$0xff]  ;;  %v5606_v31 = vld [vmem:[#allocation18] ss:$0 sm:$0xff] }
 0x74f   : > { %6216 = vmatprep.subr.mxu1 %v3709_v37 }
 0x750   : > { %6217 = vmatpush3.msra.mxu1 %v3709_v37  ;;  %v4402_v37 = vld [vmem:[%s8350_s2 + $0x18] sm:$0xff] }
 0x751   : > { %6218 = vmatprep.subr.mxu1 %v3708_v45  ;;  %v6676_v47 = vpop.eup %6675  ;;  %6294 = vmatprep.subr.mxu0 %v4402_v37 }
 0x752   : > { %6219 = vmatpush3.msra.mxu1 %v3708_v45  ;;  %v3703_v29 = vmul.f32 %v6676_v47, %v7942_v19  ;;  %v3794_v19 = vld [vmem:[%s8344_s0] sm:$0xff]  ;;  %s8348_s0 = sld [smem:[#allocation62_spill]]  ;;  %6295 = vmatpush3.msra.mxu0 %v4402_v37  ;;  %v4400_v45 = vld [vmem:[%s8350_s2 + $0x8] sm:$0xff] }
 0x753   : > { %6220 = vmatprep.subr.mxu1 %v3707_v41  ;;  %v6678_v51 = vpop.eup %6677  ;;  %6296 = vmatprep.subr.mxu0 %v4401_v43  ;;  %s8353_s2 = sld [smem:[#allocation70_spill]] }
 0x754   : > { %6221 = vmatpush3.msra.mxu1 %v3707_v41  ;;  %v3702_v25 = vmul.f32 %v6678_v51, %v7936_v20  ;;  %v3793_v20 = vld [vmem:[%s8345_s1 + $0x8] sm:$0xff]  ;;  %6297 = vmatpush3.msra.mxu0 %v4401_v43  ;;  %v6286_v41 = vpop.f32.mrf.mxu0 }
 0x755   : > { %6222 = vmatprep.subr.mxu1 %v3706_v36  ;;  %v6680_v53 = vpop.eup %6679  ;;  %6298 = vmatprep.subr.mxu0 %v4400_v45 }
 0x756   : > { %6223 = vmatpush3.msra.mxu1 %v3706_v36  ;;  %v3701_v24 = vmul.f32 %v6680_v53, %v7934_v17  ;;  %v3792_v17 = vld [vmem:[%s8345_s1] sm:$0xff]  ;;  %s8349_s1 = sld [smem:[#allocation63_spill]]  ;;  %6299 = vmatpush3.msra.mxu0 %v4400_v45 }
 0x757   : > { %6224 = vmatprep.subr.mxu1 %v3705_v35  ;;  %6300 = vmatprep.subr.mxu0 %v4399_v4 }
 0x758   : > { %6225 = vmatpush3.msra.mxu1 %v3705_v35  ;;  %v4139_v32 = vld [vmem:[%s8348_s0 + $0x18] sm:$0xff]  ;;  %v4138_v33 = vld [vmem:[%s8348_s0 + $0x10] sm:$0xff]  ;;  %v4137_v38 = vld [vmem:[%s8348_s0 + $0x8] sm:$0xff]  ;;  %6301 = vmatpush3.msra.mxu0 %v4399_v4  ;;  %v4298_v35 = vpop.f32.mrf.mxu0 }
 0x759   : > { %6226 = vmatprep.subr.mxu1 %v3704_v30  ;;  %v4136_v26 = vld [vmem:[%s8348_s0] sm:$0xff]  ;;  %s8351_s0 = sld [smem:[#allocation66_spill]] }
 0x75a   : > { %6227 = vmatpush3.msra.mxu1 %v3704_v30 }
 0x75b   : > { %6228 = vmatprep.subr.mxu1 %v3703_v29 }
 0x75c   : > { %6229 = vmatpush3.msra.mxu1 %v3703_v29  ;;  %v4229_v58 = vld [vmem:[%s8349_s1 + $0x8] sm:$0xff]  ;;  %v4228_v61 = vld [vmem:[%s8349_s1] sm:$0xff]  ;;  %s8352_s1 = sld [smem:[#allocation69_spill]] }
 0x75d   : > { %6230 = vmatprep.subr.mxu1 %v3702_v25 }
 0x75e   : > { %6231 = vmatpush3.msra.mxu1 %v3702_v25 }
 0x75f   : > { %6232 = vmatprep.subr.mxu1 %v3701_v24 }
 0x760   : > { %6233 = vmatpush3.msra.mxu1 %v3701_v24  ;;  %v7275_v24 = vmov 0.0  }
 0x761   : > { %6235 = vmatmul.mubr.f32.vlgmr.msra.gmra.mxu1 %v5696_v55  ;;  %6237 = vmatprep.subr.mxu1 %v3795_v21  ;;  %v4579_v55 = vld [vmem:[%s8351_s0 + $0x8] sm:$0xff] }
 0x762   : > { %6238 = vmatpush3.msra.mxu1 %v3795_v21  ;;  %6319 = vmatprep.subr.mxu0 %v7275_v24  ;;  %v5607_v21 = vld [vmem:[#allocation20] ss:$0 sm:$0xff] }
 0x763   : > { %6239 = vmatprep.subr.mxu1 %v3794_v19 }
 0x764   : > { %6240 = vmatpush3.msra.mxu1 %v3794_v19 }
 0x765   : > { %6244 = vmatprep.subr.mxu1 %v3793_v20 }
 0x821   : > { %v6236_v18 = vpop.f32.mrf.mxu1 }
 0x823   : > { %v3783_v57 = vpop.f32.mrf.mxu1 }
 0x824   : > { %6241 = vmatprep.mubr.msk.f32.mxu1 %vm1778_vm4, %v3783_v57 }
 0x825   : > { %6242 = vmatmul.mubr.msk.f32.vlgmr.msra.gmra.mxu1 %vm1778_vm4, %v6236_v18 }
 0x826   : > { %6245 = vmatpush3.msra.mxu1 %v3793_v20  ;;  %6248 = vmatprep.mubr.msk.f32.mxu1 %vm1778_vm4, %v6689_v0 }
 0x827   : > { %6246 = vmatprep.subr.mxu1 %v3792_v17 }
 0x828   : > { %6247 = vmatpush3.msra.mxu1 %v3792_v17 }
 0x829   : > { %6249 = vmatmul.mubr.msk.f32.vlgmr.msra.gmra.mxu1 %vm1778_vm4, %v6690_v1  ;;  %6251 = vmatprep.subr.mxu1 %v3953_v59 }
 0x82a   : > { %6252 = vmatpush3.msra.mxu1 %v3953_v59  ;;  %6255 = vmatprep.mubr.msk.f32.mxu1 %vm1778_vm4, %v7736_v14 }
 0x82b   : > { %6253 = vmatprep.subr.mxu1 %v3952_v2 }
 0x82c   : > { %6254 = vmatpush3.msra.mxu1 %v3952_v2 }
 0x82d   : > { %6256 = vmatmul.mubr.msk.f32.vlgmr.msra.gmra.mxu1 %vm1778_vm4, %v7734_v13  ;;  %6258 = vmatprep.subr.mxu1 %v4045_v63 }
 0x82e   : > { %6259 = vmatpush3.msra.mxu1 %v4045_v63 }
 0x82f   : > { %6260 = vmatprep.subr.mxu1 %v4044_v3 }
 0x830   : > { %6261 = vmatpush3.msra.mxu1 %v4044_v3 }
 0x831   : > { %6262 = vmatprep.subr.mxu1 %v4043_v39 }
 0x832   : > { %6263 = vmatpush3.msra.mxu1 %v4043_v39 }
 0x833   : > { %6264 = vmatprep.subr.mxu1 %v4042_v49 }
 0x834   : > { %6265 = vmatpush3.msra.mxu1 %v4042_v49 }
 0x835   : > { %6269 = vmatprep.subr.mxu1 %v4139_v32 }
 0x8e5   : > { %v6243_v5 = vpop.f32.mrf.mxu1 }
 0x8e7   : > { %v3868_v7 = vpop.f32.mrf.mxu1 }
 0x8e9   : > { %v6250_v14 = vpop.f32.mrf.mxu1 }
 0x8ea   : > { %v3949_v12 = vadd.f32 %v6250_v14, %v6243_v5  ;;  %v4581_v14 = vld [vmem:[#allocation21 + $0x8] sm:$0xff] }
 0x8eb   : > { %v3943_v8 = vpop.f32.mrf.mxu1 }
 0x8ec   : > { %v3944_v6 = vadd.f32 %v3943_v8, %v3868_v7  ;;  %v1687_v7 = vld [vmem:[#allocation4] sm:$0x3]  ;;  %v4580_v8 = vld [vmem:[#allocation21] sm:$0xff] }
 0x8ed   : > { %v6257_v13 = vpop.f32.mrf.mxu1 }
 0x8ee   : > { %v4030_v9 = vadd.f32 %v6257_v13, %v3949_v12  ;;  %v6691_v12 = vld [vmem:[#allocation3] sm:$0x3]  ;;  %v4578_v13 = vld [vmem:[%s8351_s0] sm:$0xff]  ;;  %s8354_s0 = sld [smem:[#allocation73_spill]] }
 0x8ef   : > { %v4020_v10 = vpop.f32.mrf.mxu1 }
 0x8f0   : > { %v4029_v11 = vadd.f32 %v4020_v10, %v3944_v6  ;;  %v4039_v22 = vadd.f32 %v5595_v15, %v4030_v9 }
 0x8f2   : > { %v4038_v23 = vadd.f32 %v5595_v15, %v4029_v11  ;;  %v4041_v27 = vmax.f32 %v4039_v22, 0.0  ;;  %v4739_v11 = vld [vmem:[%s8352_s1 + $0x18] sm:$0xff]  ;;  %v4738_v22 = vld [vmem:[%s8352_s1 + $0x10] sm:$0xff] }
 0x8f4   : > { %v4040_v16 = vmax.f32 %v4038_v23, 0.0  ;;  %v4737_v23 = vld [vmem:[%s8352_s1 + $0x8] sm:$0xff]  ;;  %v4990_v4 = vld [vmem:[%s8354_s0 + $0x10] sm:$0xff] }
 0x8f6   : > { %6266 = vmatprep.mubr.msk.f32.mxu1 %vm2454_vm5, %v4040_v16  ;;  %v4736_v16 = vld [vmem:[%s8352_s1] sm:$0xff]  ;;  %s8355_s1 = sld [smem:[#allocation71_spill]] }
 0x8f7   : > { %6267 = vmatmul.mubr.msk.f32.vlgmr.msra.gmra.mxu1 %vm2454_vm5, %v4041_v27  ;;  %v4824_v27 = vld [vmem:[%s8353_s2 + $0x18] sm:$0xff] }
 0x8f8   : > { %6270 = vmatpush3.msra.mxu1 %v4139_v32 }
 0x8f9   : > { %6271 = vmatprep.subr.mxu1 %v4138_v33 }
 0x8fa   : > { %6272 = vmatpush3.msra.mxu1 %v4138_v33  ;;  %v5615_v33 = vld [vmem:[#allocation23] ss:$0 sm:$0xff] }
 0x8fb   : > { %6273 = vmatprep.subr.mxu1 %v4137_v38 }
 0x8fc   : > { %6274 = vmatpush3.msra.mxu1 %v4137_v38 }
 0x8fd   : > { %6275 = vmatprep.subr.mxu1 %v4136_v26 }
 0x8fe   : > { %6276 = vmatpush3.msra.mxu1 %v4136_v26 }
 0x8ff   : > { %6287 = vmatprep.subr.mxu1 %v4229_v58 }
 0x9b7   : > { %v6268_v46 = vpop.f32.mrf.mxu1 }
 0x9b8   : > { %v4131_v52 = vadd.f32 %v6268_v46, %v5596_v44 }
 0x9b9   : > { %v4125_v54 = vpop.f32.mrf.mxu1 }
 0x9ba   : > { %v4126_v60 = vadd.f32 %v5596_v44, %v4125_v54  ;;  %v4135_v62 = vmax.f32 %v4131_v52, 0.0  ;;  %v4823_v52 = vld [vmem:[%s8353_s2 + $0x10] sm:$0xff]  ;;  %v4822_v54 = vld [vmem:[%s8353_s2 + $0x8] sm:$0xff] }
 0x9bc   : > { %v4134_v56 = vmax.f32 %v4126_v60, 0.0  ;;  %v4821_v60 = vld [vmem:[%s8353_s2] sm:$0xff] }
 0x9be   : > { %6277 = vmatprep.mubr.msk.f32.mxu1 %vm2454_vm5, %v4134_v56  ;;  %v5616_v56 = vld [vmem:[#allocation24] ss:$0 sm:$0xff] }
 0x9bf   : > { %6278 = vmatmul.mubr.msk.f32.vlgmr.msra.gmra.mxu1 %vm2454_vm5, %v4135_v62 }
 0x9c0   : > { %6288 = vmatpush3.msra.mxu1 %v4229_v58 }
 0x9c1   : > { %6289 = vmatprep.subr.mxu1 %v4228_v61 }
 0x9c2   : > { %6290 = vmatpush3.msra.mxu1 %v4228_v61 }
 0x9c3   : > { %6305 = vmatprep.subr.mxu1 %v7275_v24 }
 0xa7f   : > { %v6279_v50 = vpop.f32.mrf.mxu1 }
 0xa80   : > { %v4225_v34 = vadd.f32 %v6279_v50, %v5599_v40  ;;  %v4906_v50 = vld [vmem:[#allocation26 + $0x8] sm:$0xff] }
 0xa81   : > { %v4219_v48 = vpop.f32.mrf.mxu1 }
 0xa82   : > { %5158 = vst.msk [vmem:[#allocation2 + $0x8] sm:$0xff] %vm1778_vm4, %v4225_v34  ;;  %v4220_v42 = vadd.f32 %v5599_v40, %v4219_v48  ;;  %v4991_v48 = vld [vmem:[%s8354_s0 + $0x18] sm:$0xff] }
 0xa84   : > { %5157 = vst.msk [vmem:[#allocation2] sm:$0xff] %vm1778_vm4, %v4220_v42  ;;  %6291 = vmatprep.mubr.msk.f32.mxu1 %vm1778_vm4, %v4220_v42 }
 0xa85   : > { %6292 = vmatmul.mubr.msk.f32.vlgmr.msra.gmra.mxu1 %vm1778_vm4, %v4225_v34 }
 0xa86   : > { %6309 = vmatprep.mubr.msk.f32.mxu1 %vm7276_vm6, %v7275_v24 }
 0xb45   : > { %v6293_v28 = vpop.f32.mrf.mxu1 }
 0xb46   : > { %v4385_v36 = vadd.f32 %v6293_v28, %v6286_v41  ;;  %v4989_v41 = vld [vmem:[%s8354_s0 + $0x8] sm:$0xff]  ;;  %v4988_v28 = vld [vmem:[%s8354_s0] sm:$0xff] }
 0xb47   : > { %v4379_v47 = vpop.f32.mrf.mxu1 }
 0xb48   : > { %v4380_v30 = vadd.f32 %v4379_v47, %v4298_v35  ;;  %v4396_v51 = vadd.f32 %v5606_v31, %v4385_v36  ;;  %v5076_v36 = vld [vmem:[%s7510_s14 + $0x18] sm:$0xff] }
 0xb4a   : > { %v4395_v29 = vadd.f32 %v5606_v31, %v4380_v30  ;;  %v4398_v25 = vmax.f32 %v4396_v51, 0.0  ;;  %v5620_v31 = vld [vmem:[#allocation27] ss:$0 sm:$0xff] }
 0xb4c   : > { %v4397_v53 = vmax.f32 %v4395_v29, 0.0  ;;  %v5075_v29 = vld [vmem:[%s7510_s14 + $0x10] sm:$0xff] }
 0xb4e   : > { %6302 = vmatprep.mubr.msk.f32.mxu0 %vm2454_vm5, %v4397_v53  ;;  %v5074_v53 = vld [vmem:[%s7510_s14 + $0x8] sm:$0xff] }
 0xb4f   : > { %6303 = vmatmul.mubr.msk.f32.vlgmr.msra.gmra.mxu0 %vm2454_vm5, %v4398_v25  ;;  %v5073_v25 = vld [vmem:[%s7510_s14] sm:$0xff] }
 0xb50   : > { %6323 = vmatprep.mubr.msk.f32.mxu0 %vm7276_vm6, %v7275_v24  ;;  %6320 = vmatpush3.msra.mxu0 %v4579_v55  ;;  %v5622_v55 = vld [vmem:[#allocation29] ss:$0 sm:$0xff] }
 0xb51   : > { %6321 = vmatprep.subr.mxu0 %v7275_v24 }
 0xb52   : > { %6322 = vmatpush3.msra.mxu0 %v4578_v13 }
 0xb53   : > { %6337 = vmatprep.subr.mxu0 %v7275_v24 }
 0xc0f   : > { %v6304_v19 = vpop.f32.mrf.mxu0 }
 0xc10   : > { %v4488_v20 = vadd.f32 %v6304_v19, %v5607_v21 }
 0xc11   : > { %v4482_v18 = vpop.f32.mrf.mxu0 }
 0xc12   : > { %v5611_v57 = vmul.f32 -1.442695, %v4488_v20  ;;  %v4483_v17 = vadd.f32 %v5607_v21, %v4482_v18 }
 0xc14   : > { %6681 = vpow2.f32 %v5611_v57  ;;  %v5610_v0 = vmul.f32 -1.442695, %v4483_v17  ;;  %v5624_v57 = vld [vmem:[#allocation30] ss:$0 sm:$0xff] }
 0xc16   : > { %6683 = vpow2.f32 %v5610_v0 }
 0xc21   : > { %v6682_v59 = vpop.eup %6681 }
 0xc22   : > { %v4498_v2 = vadd.f32 1.0, %v6682_v59 }
 0xc23   : > { %v6684_v1 = vpop.eup %6683 }
 0xc24   : > { %6685 = vrcp.f32 %v4498_v2  ;;  %v4497_v63 = vadd.f32 1.0, %v6684_v1 }
 0xc26   : > { %6687 = vrcp.f32 %v4497_v63 }
 0xc31   : > { %v6686_v3 = vpop.eup %6685 }
 0xc32   : > { %v4504_v39 = vmul.f32 %v6686_v3, %v4225_v34  ;;  %v4905_v34 = vld [vmem:[#allocation26] sm:$0xff] }
 0xc33   : > { %v6688_v49 = vpop.eup %6687 }
 0xc34   : > { %6306 = vmatpush3.msra.mxu1 %v4504_v39  ;;  %v4503_v5 = vmul.f32 %v6688_v49, %v4220_v42  ;;  %v5618_v42 = vld [vmem:[%s8355_s1] ss:$0 sm:$0xff]  ;;  %s5626_s1 = sshll.u32 %s7528_s26, 1 }
 0xc35   : > { %6307 = vmatprep.subr.mxu1 %v7275_v24  ;;  %s5162_s0 = scalar_lea.vmem %s7520_s25, %s5626_s1 }
 0xc36   : > { %6308 = vmatpush3.msra.mxu1 %v4503_v5 }
 0xc37   : > { %6310 = vmatmul.mubr.msk.f32.vlgmr.msra.gmra.mxu1 %vm1778_vm4, %v1687_v7  ;;  %6312 = vmatprep.subr.mxu1 %v7275_v24 }
 0xc38   : > { %6313 = vmatpush3.msra.mxu1 %v4581_v14  ;;  %6316 = vmatprep.mubr.msk.f32.mxu1 %vm7276_vm6, %v7275_v24 }
 0xc39   : > { %6314 = vmatprep.subr.mxu1 %v7275_v24 }
 0xc3a   : > { %6315 = vmatpush3.msra.mxu1 %v4580_v8 }
 0xc3b   : > { %6317 = vmatmul.mubr.msk.f32.vlgmr.msra.gmra.mxu1 %vm1778_vm4, %v6691_v12  ;;  %6326 = vmatprep.subr.mxu1 %v7275_v24 }
 0xc3c   : > { %6334 = vmatprep.mubr.msk.f32.mxu1 %vm7276_vm6, %v7275_v24  ;;  %6327 = vmatpush3.msra.mxu1 %v4739_v11 }
 0xc3d   : > { %6328 = vmatprep.subr.mxu1 %v7275_v24 }
 0xc3e   : > { %6329 = vmatpush3.msra.mxu1 %v4738_v22 }
 0xc3f   : > { %6330 = vmatprep.subr.mxu1 %v7275_v24 }
 0xc40   : > { %6331 = vmatpush3.msra.mxu1 %v4737_v23 }
 0xc41   : > { %6332 = vmatprep.subr.mxu1 %v7275_v24 }
 0xc42   : > { %6333 = vmatpush3.msra.mxu1 %v4736_v16 }
 0xc43   : > { %6348 = vmatprep.subr.mxu1 %v7275_v24 }
 0xcf7   : > { %v4574_v6 = vpop.f32.mrf.mxu1 }
 0xcf8   : > { %6324 = vmatmul.mubr.msk.f32.vlgmr.msra.gmra.mxu0 %vm1778_vm4, %v4574_v6 }
 0xcf9   : > { %v6311_v9 = vpop.f32.mrf.mxu1  ;;  %6345 = vmatprep.mubr.msk.f32.mxu0 %vm7276_vm6, %v7275_v24  ;;  %6338 = vmatpush3.msra.mxu0 %v4824_v27 }
 0xcfa   : > { %6339 = vmatprep.subr.mxu0 %v7275_v24 }
 0xcfb   : > { %v4650_v15 = vpop.f32.mrf.mxu1  ;;  %6340 = vmatpush3.msra.mxu0 %v4823_v52 }
 0xcfc   : > { %6341 = vmatprep.subr.mxu0 %v7275_v24 }
 0xcfd   : > { %v6318_v10 = vpop.f32.mrf.mxu1  ;;  %6342 = vmatpush3.msra.mxu0 %v4822_v54 }
 0xcfe   : > { %6343 = vmatprep.subr.mxu0 %v7275_v24 }
 0xcff   : > { %6344 = vmatpush3.msra.mxu0 %v4821_v60 }
 0xd00   : > { %6355 = vmatprep.subr.mxu0 %v7275_v24 }
 0xdb8   : > { %v4723_v32 = vpop.f32.mrf.mxu0 }
 0xdb9   : > { %v4724_v38 = vadd.f32 %v4723_v32, %v4650_v15 }
 0xdba   : > { %v6325_v26 = vpop.f32.mrf.mxu0 }
 0xdbb   : > { %v4734_v44 = vadd.f32 %v5615_v33, %v4724_v38 }
 0xdbd   : > { %v4735_v46 = vmax.f32 %v4734_v44, 0.0 }
 0xdbf   : > { %6335 = vmatmul.mubr.msk.f32.vlgmr.msra.gmra.mxu1 %vm2454_vm5, %v4735_v46 }
 0xdc0   : > { %6352 = vmatprep.mubr.msk.f32.mxu1 %vm7276_vm6, %v7275_v24  ;;  %6349 = vmatpush3.msra.mxu1 %v4906_v50 }
 0xdc1   : > { %6350 = vmatprep.subr.mxu1 %v7275_v24 }
 0xdc2   : > { %6351 = vmatpush3.msra.mxu1 %v4905_v34 }
 0xdc3   : > { %6366 = vmatprep.subr.mxu1 %v7275_v24 }
 0xe7f   : > { %v4816_v62 = vpop.f32.mrf.mxu1 }
 0xe80   : > { %v4817_v58 = vadd.f32 %v5616_v56, %v4816_v62 }
 0xe81   : > { %v6336_v61 = vpop.f32.mrf.mxu1 }
 0xe82   : > { %v4820_v40 = vmax.f32 %v4817_v58, 0.0 }
 0xe84   : > { %6346 = vmatmul.mubr.msk.f32.vlgmr.msra.gmra.mxu0 %vm2454_vm5, %v4820_v40 }
 0xe85   : > { %6363 = vmatprep.mubr.msk.f32.mxu0 %vm7276_vm6, %v7275_v24  ;;  %6356 = vmatpush3.msra.mxu0 %v4991_v48 }
 0xe86   : > { %6357 = vmatprep.subr.mxu0 %v7275_v24 }
 0xe87   : > { %6358 = vmatpush3.msra.mxu0 %v4990_v4 }
 0xe88   : > { %6359 = vmatprep.subr.mxu0 %v7275_v24 }
 0xe89   : > { %6360 = vmatpush3.msra.mxu0 %v4989_v41 }
 0xe8a   : > { %6361 = vmatprep.subr.mxu0 %v7275_v24 }
 0xe8b   : > { %6362 = vmatpush3.msra.mxu0 %v4988_v28 }
 0xf44   : > { %v4901_v37 = vpop.f32.mrf.mxu0 }
 0xf45   : > { %v4902_v43 = vadd.f32 %v5618_v42, %v4901_v37 }
 0xf46   : > { %v6347_v45 = vpop.f32.mrf.mxu0 }
 0xf47   : > { %5160 = vst.msk [vmem:[#allocation3] sm:$0x3] %vm5159_vm7, %v4902_v43  ;;  %6353 = vmatmul.mubr.msk.f32.vlgmr.msra.gmra.mxu1 %vm1778_vm4, %v4902_v43 }
 0xf48   : > { %6374 = vmatprep.mubr.msk.f32.mxu1 %vm7276_vm6, %v7275_v24  ;;  %6367 = vmatpush3.msra.mxu1 %v5076_v36 }
 0xf49   : > { %6368 = vmatprep.subr.mxu1 %v7275_v24 }
 0xf4a   : > { %6369 = vmatpush3.msra.mxu1 %v5075_v29 }
 0xf4b   : > { %6370 = vmatprep.subr.mxu1 %v7275_v24 }
 0xf4c   : > { %6371 = vmatpush3.msra.mxu1 %v5074_v53 }
 0xf4d   : > { %6372 = vmatprep.subr.mxu1 %v7275_v24 }
 0xf4e   : > { %6373 = vmatpush3.msra.mxu1 %v5073_v25 }
0x1007   : > { %v4983_v35 = vpop.f32.mrf.mxu1 }
0x1008   : > { %v4984_v47 = vadd.f32 %v5620_v31, %v4983_v35 }
0x1009   : > { %v6354_v30 = vpop.f32.mrf.mxu1 }
0x100a   : > { %v4987_v51 = vmax.f32 %v4984_v47, 0.0 }
0x100c   : > { %6364 = vmatmul.mubr.msk.f32.vlgmr.msra.gmra.mxu0 %vm2454_vm5, %v4987_v51 }
0x10cc   : > { %v5068_v21 = vpop.f32.mrf.mxu0 }
0x10cd   : > { %v5069_v19 = vadd.f32 %v5622_v55, %v5068_v21 }
0x10ce   : > { %v6365_v20 = vpop.f32.mrf.mxu0 }
0x10cf   : > { %v5072_v18 = vmax.f32 %v5069_v19, 0.0 }
0x10d1   : > { %6375 = vmatmul.mubr.msk.f32.vlgmr.msra.gmra.mxu1 %vm2454_vm5, %v5072_v18 }
0x1191   : > { %v5153_v17 = vpop.f32.mrf.mxu1 }
0x1192   : > { %v5154_v0 = vadd.f32 %v5624_v57, %v5153_v17 }
0x1193   : > { %v6376_v59 = vpop.f32.mrf.mxu1 }
0x1194   : > { %5163 = vst [vmem:[%s5162_s0] sm:$0x3] %v5154_v0 }
0x1195 PF: > { %s115_s22 = sadd.s32 1, %s7206_s22  }
0x1196   : > { %p112_p0 = scmp.ge.s32.totalorder %s115_s22, 4  }
0x1198   :  { %114 = sbr.rel (!%p112_p0) target bundleno = 92 (0x5c), region = 356 }
0x119d   :  { %5175 = vsyncpa [#allocation5], 1 }
0x119e   :  { %5177 = vsyncpa [#allocation5 + $0x1], 1 }
0x119f   :  { %5178 = vsyncpa [#allocation7], 1 }
0x11a0   :  { %5179 = vsyncpa [#allocation10], 1 }
0x11a1   :  { %5180 = vsyncpa [#allocation13], 1 }
0x11a2   :  { %5181 = vsyncpa [#allocation16], 1 }
0x11a3   :  { %5182 = vsyncpa [#allocation19], 1 }
0x11a4   :  { %5183 = vsyncpa [#allocation22], 1 }
0x11a5   :  { %5184 = vsyncpa [#allocation25], 1 }
0x11a6   :  { %5185 = vsyncpa [#allocation28], 1 }
0x11a7   :  { %5186 = vsyncpa [#allocation31], 1 }

</bundles_post_ra>
